<compile_context>
chip_gen: v7x
topology: tpu7x:2x2x1
jax: 0.10.0
libtpu: 0.0.40
codegen_flags: <defaults>
</compile_context>

<pallas_src>
import jax
import jax.numpy as jnp
import numpy as np
from jax.experimental import pallas as pl
from jax.experimental.pallas import tpu as pltpu

# ----------------------------- hyperparameters ------------------------------
VOCAB_SIZE = 50
EMBED_SIZE = 32
C_SIZE = 4
KERNEL_NUM = 110          # logical conv output channels (PyTorch)
K_PAD = 128               # lane-padded channel count used inside the kernel
KERNEL_SIZES = (2, 3, 4)
BATCH = 2
SEQ_LEN = 22

L_OUTS = tuple(SEQ_LEN - k + 1 for k in KERNEL_SIZES)          # (21, 20, 19)
P_OUTS = tuple(l // k for l, k in zip(L_OUTS, KERNEL_SIZES))   # (10, 6, 4)
P_TOTAL = sum(P_OUTS)                                          # 20
assert KERNEL_NUM * P_TOTAL == 2200  # matches nn.Linear(2200, c_size)


# ------------------------------ fused kernel --------------------------------
def fused_kernel(x_smem,                      # (B, L) int32 token ids  [SMEM]
                 tbl_ref,                     # (V, E)                  [VMEM]
                 w2_ref, w3_ref, w4_ref,      # (k, E, K_PAD)           [VMEM]
                 b2_ref, b3_ref, b4_ref,      # (1, K_PAD)              [VMEM]
                 lw_ref,                      # (P_TOTAL, K_PAD, C)     [VMEM]
                 lb_ref,                      # (1, C)                  [VMEM]
                 o_ref,                       # (B, C)                  [VMEM]
                 emb_scratch):                # (B, L, E) VMEM scratch
    # ---- embedding lookup: in-kernel gather (padding_idx=0 row is zero) ----
    for b in range(BATCH):
        for l in range(SEQ_LEN):
            emb_scratch[b, l, :] = tbl_ref[x_smem[b, l], :]
    emb = emb_scratch[...]                                     # (B, L, E) f32

    w_refs = (w2_ref, w3_ref, w4_ref)
    b_refs = (b2_ref, b3_ref, b4_ref)

    logits = jnp.zeros((BATCH, C_SIZE), jnp.float32)
    pt = 0
    for i, k in enumerate(KERNEL_SIZES):
        l_out = L_OUTS[i]
        p_out = P_OUTS[i]
        # Conv1d as a per-tap sum of (B, l_out, E) @ (E, K_PAD) MXU matmuls,
        # accumulated in f32 (lane-dense K_PAD=128 output tiles).
        acc = jnp.zeros((BATCH, l_out, K_PAD), jnp.float32)
        for dk in range(k):
            acc = acc + jax.lax.dot_general(
                emb[:, dk:dk + l_out, :], w_refs[i][dk],
                dimension_numbers=(((2,), (0,)), ((), ())),
                preferred_element_type=jnp.float32)
        acc = acc + b_refs[i][...]             # (1, K_PAD) broadcast bias add
        # MaxPool1d(kernel=k, stride=k) fused with the Linear: every pooled
        # (B, K_PAD) row is contracted immediately with the matching
        # (K_PAD, C) slice of the pre-permuted linear weight, so no pooled
        # tensor / transpose / concat / flatten / masked store materializes.
        for p in range(p_out):
            win = acc[:, p * k:(p + 1) * k, :]                 # (B, k, K_PAD)
            wmax = jnp.max(win, axis=1)                        # (B, K_PAD)
            logits = logits + jnp.dot(wmax, lw_ref[pt],
                                      preferred_element_type=jnp.float32)
            pt += 1

    logits = logits + lb_ref[...]                              # (1, C) bias
    # TODO(synk): nn.Dropout(p=0.2) is identity here (eval mode).
    # LogSoftmax(dim=1)
    m = jnp.max(logits, axis=1, keepdims=True)
    s = logits - m
    lse = jnp.log(jnp.sum(jnp.exp(s), axis=1, keepdims=True))
    o_ref[...] = s - lse


# --------------------------- parameter preparation --------------------------
def prepare_params(raw):
    """One-time repacking: pad channels 110->128 and pre-permute lin_w so the
    kernel consumes it per pooled position (P_TOTAL, K_PAD, C).  The padded
    channel rows of lin_w are zero, preserving exact results."""
    pad_k = K_PAD - KERNEL_NUM
    conv_w = [jnp.pad(w, ((0, 0), (0, 0), (0, pad_k))) for w in raw["conv_w"]]
    conv_b = [jnp.pad(b, ((0, 0), (0, pad_k))) for b in raw["conv_b"]]
    # PyTorch flatten order: feature f = channel * P_TOTAL + pooled_position.
    lw = raw["lin_w"].reshape(KERNEL_NUM, P_TOTAL, C_SIZE)
    lw = jnp.transpose(lw, (1, 0, 2))                 # (P_TOTAL, K, C)
    lw = jnp.pad(lw, ((0, 0), (0, pad_k), (0, 0)))    # (P_TOTAL, K_PAD, C)
    return {"embedding": raw["embedding"], "conv_w": conv_w, "conv_b": conv_b,
            "lin_w": lw, "lin_b": raw["lin_b"]}


# ------------------------------ pallas wrapper -------------------------------
@jax.jit
def discriminator_forward(x_idx, prep):
    grid_spec = pltpu.PrefetchScalarGridSpec(
        num_scalar_prefetch=1,          # token ids -> SMEM
        grid=(1,),
        in_specs=[
            pl.BlockSpec((VOCAB_SIZE, EMBED_SIZE), lambda i, xs: (0, 0)),
            pl.BlockSpec((KERNEL_SIZES[0], EMBED_SIZE, K_PAD),
                         lambda i, xs: (0, 0, 0)),
            pl.BlockSpec((KERNEL_SIZES[1], EMBED_SIZE, K_PAD),
                         lambda i, xs: (0, 0, 0)),
            pl.BlockSpec((KERNEL_SIZES[2], EMBED_SIZE, K_PAD),
                         lambda i, xs: (0, 0, 0)),
            pl.BlockSpec((1, K_PAD), lambda i, xs: (0, 0)),
            pl.BlockSpec((1, K_PAD), lambda i, xs: (0, 0)),
            pl.BlockSpec((1, K_PAD), lambda i, xs: (0, 0)),
            pl.BlockSpec((P_TOTAL, K_PAD, C_SIZE), lambda i, xs: (0, 0, 0)),
            pl.BlockSpec((1, C_SIZE), lambda i, xs: (0, 0)),
        ],
        out_specs=pl.BlockSpec((BATCH, C_SIZE), lambda i, xs: (0, 0)),
        scratch_shapes=[pltpu.VMEM((BATCH, SEQ_LEN, EMBED_SIZE), jnp.float32)],
    )
    return pl.pallas_call(
        fused_kernel,
        out_shape=jax.ShapeDtypeStruct((BATCH, C_SIZE), jnp.float32),
        grid_spec=grid_spec,
        # Everything fits in VMEM at these shapes on v5e/v6e/v7x; a parallel
        # batch grid axis is only needed if BATCH/SEQ_LEN are scaled up.
        compiler_params=pltpu.CompilerParams(
            dimension_semantics=("arbitrary",)),
    )(x_idx, prep["embedding"], prep["conv_w"][0], prep["conv_w"][1],
      prep["conv_w"][2], prep["conv_b"][0], prep["conv_b"][1],
      prep["conv_b"][2], prep["lin_w"], prep["lin_b"])


# ------------------------------ reference (jnp) ------------------------------
def reference_forward(x_idx, raw):
    emb = jnp.take(raw["embedding"], x_idx, axis=0)
    pools = []
    for i, k in enumerate(KERNEL_SIZES):
        w, b = raw["conv_w"][i], raw["conv_b"][i]
        l_out = SEQ_LEN - k + 1
        acc = sum(jnp.einsum("ble,ek->blk", emb[:, dk:dk + l_out, :], w[dk])
                  for dk in range(k)) + b
        p_out = l_out // k
        pooled = acc[:, :p_out * k, :].reshape(
            BATCH, p_out, k, KERNEL_NUM).max(axis=2)            # (B, P, K)
        pools.append(jnp.transpose(pooled, (0, 2, 1)))          # (B, K, P)
    flat = jnp.concatenate(pools, axis=-1).reshape(BATCH, -1)   # (B, 2200)
    logits = flat @ raw["lin_w"] + raw["lin_b"]
    return jax.nn.log_softmax(logits, axis=1)


# --------------------------------- main --------------------------------------
if __name__ == "__main__":
    key = jax.random.PRNGKey(0)
    keys = jax.random.split(key, 12)

    # Deterministic synthetic parameters (shapes follow the PyTorch __init__;
    # conv weights stored tap-major as (k, E, K)).
    emb_table = 0.1 * jax.random.normal(keys[0], (VOCAB_SIZE, EMBED_SIZE),
                                        jnp.float32)
    emb_table = emb_table.at[0].set(0.0)  # padding_idx=0

    conv_w, conv_b = [], []
    for i, k in enumerate(KERNEL_SIZES):
        conv_w.append(0.05 * jax.random.normal(
            keys[1 + i], (k, EMBED_SIZE, KERNEL_NUM), jnp.float32))
        conv_b.append(0.01 * jax.random.normal(
            keys[4 + i], (1, KERNEL_NUM), jnp.float32))

    lin_w = 0.02 * jax.random.normal(keys[7], (KERNEL_NUM * P_TOTAL, C_SIZE),
                                     jnp.float32)
    lin_b = 0.01 * jax.random.normal(keys[8], (1, C_SIZE), jnp.float32)

    raw_params = {"embedding": emb_table, "conv_w": conv_w, "conv_b": conv_b,
                  "lin_w": lin_w, "lin_b": lin_b}
    prep_params = prepare_params(raw_params)

    # Deterministic example input: token ids (B, L), includes padding id 0.
    x = jax.random.randint(keys[9], (BATCH, SEQ_LEN), 0, VOCAB_SIZE,
                           dtype=jnp.int32)
    x = x.at[0, -3:].set(0)

    out = jax.block_until_ready(discriminator_forward(x, prep_params))
    assert out.shape == (BATCH, C_SIZE)

    ref = jax.block_until_ready(reference_forward(x, raw_params))
    np.testing.assert_allclose(np.asarray(out), np.asarray(ref),
                               rtol=1e-4, atol=1e-4)
    # Rows of LogSoftmax output must exponentiate-sum to ~1.
    np.testing.assert_allclose(np.exp(np.asarray(out)).sum(axis=1),
                               np.ones(BATCH), rtol=1e-4, atol=1e-4)

    print("KERNEL_OK")
</pallas_src>

<mosaic_0001>
module attributes {stable_mosaic.version = 11 : i64} {
  func.func @fused_kernel(%arg0: i32, %arg1: memref<2x22xi32, #tpu.memory_space<smem>>, %arg2: memref<50x32xf32, #tpu.memory_space<vmem>>, %arg3: memref<2x32x128xf32, #tpu.memory_space<vmem>>, %arg4: memref<3x32x128xf32, #tpu.memory_space<vmem>>, %arg5: memref<4x32x128xf32, #tpu.memory_space<vmem>>, %arg6: memref<1x128xf32, #tpu.memory_space<vmem>>, %arg7: memref<1x128xf32, #tpu.memory_space<vmem>>, %arg8: memref<1x128xf32, #tpu.memory_space<vmem>>, %arg9: memref<20x128x4xf32, #tpu.memory_space<vmem>>, %arg10: memref<1x4xf32, #tpu.memory_space<vmem>>, %arg11: memref<2x4xf32, #tpu.memory_space<vmem>>, %arg12: memref<2x22x32xf32, #tpu.memory_space<vmem>>) attributes {dimension_semantics = [#tpu.dimension_semantics<arbitrary>], iteration_bounds = array<i64: 1>, scalar_prefetch = 1 : i64, scratch_operands = 1 : i64, tpu.core_type = #tpu.core_type<tc>, window_params = [{pipeline_mode = #tpu.pipeline_mode<synchronous>, transform_indices = @transform_0, window_bounds = array<i64: 50, 32>}, {pipeline_mode = #tpu.pipeline_mode<synchronous>, transform_indices = @transform_1, window_bounds = array<i64: 2, 32, 128>}, {pipeline_mode = #tpu.pipeline_mode<synchronous>, transform_indices = @transform_2, window_bounds = array<i64: 3, 32, 128>}, {pipeline_mode = #tpu.pipeline_mode<synchronous>, transform_indices = @transform_3, window_bounds = array<i64: 4, 32, 128>}, {pipeline_mode = #tpu.pipeline_mode<synchronous>, transform_indices = @transform_4, window_bounds = array<i64: 1, 128>}, {pipeline_mode = #tpu.pipeline_mode<synchronous>, transform_indices = @transform_5, window_bounds = array<i64: 1, 128>}, {pipeline_mode = #tpu.pipeline_mode<synchronous>, transform_indices = @transform_6, window_bounds = array<i64: 1, 128>}, {pipeline_mode = #tpu.pipeline_mode<synchronous>, transform_indices = @transform_7, window_bounds = array<i64: 20, 128, 4>}, {pipeline_mode = #tpu.pipeline_mode<synchronous>, transform_indices = @transform_8, window_bounds = array<i64: 1, 4>}, {pipeline_mode = #tpu.pipeline_mode<synchronous>, transform_indices = @transform_9, window_bounds = array<i64: 2, 4>}]} {
    %c0 = arith.constant 0 : index
    %c0_0 = arith.constant 0 : index
    %0 = memref.load %arg1[%c0, %c0_0] : memref<2x22xi32, #tpu.memory_space<smem>>
    %1 = arith.index_cast %0 : i32 to index
    %c0_1 = arith.constant 0 : index
    %2 = vector.load %arg2[%1, %c0_1] : memref<50x32xf32, #tpu.memory_space<vmem>>, vector<1x32xf32>
    %3 = vector.shape_cast %2 : vector<1x32xf32> to vector<32xf32>
    %c0_2 = arith.constant 0 : index
    %c0_3 = arith.constant 0 : index
    %c0_4 = arith.constant 0 : index
    %4 = vector.load %arg12[%c0_2, %c0_3, %c0_4] : memref<2x22x32xf32, #tpu.memory_space<vmem>>, vector<1x1x32xf32>
    %5 = vector.shape_cast %4 : vector<1x1x32xf32> to vector<32xf32>
    %6 = vector.shape_cast %3 : vector<32xf32> to vector<1x1x32xf32>
    tpu.vector_store %arg12[%c0_2, %c0_3, %c0_4], %6 {strides = array<i32>} : memref<2x22x32xf32, #tpu.memory_space<vmem>>, vector<1x1x32xf32>,
    %c0_5 = arith.constant 0 : index
    %c1 = arith.constant 1 : index
    %7 = memref.load %arg1[%c0_5, %c1] : memref<2x22xi32, #tpu.memory_space<smem>>
    %8 = arith.index_cast %7 : i32 to index
    %c0_6 = arith.constant 0 : index
    %9 = vector.load %arg2[%8, %c0_6] : memref<50x32xf32, #tpu.memory_space<vmem>>, vector<1x32xf32>
    %10 = vector.shape_cast %9 : vector<1x32xf32> to vector<32xf32>
    %c0_7 = arith.constant 0 : index
    %c1_8 = arith.constant 1 : index
    %c0_9 = arith.constant 0 : index
    %11 = vector.load %arg12[%c0_7, %c1_8, %c0_9] : memref<2x22x32xf32, #tpu.memory_space<vmem>>, vector<1x1x32xf32>
    %12 = vector.shape_cast %11 : vector<1x1x32xf32> to vector<32xf32>
    %13 = vector.shape_cast %10 : vector<32xf32> to vector<1x1x32xf32>
    tpu.vector_store %arg12[%c0_7, %c1_8, %c0_9], %13 {strides = array<i32>} : memref<2x22x32xf32, #tpu.memory_space<vmem>>, vector<1x1x32xf32>,
    %c0_10 = arith.constant 0 : index
    %c2 = arith.constant 2 : index
    %14 = memref.load %arg1[%c0_10, %c2] : memref<2x22xi32, #tpu.memory_space<smem>>
    %15 = arith.index_cast %14 : i32 to index
    %c0_11 = arith.constant 0 : index
    %16 = vector.load %arg2[%15, %c0_11] : memref<50x32xf32, #tpu.memory_space<vmem>>, vector<1x32xf32>
    %17 = vector.shape_cast %16 : vector<1x32xf32> to vector<32xf32>
    %c0_12 = arith.constant 0 : index
    %c2_13 = arith.constant 2 : index
    %c0_14 = arith.constant 0 : index
    %18 = vector.load %arg12[%c0_12, %c2_13, %c0_14] : memref<2x22x32xf32, #tpu.memory_space<vmem>>, vector<1x1x32xf32>
    %19 = vector.shape_cast %18 : vector<1x1x32xf32> to vector<32xf32>
    %20 = vector.shape_cast %17 : vector<32xf32> to vector<1x1x32xf32>
    tpu.vector_store %arg12[%c0_12, %c2_13, %c0_14], %20 {strides = array<i32>} : memref<2x22x32xf32, #tpu.memory_space<vmem>>, vector<1x1x32xf32>,
    %c0_15 = arith.constant 0 : index
    %c3 = arith.constant 3 : index
    %21 = memref.load %arg1[%c0_15, %c3] : memref<2x22xi32, #tpu.memory_space<smem>>
    %22 = arith.index_cast %21 : i32 to index
    %c0_16 = arith.constant 0 : index
    %23 = vector.load %arg2[%22, %c0_16] : memref<50x32xf32, #tpu.memory_space<vmem>>, vector<1x32xf32>
    %24 = vector.shape_cast %23 : vector<1x32xf32> to vector<32xf32>
    %c0_17 = arith.constant 0 : index
    %c3_18 = arith.constant 3 : index
    %c0_19 = arith.constant 0 : index
    %25 = vector.load %arg12[%c0_17, %c3_18, %c0_19] : memref<2x22x32xf32, #tpu.memory_space<vmem>>, vector<1x1x32xf32>
    %26 = vector.shape_cast %25 : vector<1x1x32xf32> to vector<32xf32>
    %27 = vector.shape_cast %24 : vector<32xf32> to vector<1x1x32xf32>
    tpu.vector_store %arg12[%c0_17, %c3_18, %c0_19], %27 {strides = array<i32>} : memref<2x22x32xf32, #tpu.memory_space<vmem>>, vector<1x1x32xf32>,
    %c0_20 = arith.constant 0 : index
    %c4 = arith.constant 4 : index
    %28 = memref.load %arg1[%c0_20, %c4] : memref<2x22xi32, #tpu.memory_space<smem>>
    %29 = arith.index_cast %28 : i32 to index
    %c0_21 = arith.constant 0 : index
    %30 = vector.load %arg2[%29, %c0_21] : memref<50x32xf32, #tpu.memory_space<vmem>>, vector<1x32xf32>
    %31 = vector.shape_cast %30 : vector<1x32xf32> to vector<32xf32>
    %c0_22 = arith.constant 0 : index
    %c4_23 = arith.constant 4 : index
    %c0_24 = arith.constant 0 : index
    %32 = vector.load %arg12[%c0_22, %c4_23, %c0_24] : memref<2x22x32xf32, #tpu.memory_space<vmem>>, vector<1x1x32xf32>
    %33 = vector.shape_cast %32 : vector<1x1x32xf32> to vector<32xf32>
    %34 = vector.shape_cast %31 : vector<32xf32> to vector<1x1x32xf32>
    tpu.vector_store %arg12[%c0_22, %c4_23, %c0_24], %34 {strides = array<i32>} : memref<2x22x32xf32, #tpu.memory_space<vmem>>, vector<1x1x32xf32>,
    %c0_25 = arith.constant 0 : index
    %c5 = arith.constant 5 : index
    %35 = memref.load %arg1[%c0_25, %c5] : memref<2x22xi32, #tpu.memory_space<smem>>
    %36 = arith.index_cast %35 : i32 to index
    %c0_26 = arith.constant 0 : index
    %37 = vector.load %arg2[%36, %c0_26] : memref<50x32xf32, #tpu.memory_space<vmem>>, vector<1x32xf32>
    %38 = vector.shape_cast %37 : vector<1x32xf32> to vector<32xf32>
    %c0_27 = arith.constant 0 : index
    %c5_28 = arith.constant 5 : index
    %c0_29 = arith.constant 0 : index
    %39 = vector.load %arg12[%c0_27, %c5_28, %c0_29] : memref<2x22x32xf32, #tpu.memory_space<vmem>>, vector<1x1x32xf32>
    %40 = vector.shape_cast %39 : vector<1x1x32xf32> to vector<32xf32>
    %41 = vector.shape_cast %38 : vector<32xf32> to vector<1x1x32xf32>
    tpu.vector_store %arg12[%c0_27, %c5_28, %c0_29], %41 {strides = array<i32>} : memref<2x22x32xf32, #tpu.memory_space<vmem>>, vector<1x1x32xf32>,
    %c0_30 = arith.constant 0 : index
    %c6 = arith.constant 6 : index
    %42 = memref.load %arg1[%c0_30, %c6] : memref<2x22xi32, #tpu.memory_space<smem>>
    %43 = arith.index_cast %42 : i32 to index
    %c0_31 = arith.constant 0 : index
    %44 = vector.load %arg2[%43, %c0_31] : memref<50x32xf32, #tpu.memory_space<vmem>>, vector<1x32xf32>
    %45 = vector.shape_cast %44 : vector<1x32xf32> to vector<32xf32>
    %c0_32 = arith.constant 0 : index
    %c6_33 = arith.constant 6 : index
    %c0_34 = arith.constant 0 : index
    %46 = vector.load %arg12[%c0_32, %c6_33, %c0_34] : memref<2x22x32xf32, #tpu.memory_space<vmem>>, vector<1x1x32xf32>
    %47 = vector.shape_cast %46 : vector<1x1x32xf32> to vector<32xf32>
    %48 = vector.shape_cast %45 : vector<32xf32> to vector<1x1x32xf32>
    tpu.vector_store %arg12[%c0_32, %c6_33, %c0_34], %48 {strides = array<i32>} : memref<2x22x32xf32, #tpu.memory_space<vmem>>, vector<1x1x32xf32>,
    %c0_35 = arith.constant 0 : index
    %c7 = arith.constant 7 : index
    %49 = memref.load %arg1[%c0_35, %c7] : memref<2x22xi32, #tpu.memory_space<smem>>
    %50 = arith.index_cast %49 : i32 to index
    %c0_36 = arith.constant 0 : index
    %51 = vector.load %arg2[%50, %c0_36] : memref<50x32xf32, #tpu.memory_space<vmem>>, vector<1x32xf32>
    %52 = vector.shape_cast %51 : vector<1x32xf32> to vector<32xf32>
    %c0_37 = arith.constant 0 : index
    %c7_38 = arith.constant 7 : index
    %c0_39 = arith.constant 0 : index
    %53 = vector.load %arg12[%c0_37, %c7_38, %c0_39] : memref<2x22x32xf32, #tpu.memory_space<vmem>>, vector<1x1x32xf32>
    %54 = vector.shape_cast %53 : vector<1x1x32xf32> to vector<32xf32>
    %55 = vector.shape_cast %52 : vector<32xf32> to vector<1x1x32xf32>
    tpu.vector_store %arg12[%c0_37, %c7_38, %c0_39], %55 {strides = array<i32>} : memref<2x22x32xf32, #tpu.memory_space<vmem>>, vector<1x1x32xf32>,
    %c0_40 = arith.constant 0 : index
    %c8 = arith.constant 8 : index
    %56 = memref.load %arg1[%c0_40, %c8] : memref<2x22xi32, #tpu.memory_space<smem>>
    %57 = arith.index_cast %56 : i32 to index
    %c0_41 = arith.constant 0 : index
    %58 = vector.load %arg2[%57, %c0_41] : memref<50x32xf32, #tpu.memory_space<vmem>>, vector<1x32xf32>
    %59 = vector.shape_cast %58 : vector<1x32xf32> to vector<32xf32>
    %c0_42 = arith.constant 0 : index
    %c8_43 = arith.constant 8 : index
    %c0_44 = arith.constant 0 : index
    %60 = vector.load %arg12[%c0_42, %c8_43, %c0_44] : memref<2x22x32xf32, #tpu.memory_space<vmem>>, vector<1x1x32xf32>
    %61 = vector.shape_cast %60 : vector<1x1x32xf32> to vector<32xf32>
    %62 = vector.shape_cast %59 : vector<32xf32> to vector<1x1x32xf32>
    tpu.vector_store %arg12[%c0_42, %c8_43, %c0_44], %62 {strides = array<i32>} : memref<2x22x32xf32, #tpu.memory_space<vmem>>, vector<1x1x32xf32>,
    %c0_45 = arith.constant 0 : index
    %c9 = arith.constant 9 : index
    %63 = memref.load %arg1[%c0_45, %c9] : memref<2x22xi32, #tpu.memory_space<smem>>
    %64 = arith.index_cast %63 : i32 to index
    %c0_46 = arith.constant 0 : index
    %65 = vector.load %arg2[%64, %c0_46] : memref<50x32xf32, #tpu.memory_space<vmem>>, vector<1x32xf32>
    %66 = vector.shape_cast %65 : vector<1x32xf32> to vector<32xf32>
    %c0_47 = arith.constant 0 : index
    %c9_48 = arith.constant 9 : index
    %c0_49 = arith.constant 0 : index
    %67 = vector.load %arg12[%c0_47, %c9_48, %c0_49] : memref<2x22x32xf32, #tpu.memory_space<vmem>>, vector<1x1x32xf32>
    %68 = vector.shape_cast %67 : vector<1x1x32xf32> to vector<32xf32>
    %69 = vector.shape_cast %66 : vector<32xf32> to vector<1x1x32xf32>
    tpu.vector_store %arg12[%c0_47, %c9_48, %c0_49], %69 {strides = array<i32>} : memref<2x22x32xf32, #tpu.memory_space<vmem>>, vector<1x1x32xf32>,
    %c0_50 = arith.constant 0 : index
    %c10 = arith.constant 10 : index
    %70 = memref.load %arg1[%c0_50, %c10] : memref<2x22xi32, #tpu.memory_space<smem>>
    %71 = arith.index_cast %70 : i32 to index
    %c0_51 = arith.constant 0 : index
    %72 = vector.load %arg2[%71, %c0_51] : memref<50x32xf32, #tpu.memory_space<vmem>>, vector<1x32xf32>
    %73 = vector.shape_cast %72 : vector<1x32xf32> to vector<32xf32>
    %c0_52 = arith.constant 0 : index
    %c10_53 = arith.constant 10 : index
    %c0_54 = arith.constant 0 : index
    %74 = vector.load %arg12[%c0_52, %c10_53, %c0_54] : memref<2x22x32xf32, #tpu.memory_space<vmem>>, vector<1x1x32xf32>
    %75 = vector.shape_cast %74 : vector<1x1x32xf32> to vector<32xf32>
    %76 = vector.shape_cast %73 : vector<32xf32> to vector<1x1x32xf32>
    tpu.vector_store %arg12[%c0_52, %c10_53, %c0_54], %76 {strides = array<i32>} : memref<2x22x32xf32, #tpu.memory_space<vmem>>, vector<1x1x32xf32>,
    %c0_55 = arith.constant 0 : index
    %c11 = arith.constant 11 : index
    %77 = memref.load %arg1[%c0_55, %c11] : memref<2x22xi32, #tpu.memory_space<smem>>
    %78 = arith.index_cast %77 : i32 to index
    %c0_56 = arith.constant 0 : index
    %79 = vector.load %arg2[%78, %c0_56] : memref<50x32xf32, #tpu.memory_space<vmem>>, vector<1x32xf32>
    %80 = vector.shape_cast %79 : vector<1x32xf32> to vector<32xf32>
    %c0_57 = arith.constant 0 : index
    %c11_58 = arith.constant 11 : index
    %c0_59 = arith.constant 0 : index
    %81 = vector.load %arg12[%c0_57, %c11_58, %c0_59] : memref<2x22x32xf32, #tpu.memory_space<vmem>>, vector<1x1x32xf32>
    %82 = vector.shape_cast %81 : vector<1x1x32xf32> to vector<32xf32>
    %83 = vector.shape_cast %80 : vector<32xf32> to vector<1x1x32xf32>
    tpu.vector_store %arg12[%c0_57, %c11_58, %c0_59], %83 {strides = array<i32>} : memref<2x22x32xf32, #tpu.memory_space<vmem>>, vector<1x1x32xf32>,
    %c0_60 = arith.constant 0 : index
    %c12 = arith.constant 12 : index
    %84 = memref.load %arg1[%c0_60, %c12] : memref<2x22xi32, #tpu.memory_space<smem>>
    %85 = arith.index_cast %84 : i32 to index
    %c0_61 = arith.constant 0 : index
    %86 = vector.load %arg2[%85, %c0_61] : memref<50x32xf32, #tpu.memory_space<vmem>>, vector<1x32xf32>
    %87 = vector.shape_cast %86 : vector<1x32xf32> to vector<32xf32>
    %c0_62 = arith.constant 0 : index
    %c12_63 = arith.constant 12 : index
    %c0_64 = arith.constant 0 : index
    %88 = vector.load %arg12[%c0_62, %c12_63, %c0_64] : memref<2x22x32xf32, #tpu.memory_space<vmem>>, vector<1x1x32xf32>
    %89 = vector.shape_cast %88 : vector<1x1x32xf32> to vector<32xf32>
    %90 = vector.shape_cast %87 : vector<32xf32> to vector<1x1x32xf32>
    tpu.vector_store %arg12[%c0_62, %c12_63, %c0_64], %90 {strides = array<i32>} : memref<2x22x32xf32, #tpu.memory_space<vmem>>, vector<1x1x32xf32>,
    %c0_65 = arith.constant 0 : index
    %c13 = arith.constant 13 : index
    %91 = memref.load %arg1[%c0_65, %c13] : memref<2x22xi32, #tpu.memory_space<smem>>
    %92 = arith.index_cast %91 : i32 to index
    %c0_66 = arith.constant 0 : index
    %93 = vector.load %arg2[%92, %c0_66] : memref<50x32xf32, #tpu.memory_space<vmem>>, vector<1x32xf32>
    %94 = vector.shape_cast %93 : vector<1x32xf32> to vector<32xf32>
    %c0_67 = arith.constant 0 : index
    %c13_68 = arith.constant 13 : index
    %c0_69 = arith.constant 0 : index
    %95 = vector.load %arg12[%c0_67, %c13_68, %c0_69] : memref<2x22x32xf32, #tpu.memory_space<vmem>>, vector<1x1x32xf32>
    %96 = vector.shape_cast %95 : vector<1x1x32xf32> to vector<32xf32>
    %97 = vector.shape_cast %94 : vector<32xf32> to vector<1x1x32xf32>
    tpu.vector_store %arg12[%c0_67, %c13_68, %c0_69], %97 {strides = array<i32>} : memref<2x22x32xf32, #tpu.memory_space<vmem>>, vector<1x1x32xf32>,
    %c0_70 = arith.constant 0 : index
    %c14 = arith.constant 14 : index
    %98 = memref.load %arg1[%c0_70, %c14] : memref<2x22xi32, #tpu.memory_space<smem>>
    %99 = arith.index_cast %98 : i32 to index
    %c0_71 = arith.constant 0 : index
    %100 = vector.load %arg2[%99, %c0_71] : memref<50x32xf32, #tpu.memory_space<vmem>>, vector<1x32xf32>
    %101 = vector.shape_cast %100 : vector<1x32xf32> to vector<32xf32>
    %c0_72 = arith.constant 0 : index
    %c14_73 = arith.constant 14 : index
    %c0_74 = arith.constant 0 : index
    %102 = vector.load %arg12[%c0_72, %c14_73, %c0_74] : memref<2x22x32xf32, #tpu.memory_space<vmem>>, vector<1x1x32xf32>
    %103 = vector.shape_cast %102 : vector<1x1x32xf32> to vector<32xf32>
    %104 = vector.shape_cast %101 : vector<32xf32> to vector<1x1x32xf32>
    tpu.vector_store %arg12[%c0_72, %c14_73, %c0_74], %104 {strides = array<i32>} : memref<2x22x32xf32, #tpu.memory_space<vmem>>, vector<1x1x32xf32>,
    %c0_75 = arith.constant 0 : index
    %c15 = arith.constant 15 : index
    %105 = memref.load %arg1[%c0_75, %c15] : memref<2x22xi32, #tpu.memory_space<smem>>
    %106 = arith.index_cast %105 : i32 to index
    %c0_76 = arith.constant 0 : index
    %107 = vector.load %arg2[%106, %c0_76] : memref<50x32xf32, #tpu.memory_space<vmem>>, vector<1x32xf32>
    %108 = vector.shape_cast %107 : vector<1x32xf32> to vector<32xf32>
    %c0_77 = arith.constant 0 : index
    %c15_78 = arith.constant 15 : index
    %c0_79 = arith.constant 0 : index
    %109 = vector.load %arg12[%c0_77, %c15_78, %c0_79] : memref<2x22x32xf32, #tpu.memory_space<vmem>>, vector<1x1x32xf32>
    %110 = vector.shape_cast %109 : vector<1x1x32xf32> to vector<32xf32>
    %111 = vector.shape_cast %108 : vector<32xf32> to vector<1x1x32xf32>
    tpu.vector_store %arg12[%c0_77, %c15_78, %c0_79], %111 {strides = array<i32>} : memref<2x22x32xf32, #tpu.memory_space<vmem>>, vector<1x1x32xf32>,
    %c0_80 = arith.constant 0 : index
    %c16 = arith.constant 16 : index
    %112 = memref.load %arg1[%c0_80, %c16] : memref<2x22xi32, #tpu.memory_space<smem>>
    %113 = arith.index_cast %112 : i32 to index
    %c0_81 = arith.constant 0 : index
    %114 = vector.load %arg2[%113, %c0_81] : memref<50x32xf32, #tpu.memory_space<vmem>>, vector<1x32xf32>
    %115 = vector.shape_cast %114 : vector<1x32xf32> to vector<32xf32>
    %c0_82 = arith.constant 0 : index
    %c16_83 = arith.constant 16 : index
    %c0_84 = arith.constant 0 : index
    %116 = vector.load %arg12[%c0_82, %c16_83, %c0_84] : memref<2x22x32xf32, #tpu.memory_space<vmem>>, vector<1x1x32xf32>
    %117 = vector.shape_cast %116 : vector<1x1x32xf32> to vector<32xf32>
    %118 = vector.shape_cast %115 : vector<32xf32> to vector<1x1x32xf32>
    tpu.vector_store %arg12[%c0_82, %c16_83, %c0_84], %118 {strides = array<i32>} : memref<2x22x32xf32, #tpu.memory_space<vmem>>, vector<1x1x32xf32>,
    %c0_85 = arith.constant 0 : index
    %c17 = arith.constant 17 : index
    %119 = memref.load %arg1[%c0_85, %c17] : memref<2x22xi32, #tpu.memory_space<smem>>
    %120 = arith.index_cast %119 : i32 to index
    %c0_86 = arith.constant 0 : index
    %121 = vector.load %arg2[%120, %c0_86] : memref<50x32xf32, #tpu.memory_space<vmem>>, vector<1x32xf32>
    %122 = vector.shape_cast %121 : vector<1x32xf32> to vector<32xf32>
    %c0_87 = arith.constant 0 : index
    %c17_88 = arith.constant 17 : index
    %c0_89 = arith.constant 0 : index
    %123 = vector.load %arg12[%c0_87, %c17_88, %c0_89] : memref<2x22x32xf32, #tpu.memory_space<vmem>>, vector<1x1x32xf32>
    %124 = vector.shape_cast %123 : vector<1x1x32xf32> to vector<32xf32>
    %125 = vector.shape_cast %122 : vector<32xf32> to vector<1x1x32xf32>
    tpu.vector_store %arg12[%c0_87, %c17_88, %c0_89], %125 {strides = array<i32>} : memref<2x22x32xf32, #tpu.memory_space<vmem>>, vector<1x1x32xf32>,
    %c0_90 = arith.constant 0 : index
    %c18 = arith.constant 18 : index
    %126 = memref.load %arg1[%c0_90, %c18] : memref<2x22xi32, #tpu.memory_space<smem>>
    %127 = arith.index_cast %126 : i32 to index
    %c0_91 = arith.constant 0 : index
    %128 = vector.load %arg2[%127, %c0_91] : memref<50x32xf32, #tpu.memory_space<vmem>>, vector<1x32xf32>
    %129 = vector.shape_cast %128 : vector<1x32xf32> to vector<32xf32>
    %c0_92 = arith.constant 0 : index
    %c18_93 = arith.constant 18 : index
    %c0_94 = arith.constant 0 : index
    %130 = vector.load %arg12[%c0_92, %c18_93, %c0_94] : memref<2x22x32xf32, #tpu.memory_space<vmem>>, vector<1x1x32xf32>
    %131 = vector.shape_cast %130 : vector<1x1x32xf32> to vector<32xf32>
    %132 = vector.shape_cast %129 : vector<32xf32> to vector<1x1x32xf32>
    tpu.vector_store %arg12[%c0_92, %c18_93, %c0_94], %132 {strides = array<i32>} : memref<2x22x32xf32, #tpu.memory_space<vmem>>, vector<1x1x32xf32>,
    %c0_95 = arith.constant 0 : index
    %c19 = arith.constant 19 : index
    %133 = memref.load %arg1[%c0_95, %c19] : memref<2x22xi32, #tpu.memory_space<smem>>
    %134 = arith.index_cast %133 : i32 to index
    %c0_96 = arith.constant 0 : index
    %135 = vector.load %arg2[%134, %c0_96] : memref<50x32xf32, #tpu.memory_space<vmem>>, vector<1x32xf32>
    %136 = vector.shape_cast %135 : vector<1x32xf32> to vector<32xf32>
    %c0_97 = arith.constant 0 : index
    %c19_98 = arith.constant 19 : index
    %c0_99 = arith.constant 0 : index
    %137 = vector.load %arg12[%c0_97, %c19_98, %c0_99] : memref<2x22x32xf32, #tpu.memory_space<vmem>>, vector<1x1x32xf32>
    %138 = vector.shape_cast %137 : vector<1x1x32xf32> to vector<32xf32>
    %139 = vector.shape_cast %136 : vector<32xf32> to vector<1x1x32xf32>
    tpu.vector_store %arg12[%c0_97, %c19_98, %c0_99], %139 {strides = array<i32>} : memref<2x22x32xf32, #tpu.memory_space<vmem>>, vector<1x1x32xf32>,
    %c0_100 = arith.constant 0 : index
    %c20 = arith.constant 20 : index
    %140 = memref.load %arg1[%c0_100, %c20] : memref<2x22xi32, #tpu.memory_space<smem>>
    %141 = arith.index_cast %140 : i32 to index
    %c0_101 = arith.constant 0 : index
    %142 = vector.load %arg2[%141, %c0_101] : memref<50x32xf32, #tpu.memory_space<vmem>>, vector<1x32xf32>
    %143 = vector.shape_cast %142 : vector<1x32xf32> to vector<32xf32>
    %c0_102 = arith.constant 0 : index
    %c20_103 = arith.constant 20 : index
    %c0_104 = arith.constant 0 : index
    %144 = vector.load %arg12[%c0_102, %c20_103, %c0_104] : memref<2x22x32xf32, #tpu.memory_space<vmem>>, vector<1x1x32xf32>
    %145 = vector.shape_cast %144 : vector<1x1x32xf32> to vector<32xf32>
    %146 = vector.shape_cast %143 : vector<32xf32> to vector<1x1x32xf32>
    tpu.vector_store %arg12[%c0_102, %c20_103, %c0_104], %146 {strides = array<i32>} : memref<2x22x32xf32, #tpu.memory_space<vmem>>, vector<1x1x32xf32>,
    %c0_105 = arith.constant 0 : index
    %c21 = arith.constant 21 : index
    %147 = memref.load %arg1[%c0_105, %c21] : memref<2x22xi32, #tpu.memory_space<smem>>
    %148 = arith.index_cast %147 : i32 to index
    %c0_106 = arith.constant 0 : index
    %149 = vector.load %arg2[%148, %c0_106] : memref<50x32xf32, #tpu.memory_space<vmem>>, vector<1x32xf32>
    %150 = vector.shape_cast %149 : vector<1x32xf32> to vector<32xf32>
    %c0_107 = arith.constant 0 : index
    %c21_108 = arith.constant 21 : index
    %c0_109 = arith.constant 0 : index
    %151 = vector.load %arg12[%c0_107, %c21_108, %c0_109] : memref<2x22x32xf32, #tpu.memory_space<vmem>>, vector<1x1x32xf32>
    %152 = vector.shape_cast %151 : vector<1x1x32xf32> to vector<32xf32>
    %153 = vector.shape_cast %150 : vector<32xf32> to vector<1x1x32xf32>
    tpu.vector_store %arg12[%c0_107, %c21_108, %c0_109], %153 {strides = array<i32>} : memref<2x22x32xf32, #tpu.memory_space<vmem>>, vector<1x1x32xf32>,
    %c1_110 = arith.constant 1 : index
    %c0_111 = arith.constant 0 : index
    %154 = memref.load %arg1[%c1_110, %c0_111] : memref<2x22xi32, #tpu.memory_space<smem>>
    %155 = arith.index_cast %154 : i32 to index
    %c0_112 = arith.constant 0 : index
    %156 = vector.load %arg2[%155, %c0_112] : memref<50x32xf32, #tpu.memory_space<vmem>>, vector<1x32xf32>
    %157 = vector.shape_cast %156 : vector<1x32xf32> to vector<32xf32>
    %c1_113 = arith.constant 1 : index
    %c0_114 = arith.constant 0 : index
    %c0_115 = arith.constant 0 : index
    %158 = vector.load %arg12[%c1_113, %c0_114, %c0_115] : memref<2x22x32xf32, #tpu.memory_space<vmem>>, vector<1x1x32xf32>
    %159 = vector.shape_cast %158 : vector<1x1x32xf32> to vector<32xf32>
    %160 = vector.shape_cast %157 : vector<32xf32> to vector<1x1x32xf32>
    tpu.vector_store %arg12[%c1_113, %c0_114, %c0_115], %160 {strides = array<i32>} : memref<2x22x32xf32, #tpu.memory_space<vmem>>, vector<1x1x32xf32>,
    %c1_116 = arith.constant 1 : index
    %c1_117 = arith.constant 1 : index
    %161 = memref.load %arg1[%c1_116, %c1_117] : memref<2x22xi32, #tpu.memory_space<smem>>
    %162 = arith.index_cast %161 : i32 to index
    %c0_118 = arith.constant 0 : index
    %163 = vector.load %arg2[%162, %c0_118] : memref<50x32xf32, #tpu.memory_space<vmem>>, vector<1x32xf32>
    %164 = vector.shape_cast %163 : vector<1x32xf32> to vector<32xf32>
    %c1_119 = arith.constant 1 : index
    %c1_120 = arith.constant 1 : index
    %c0_121 = arith.constant 0 : index
    %165 = vector.load %arg12[%c1_119, %c1_120, %c0_121] : memref<2x22x32xf32, #tpu.memory_space<vmem>>, vector<1x1x32xf32>
    %166 = vector.shape_cast %165 : vector<1x1x32xf32> to vector<32xf32>
    %167 = vector.shape_cast %164 : vector<32xf32> to vector<1x1x32xf32>
    tpu.vector_store %arg12[%c1_119, %c1_120, %c0_121], %167 {strides = array<i32>} : memref<2x22x32xf32, #tpu.memory_space<vmem>>, vector<1x1x32xf32>,
    %c1_122 = arith.constant 1 : index
    %c2_123 = arith.constant 2 : index
    %168 = memref.load %arg1[%c1_122, %c2_123] : memref<2x22xi32, #tpu.memory_space<smem>>
    %169 = arith.index_cast %168 : i32 to index
    %c0_124 = arith.constant 0 : index
    %170 = vector.load %arg2[%169, %c0_124] : memref<50x32xf32, #tpu.memory_space<vmem>>, vector<1x32xf32>
    %171 = vector.shape_cast %170 : vector<1x32xf32> to vector<32xf32>
    %c1_125 = arith.constant 1 : index
    %c2_126 = arith.constant 2 : index
    %c0_127 = arith.constant 0 : index
    %172 = vector.load %arg12[%c1_125, %c2_126, %c0_127] : memref<2x22x32xf32, #tpu.memory_space<vmem>>, vector<1x1x32xf32>
    %173 = vector.shape_cast %172 : vector<1x1x32xf32> to vector<32xf32>
    %174 = vector.shape_cast %171 : vector<32xf32> to vector<1x1x32xf32>
    tpu.vector_store %arg12[%c1_125, %c2_126, %c0_127], %174 {strides = array<i32>} : memref<2x22x32xf32, #tpu.memory_space<vmem>>, vector<1x1x32xf32>,
    %c1_128 = arith.constant 1 : index
    %c3_129 = arith.constant 3 : index
    %175 = memref.load %arg1[%c1_128, %c3_129] : memref<2x22xi32, #tpu.memory_space<smem>>
    %176 = arith.index_cast %175 : i32 to index
    %c0_130 = arith.constant 0 : index
    %177 = vector.load %arg2[%176, %c0_130] : memref<50x32xf32, #tpu.memory_space<vmem>>, vector<1x32xf32>
    %178 = vector.shape_cast %177 : vector<1x32xf32> to vector<32xf32>
    %c1_131 = arith.constant 1 : index
    %c3_132 = arith.constant 3 : index
    %c0_133 = arith.constant 0 : index
    %179 = vector.load %arg12[%c1_131, %c3_132, %c0_133] : memref<2x22x32xf32, #tpu.memory_space<vmem>>, vector<1x1x32xf32>
    %180 = vector.shape_cast %179 : vector<1x1x32xf32> to vector<32xf32>
    %181 = vector.shape_cast %178 : vector<32xf32> to vector<1x1x32xf32>
    tpu.vector_store %arg12[%c1_131, %c3_132, %c0_133], %181 {strides = array<i32>} : memref<2x22x32xf32, #tpu.memory_space<vmem>>, vector<1x1x32xf32>,
    %c1_134 = arith.constant 1 : index
    %c4_135 = arith.constant 4 : index
    %182 = memref.load %arg1[%c1_134, %c4_135] : memref<2x22xi32, #tpu.memory_space<smem>>
    %183 = arith.index_cast %182 : i32 to index
    %c0_136 = arith.constant 0 : index
    %184 = vector.load %arg2[%183, %c0_136] : memref<50x32xf32, #tpu.memory_space<vmem>>, vector<1x32xf32>
    %185 = vector.shape_cast %184 : vector<1x32xf32> to vector<32xf32>
    %c1_137 = arith.constant 1 : index
    %c4_138 = arith.constant 4 : index
    %c0_139 = arith.constant 0 : index
    %186 = vector.load %arg12[%c1_137, %c4_138, %c0_139] : memref<2x22x32xf32, #tpu.memory_space<vmem>>, vector<1x1x32xf32>
    %187 = vector.shape_cast %186 : vector<1x1x32xf32> to vector<32xf32>
    %188 = vector.shape_cast %185 : vector<32xf32> to vector<1x1x32xf32>
    tpu.vector_store %arg12[%c1_137, %c4_138, %c0_139], %188 {strides = array<i32>} : memref<2x22x32xf32, #tpu.memory_space<vmem>>, vector<1x1x32xf32>,
    %c1_140 = arith.constant 1 : index
    %c5_141 = arith.constant 5 : index
    %189 = memref.load %arg1[%c1_140, %c5_141] : memref<2x22xi32, #tpu.memory_space<smem>>
    %190 = arith.index_cast %189 : i32 to index
    %c0_142 = arith.constant 0 : index
    %191 = vector.load %arg2[%190, %c0_142] : memref<50x32xf32, #tpu.memory_space<vmem>>, vector<1x32xf32>
    %192 = vector.shape_cast %191 : vector<1x32xf32> to vector<32xf32>
    %c1_143 = arith.constant 1 : index
    %c5_144 = arith.constant 5 : index
    %c0_145 = arith.constant 0 : index
    %193 = vector.load %arg12[%c1_143, %c5_144, %c0_145] : memref<2x22x32xf32, #tpu.memory_space<vmem>>, vector<1x1x32xf32>
    %194 = vector.shape_cast %193 : vector<1x1x32xf32> to vector<32xf32>
    %195 = vector.shape_cast %192 : vector<32xf32> to vector<1x1x32xf32>
    tpu.vector_store %arg12[%c1_143, %c5_144, %c0_145], %195 {strides = array<i32>} : memref<2x22x32xf32, #tpu.memory_space<vmem>>, vector<1x1x32xf32>,
    %c1_146 = arith.constant 1 : index
    %c6_147 = arith.constant 6 : index
    %196 = memref.load %arg1[%c1_146, %c6_147] : memref<2x22xi32, #tpu.memory_space<smem>>
    %197 = arith.index_cast %196 : i32 to index
    %c0_148 = arith.constant 0 : index
    %198 = vector.load %arg2[%197, %c0_148] : memref<50x32xf32, #tpu.memory_space<vmem>>, vector<1x32xf32>
    %199 = vector.shape_cast %198 : vector<1x32xf32> to vector<32xf32>
    %c1_149 = arith.constant 1 : index
    %c6_150 = arith.constant 6 : index
    %c0_151 = arith.constant 0 : index
    %200 = vector.load %arg12[%c1_149, %c6_150, %c0_151] : memref<2x22x32xf32, #tpu.memory_space<vmem>>, vector<1x1x32xf32>
    %201 = vector.shape_cast %200 : vector<1x1x32xf32> to vector<32xf32>
    %202 = vector.shape_cast %199 : vector<32xf32> to vector<1x1x32xf32>
    tpu.vector_store %arg12[%c1_149, %c6_150, %c0_151], %202 {strides = array<i32>} : memref<2x22x32xf32, #tpu.memory_space<vmem>>, vector<1x1x32xf32>,
    %c1_152 = arith.constant 1 : index
    %c7_153 = arith.constant 7 : index
    %203 = memref.load %arg1[%c1_152, %c7_153] : memref<2x22xi32, #tpu.memory_space<smem>>
    %204 = arith.index_cast %203 : i32 to index
    %c0_154 = arith.constant 0 : index
    %205 = vector.load %arg2[%204, %c0_154] : memref<50x32xf32, #tpu.memory_space<vmem>>, vector<1x32xf32>
    %206 = vector.shape_cast %205 : vector<1x32xf32> to vector<32xf32>
    %c1_155 = arith.constant 1 : index
    %c7_156 = arith.constant 7 : index
    %c0_157 = arith.constant 0 : index
    %207 = vector.load %arg12[%c1_155, %c7_156, %c0_157] : memref<2x22x32xf32, #tpu.memory_space<vmem>>, vector<1x1x32xf32>
    %208 = vector.shape_cast %207 : vector<1x1x32xf32> to vector<32xf32>
    %209 = vector.shape_cast %206 : vector<32xf32> to vector<1x1x32xf32>
    tpu.vector_store %arg12[%c1_155, %c7_156, %c0_157], %209 {strides = array<i32>} : memref<2x22x32xf32, #tpu.memory_space<vmem>>, vector<1x1x32xf32>,
    %c1_158 = arith.constant 1 : index
    %c8_159 = arith.constant 8 : index
    %210 = memref.load %arg1[%c1_158, %c8_159] : memref<2x22xi32, #tpu.memory_space<smem>>
    %211 = arith.index_cast %210 : i32 to index
    %c0_160 = arith.constant 0 : index
    %212 = vector.load %arg2[%211, %c0_160] : memref<50x32xf32, #tpu.memory_space<vmem>>, vector<1x32xf32>
    %213 = vector.shape_cast %212 : vector<1x32xf32> to vector<32xf32>
    %c1_161 = arith.constant 1 : index
    %c8_162 = arith.constant 8 : index
    %c0_163 = arith.constant 0 : index
    %214 = vector.load %arg12[%c1_161, %c8_162, %c0_163] : memref<2x22x32xf32, #tpu.memory_space<vmem>>, vector<1x1x32xf32>
    %215 = vector.shape_cast %214 : vector<1x1x32xf32> to vector<32xf32>
    %216 = vector.shape_cast %213 : vector<32xf32> to vector<1x1x32xf32>
    tpu.vector_store %arg12[%c1_161, %c8_162, %c0_163], %216 {strides = array<i32>} : memref<2x22x32xf32, #tpu.memory_space<vmem>>, vector<1x1x32xf32>,
    %c1_164 = arith.constant 1 : index
    %c9_165 = arith.constant 9 : index
    %217 = memref.load %arg1[%c1_164, %c9_165] : memref<2x22xi32, #tpu.memory_space<smem>>
    %218 = arith.index_cast %217 : i32 to index
    %c0_166 = arith.constant 0 : index
    %219 = vector.load %arg2[%218, %c0_166] : memref<50x32xf32, #tpu.memory_space<vmem>>, vector<1x32xf32>
    %220 = vector.shape_cast %219 : vector<1x32xf32> to vector<32xf32>
    %c1_167 = arith.constant 1 : index
    %c9_168 = arith.constant 9 : index
    %c0_169 = arith.constant 0 : index
    %221 = vector.load %arg12[%c1_167, %c9_168, %c0_169] : memref<2x22x32xf32, #tpu.memory_space<vmem>>, vector<1x1x32xf32>
    %222 = vector.shape_cast %221 : vector<1x1x32xf32> to vector<32xf32>
    %223 = vector.shape_cast %220 : vector<32xf32> to vector<1x1x32xf32>
    tpu.vector_store %arg12[%c1_167, %c9_168, %c0_169], %223 {strides = array<i32>} : memref<2x22x32xf32, #tpu.memory_space<vmem>>, vector<1x1x32xf32>,
    %c1_170 = arith.constant 1 : index
    %c10_171 = arith.constant 10 : index
    %224 = memref.load %arg1[%c1_170, %c10_171] : memref<2x22xi32, #tpu.memory_space<smem>>
    %225 = arith.index_cast %224 : i32 to index
    %c0_172 = arith.constant 0 : index
    %226 = vector.load %arg2[%225, %c0_172] : memref<50x32xf32, #tpu.memory_space<vmem>>, vector<1x32xf32>
    %227 = vector.shape_cast %226 : vector<1x32xf32> to vector<32xf32>
    %c1_173 = arith.constant 1 : index
    %c10_174 = arith.constant 10 : index
    %c0_175 = arith.constant 0 : index
    %228 = vector.load %arg12[%c1_173, %c10_174, %c0_175] : memref<2x22x32xf32, #tpu.memory_space<vmem>>, vector<1x1x32xf32>
    %229 = vector.shape_cast %228 : vector<1x1x32xf32> to vector<32xf32>
    %230 = vector.shape_cast %227 : vector<32xf32> to vector<1x1x32xf32>
    tpu.vector_store %arg12[%c1_173, %c10_174, %c0_175], %230 {strides = array<i32>} : memref<2x22x32xf32, #tpu.memory_space<vmem>>, vector<1x1x32xf32>,
    %c1_176 = arith.constant 1 : index
    %c11_177 = arith.constant 11 : index
    %231 = memref.load %arg1[%c1_176, %c11_177] : memref<2x22xi32, #tpu.memory_space<smem>>
    %232 = arith.index_cast %231 : i32 to index
    %c0_178 = arith.constant 0 : index
    %233 = vector.load %arg2[%232, %c0_178] : memref<50x32xf32, #tpu.memory_space<vmem>>, vector<1x32xf32>
    %234 = vector.shape_cast %233 : vector<1x32xf32> to vector<32xf32>
    %c1_179 = arith.constant 1 : index
    %c11_180 = arith.constant 11 : index
    %c0_181 = arith.constant 0 : index
    %235 = vector.load %arg12[%c1_179, %c11_180, %c0_181] : memref<2x22x32xf32, #tpu.memory_space<vmem>>, vector<1x1x32xf32>
    %236 = vector.shape_cast %235 : vector<1x1x32xf32> to vector<32xf32>
    %237 = vector.shape_cast %234 : vector<32xf32> to vector<1x1x32xf32>
    tpu.vector_store %arg12[%c1_179, %c11_180, %c0_181], %237 {strides = array<i32>} : memref<2x22x32xf32, #tpu.memory_space<vmem>>, vector<1x1x32xf32>,
    %c1_182 = arith.constant 1 : index
    %c12_183 = arith.constant 12 : index
    %238 = memref.load %arg1[%c1_182, %c12_183] : memref<2x22xi32, #tpu.memory_space<smem>>
    %239 = arith.index_cast %238 : i32 to index
    %c0_184 = arith.constant 0 : index
    %240 = vector.load %arg2[%239, %c0_184] : memref<50x32xf32, #tpu.memory_space<vmem>>, vector<1x32xf32>
    %241 = vector.shape_cast %240 : vector<1x32xf32> to vector<32xf32>
    %c1_185 = arith.constant 1 : index
    %c12_186 = arith.constant 12 : index
    %c0_187 = arith.constant 0 : index
    %242 = vector.load %arg12[%c1_185, %c12_186, %c0_187] : memref<2x22x32xf32, #tpu.memory_space<vmem>>, vector<1x1x32xf32>
    %243 = vector.shape_cast %242 : vector<1x1x32xf32> to vector<32xf32>
    %244 = vector.shape_cast %241 : vector<32xf32> to vector<1x1x32xf32>
    tpu.vector_store %arg12[%c1_185, %c12_186, %c0_187], %244 {strides = array<i32>} : memref<2x22x32xf32, #tpu.memory_space<vmem>>, vector<1x1x32xf32>,
    %c1_188 = arith.constant 1 : index
    %c13_189 = arith.constant 13 : index
    %245 = memref.load %arg1[%c1_188, %c13_189] : memref<2x22xi32, #tpu.memory_space<smem>>
    %246 = arith.index_cast %245 : i32 to index
    %c0_190 = arith.constant 0 : index
    %247 = vector.load %arg2[%246, %c0_190] : memref<50x32xf32, #tpu.memory_space<vmem>>, vector<1x32xf32>
    %248 = vector.shape_cast %247 : vector<1x32xf32> to vector<32xf32>
    %c1_191 = arith.constant 1 : index
    %c13_192 = arith.constant 13 : index
    %c0_193 = arith.constant 0 : index
    %249 = vector.load %arg12[%c1_191, %c13_192, %c0_193] : memref<2x22x32xf32, #tpu.memory_space<vmem>>, vector<1x1x32xf32>
    %250 = vector.shape_cast %249 : vector<1x1x32xf32> to vector<32xf32>
    %251 = vector.shape_cast %248 : vector<32xf32> to vector<1x1x32xf32>
    tpu.vector_store %arg12[%c1_191, %c13_192, %c0_193], %251 {strides = array<i32>} : memref<2x22x32xf32, #tpu.memory_space<vmem>>, vector<1x1x32xf32>,
    %c1_194 = arith.constant 1 : index
    %c14_195 = arith.constant 14 : index
    %252 = memref.load %arg1[%c1_194, %c14_195] : memref<2x22xi32, #tpu.memory_space<smem>>
    %253 = arith.index_cast %252 : i32 to index
    %c0_196 = arith.constant 0 : index
    %254 = vector.load %arg2[%253, %c0_196] : memref<50x32xf32, #tpu.memory_space<vmem>>, vector<1x32xf32>
    %255 = vector.shape_cast %254 : vector<1x32xf32> to vector<32xf32>
    %c1_197 = arith.constant 1 : index
    %c14_198 = arith.constant 14 : index
    %c0_199 = arith.constant 0 : index
    %256 = vector.load %arg12[%c1_197, %c14_198, %c0_199] : memref<2x22x32xf32, #tpu.memory_space<vmem>>, vector<1x1x32xf32>
    %257 = vector.shape_cast %256 : vector<1x1x32xf32> to vector<32xf32>
    %258 = vector.shape_cast %255 : vector<32xf32> to vector<1x1x32xf32>
    tpu.vector_store %arg12[%c1_197, %c14_198, %c0_199], %258 {strides = array<i32>} : memref<2x22x32xf32, #tpu.memory_space<vmem>>, vector<1x1x32xf32>,
    %c1_200 = arith.constant 1 : index
    %c15_201 = arith.constant 15 : index
    %259 = memref.load %arg1[%c1_200, %c15_201] : memref<2x22xi32, #tpu.memory_space<smem>>
    %260 = arith.index_cast %259 : i32 to index
    %c0_202 = arith.constant 0 : index
    %261 = vector.load %arg2[%260, %c0_202] : memref<50x32xf32, #tpu.memory_space<vmem>>, vector<1x32xf32>
    %262 = vector.shape_cast %261 : vector<1x32xf32> to vector<32xf32>
    %c1_203 = arith.constant 1 : index
    %c15_204 = arith.constant 15 : index
    %c0_205 = arith.constant 0 : index
    %263 = vector.load %arg12[%c1_203, %c15_204, %c0_205] : memref<2x22x32xf32, #tpu.memory_space<vmem>>, vector<1x1x32xf32>
    %264 = vector.shape_cast %263 : vector<1x1x32xf32> to vector<32xf32>
    %265 = vector.shape_cast %262 : vector<32xf32> to vector<1x1x32xf32>
    tpu.vector_store %arg12[%c1_203, %c15_204, %c0_205], %265 {strides = array<i32>} : memref<2x22x32xf32, #tpu.memory_space<vmem>>, vector<1x1x32xf32>,
    %c1_206 = arith.constant 1 : index
    %c16_207 = arith.constant 16 : index
    %266 = memref.load %arg1[%c1_206, %c16_207] : memref<2x22xi32, #tpu.memory_space<smem>>
    %267 = arith.index_cast %266 : i32 to index
    %c0_208 = arith.constant 0 : index
    %268 = vector.load %arg2[%267, %c0_208] : memref<50x32xf32, #tpu.memory_space<vmem>>, vector<1x32xf32>
    %269 = vector.shape_cast %268 : vector<1x32xf32> to vector<32xf32>
    %c1_209 = arith.constant 1 : index
    %c16_210 = arith.constant 16 : index
    %c0_211 = arith.constant 0 : index
    %270 = vector.load %arg12[%c1_209, %c16_210, %c0_211] : memref<2x22x32xf32, #tpu.memory_space<vmem>>, vector<1x1x32xf32>
    %271 = vector.shape_cast %270 : vector<1x1x32xf32> to vector<32xf32>
    %272 = vector.shape_cast %269 : vector<32xf32> to vector<1x1x32xf32>
    tpu.vector_store %arg12[%c1_209, %c16_210, %c0_211], %272 {strides = array<i32>} : memref<2x22x32xf32, #tpu.memory_space<vmem>>, vector<1x1x32xf32>,
    %c1_212 = arith.constant 1 : index
    %c17_213 = arith.constant 17 : index
    %273 = memref.load %arg1[%c1_212, %c17_213] : memref<2x22xi32, #tpu.memory_space<smem>>
    %274 = arith.index_cast %273 : i32 to index
    %c0_214 = arith.constant 0 : index
    %275 = vector.load %arg2[%274, %c0_214] : memref<50x32xf32, #tpu.memory_space<vmem>>, vector<1x32xf32>
    %276 = vector.shape_cast %275 : vector<1x32xf32> to vector<32xf32>
    %c1_215 = arith.constant 1 : index
    %c17_216 = arith.constant 17 : index
    %c0_217 = arith.constant 0 : index
    %277 = vector.load %arg12[%c1_215, %c17_216, %c0_217] : memref<2x22x32xf32, #tpu.memory_space<vmem>>, vector<1x1x32xf32>
    %278 = vector.shape_cast %277 : vector<1x1x32xf32> to vector<32xf32>
    %279 = vector.shape_cast %276 : vector<32xf32> to vector<1x1x32xf32>
    tpu.vector_store %arg12[%c1_215, %c17_216, %c0_217], %279 {strides = array<i32>} : memref<2x22x32xf32, #tpu.memory_space<vmem>>, vector<1x1x32xf32>,
    %c1_218 = arith.constant 1 : index
    %c18_219 = arith.constant 18 : index
    %280 = memref.load %arg1[%c1_218, %c18_219] : memref<2x22xi32, #tpu.memory_space<smem>>
    %281 = arith.index_cast %280 : i32 to index
    %c0_220 = arith.constant 0 : index
    %282 = vector.load %arg2[%281, %c0_220] : memref<50x32xf32, #tpu.memory_space<vmem>>, vector<1x32xf32>
    %283 = vector.shape_cast %282 : vector<1x32xf32> to vector<32xf32>
    %c1_221 = arith.constant 1 : index
    %c18_222 = arith.constant 18 : index
    %c0_223 = arith.constant 0 : index
    %284 = vector.load %arg12[%c1_221, %c18_222, %c0_223] : memref<2x22x32xf32, #tpu.memory_space<vmem>>, vector<1x1x32xf32>
    %285 = vector.shape_cast %284 : vector<1x1x32xf32> to vector<32xf32>
    %286 = vector.shape_cast %283 : vector<32xf32> to vector<1x1x32xf32>
    tpu.vector_store %arg12[%c1_221, %c18_222, %c0_223], %286 {strides = array<i32>} : memref<2x22x32xf32, #tpu.memory_space<vmem>>, vector<1x1x32xf32>,
    %c1_224 = arith.constant 1 : index
    %c19_225 = arith.constant 19 : index
    %287 = memref.load %arg1[%c1_224, %c19_225] : memref<2x22xi32, #tpu.memory_space<smem>>
    %288 = arith.index_cast %287 : i32 to index
    %c0_226 = arith.constant 0 : index
    %289 = vector.load %arg2[%288, %c0_226] : memref<50x32xf32, #tpu.memory_space<vmem>>, vector<1x32xf32>
    %290 = vector.shape_cast %289 : vector<1x32xf32> to vector<32xf32>
    %c1_227 = arith.constant 1 : index
    %c19_228 = arith.constant 19 : index
    %c0_229 = arith.constant 0 : index
    %291 = vector.load %arg12[%c1_227, %c19_228, %c0_229] : memref<2x22x32xf32, #tpu.memory_space<vmem>>, vector<1x1x32xf32>
    %292 = vector.shape_cast %291 : vector<1x1x32xf32> to vector<32xf32>
    %293 = vector.shape_cast %290 : vector<32xf32> to vector<1x1x32xf32>
    tpu.vector_store %arg12[%c1_227, %c19_228, %c0_229], %293 {strides = array<i32>} : memref<2x22x32xf32, #tpu.memory_space<vmem>>, vector<1x1x32xf32>,
    %c1_230 = arith.constant 1 : index
    %c20_231 = arith.constant 20 : index
    %294 = memref.load %arg1[%c1_230, %c20_231] : memref<2x22xi32, #tpu.memory_space<smem>>
    %295 = arith.index_cast %294 : i32 to index
    %c0_232 = arith.constant 0 : index
    %296 = vector.load %arg2[%295, %c0_232] : memref<50x32xf32, #tpu.memory_space<vmem>>, vector<1x32xf32>
    %297 = vector.shape_cast %296 : vector<1x32xf32> to vector<32xf32>
    %c1_233 = arith.constant 1 : index
    %c20_234 = arith.constant 20 : index
    %c0_235 = arith.constant 0 : index
    %298 = vector.load %arg12[%c1_233, %c20_234, %c0_235] : memref<2x22x32xf32, #tpu.memory_space<vmem>>, vector<1x1x32xf32>
    %299 = vector.shape_cast %298 : vector<1x1x32xf32> to vector<32xf32>
    %300 = vector.shape_cast %297 : vector<32xf32> to vector<1x1x32xf32>
    tpu.vector_store %arg12[%c1_233, %c20_234, %c0_235], %300 {strides = array<i32>} : memref<2x22x32xf32, #tpu.memory_space<vmem>>, vector<1x1x32xf32>,
    %c1_236 = arith.constant 1 : index
    %c21_237 = arith.constant 21 : index
    %301 = memref.load %arg1[%c1_236, %c21_237] : memref<2x22xi32, #tpu.memory_space<smem>>
    %302 = arith.index_cast %301 : i32 to index
    %c0_238 = arith.constant 0 : index
    %303 = vector.load %arg2[%302, %c0_238] : memref<50x32xf32, #tpu.memory_space<vmem>>, vector<1x32xf32>
    %304 = vector.shape_cast %303 : vector<1x32xf32> to vector<32xf32>
    %c1_239 = arith.constant 1 : index
    %c21_240 = arith.constant 21 : index
    %c0_241 = arith.constant 0 : index
    %305 = vector.load %arg12[%c1_239, %c21_240, %c0_241] : memref<2x22x32xf32, #tpu.memory_space<vmem>>, vector<1x1x32xf32>
    %306 = vector.shape_cast %305 : vector<1x1x32xf32> to vector<32xf32>
    %307 = vector.shape_cast %304 : vector<32xf32> to vector<1x1x32xf32>
    tpu.vector_store %arg12[%c1_239, %c21_240, %c0_241], %307 {strides = array<i32>} : memref<2x22x32xf32, #tpu.memory_space<vmem>>, vector<1x1x32xf32>,
    %c0_242 = arith.constant 0 : index
    %c0_243 = arith.constant 0 : index
    %c0_244 = arith.constant 0 : index
    %308 = vector.load %arg12[%c0_242, %c0_243, %c0_244] : memref<2x22x32xf32, #tpu.memory_space<vmem>>, vector<2x22x32xf32>
    %cst = arith.constant 0.000000e+00 : f32
    %309 = vector.broadcast %cst : f32 to vector<2x4xf32>
    %cst_245 = arith.constant 0.000000e+00 : f32
    %310 = vector.broadcast %cst_245 : f32 to vector<2x21x128xf32>
    %311 = vector.extract_strided_slice %308 {offsets = [0, 0, 0], sizes = [2, 21, 32], strides = [1, 1, 1]} : vector<2x22x32xf32> to vector<2x21x32xf32>
    %c0_246 = arith.constant 0 : index
    %c0_247 = arith.constant 0 : index
    %c0_248 = arith.constant 0 : index
    %312 = vector.load %arg3[%c0_246, %c0_247, %c0_248] : memref<2x32x128xf32, #tpu.memory_space<vmem>>, vector<1x32x128xf32>
    %313 = vector.shape_cast %312 : vector<1x32x128xf32> to vector<32x128xf32>
    %cst_249 = arith.constant dense<0.000000e+00> : vector<2x21x128xf32>
    %314 = tpu.matmul %311, %313, %cst_249 {dimension_numbers = #tpu.dot_dimension_numbers<[2], [0], [0, 1], [1], [0, 0, 0, 1, 1, 1], [], []>} : vector<2x21x32xf32>, vector<32x128xf32>, vector<2x21x128xf32> -> vector<2x21x128xf32>
    %315 = arith.addf %310, %314 : vector<2x21x128xf32>
    %316 = vector.extract_strided_slice %308 {offsets = [0, 1, 0], sizes = [2, 21, 32], strides = [1, 1, 1]} : vector<2x22x32xf32> to vector<2x21x32xf32>
    %c1_250 = arith.constant 1 : index
    %c0_251 = arith.constant 0 : index
    %c0_252 = arith.constant 0 : index
    %317 = vector.load %arg3[%c1_250, %c0_251, %c0_252] : memref<2x32x128xf32, #tpu.memory_space<vmem>>, vector<1x32x128xf32>
    %318 = vector.shape_cast %317 : vector<1x32x128xf32> to vector<32x128xf32>
    %cst_253 = arith.constant dense<0.000000e+00> : vector<2x21x128xf32>
    %319 = tpu.matmul %316, %318, %cst_253 {dimension_numbers = #tpu.dot_dimension_numbers<[2], [0], [0, 1], [1], [0, 0, 0, 1, 1, 1], [], []>} : vector<2x21x32xf32>, vector<32x128xf32>, vector<2x21x128xf32> -> vector<2x21x128xf32>
    %320 = arith.addf %315, %319 : vector<2x21x128xf32>
    %c0_254 = arith.constant 0 : index
    %c0_255 = arith.constant 0 : index
    %321 = vector.load %arg6[%c0_254, %c0_255] : memref<1x128xf32, #tpu.memory_space<vmem>>, vector<1x128xf32>
    %322 = vector.shape_cast %321 : vector<1x128xf32> to vector<1x1x128xf32>
    %323 = vector.broadcast %322 : vector<1x1x128xf32> to vector<2x21x128xf32>
    %324 = arith.addf %320, %323 : vector<2x21x128xf32>
    %325 = vector.extract_strided_slice %324 {offsets = [0, 0, 0], sizes = [2, 2, 128], strides = [1, 1, 1]} : vector<2x21x128xf32> to vector<2x2x128xf32>
    %cst_256 = arith.constant dense<0xFF800000> : vector<2x128xf32>
    %326 = vector.multi_reduction <maximumf>, %325, %cst_256 [1] : vector<2x2x128xf32> to vector<2x128xf32>
    %c0_257 = arith.constant 0 : index
    %c0_258 = arith.constant 0 : index
    %c0_259 = arith.constant 0 : index
    %327 = vector.load %arg9[%c0_257, %c0_258, %c0_259] : memref<20x128x4xf32, #tpu.memory_space<vmem>>, vector<1x128x4xf32>
    %328 = vector.shape_cast %327 : vector<1x128x4xf32> to vector<128x4xf32>
    %cst_260 = arith.constant dense<0.000000e+00> : vector<2x4xf32>
    %329 = tpu.matmul %326, %328, %cst_260 {dimension_numbers = #tpu.dot_dimension_numbers<[1], [0], [0], [1], [0, 0, 1, 1], [], []>} : vector<2x128xf32>, vector<128x4xf32>, vector<2x4xf32> -> vector<2x4xf32>
    %330 = arith.addf %309, %329 : vector<2x4xf32>
    %331 = vector.extract_strided_slice %324 {offsets = [0, 2, 0], sizes = [2, 2, 128], strides = [1, 1, 1]} : vector<2x21x128xf32> to vector<2x2x128xf32>
    %cst_261 = arith.constant dense<0xFF800000> : vector<2x128xf32>
    %332 = vector.multi_reduction <maximumf>, %331, %cst_261 [1] : vector<2x2x128xf32> to vector<2x128xf32>
    %c1_262 = arith.constant 1 : index
    %c0_263 = arith.constant 0 : index
    %c0_264 = arith.constant 0 : index
    %333 = vector.load %arg9[%c1_262, %c0_263, %c0_264] : memref<20x128x4xf32, #tpu.memory_space<vmem>>, vector<1x128x4xf32>
    %334 = vector.shape_cast %333 : vector<1x128x4xf32> to vector<128x4xf32>
    %cst_265 = arith.constant dense<0.000000e+00> : vector<2x4xf32>
    %335 = tpu.matmul %332, %334, %cst_265 {dimension_numbers = #tpu.dot_dimension_numbers<[1], [0], [0], [1], [0, 0, 1, 1], [], []>} : vector<2x128xf32>, vector<128x4xf32>, vector<2x4xf32> -> vector<2x4xf32>
    %336 = arith.addf %330, %335 : vector<2x4xf32>
    %337 = vector.extract_strided_slice %324 {offsets = [0, 4, 0], sizes = [2, 2, 128], strides = [1, 1, 1]} : vector<2x21x128xf32> to vector<2x2x128xf32>
    %cst_266 = arith.constant dense<0xFF800000> : vector<2x128xf32>
    %338 = vector.multi_reduction <maximumf>, %337, %cst_266 [1] : vector<2x2x128xf32> to vector<2x128xf32>
    %c2_267 = arith.constant 2 : index
    %c0_268 = arith.constant 0 : index
    %c0_269 = arith.constant 0 : index
    %339 = vector.load %arg9[%c2_267, %c0_268, %c0_269] : memref<20x128x4xf32, #tpu.memory_space<vmem>>, vector<1x128x4xf32>
    %340 = vector.shape_cast %339 : vector<1x128x4xf32> to vector<128x4xf32>
    %cst_270 = arith.constant dense<0.000000e+00> : vector<2x4xf32>
    %341 = tpu.matmul %338, %340, %cst_270 {dimension_numbers = #tpu.dot_dimension_numbers<[1], [0], [0], [1], [0, 0, 1, 1], [], []>} : vector<2x128xf32>, vector<128x4xf32>, vector<2x4xf32> -> vector<2x4xf32>
    %342 = arith.addf %336, %341 : vector<2x4xf32>
    %343 = vector.extract_strided_slice %324 {offsets = [0, 6, 0], sizes = [2, 2, 128], strides = [1, 1, 1]} : vector<2x21x128xf32> to vector<2x2x128xf32>
    %cst_271 = arith.constant dense<0xFF800000> : vector<2x128xf32>
    %344 = vector.multi_reduction <maximumf>, %343, %cst_271 [1] : vector<2x2x128xf32> to vector<2x128xf32>
    %c3_272 = arith.constant 3 : index
    %c0_273 = arith.constant 0 : index
    %c0_274 = arith.constant 0 : index
    %345 = vector.load %arg9[%c3_272, %c0_273, %c0_274] : memref<20x128x4xf32, #tpu.memory_space<vmem>>, vector<1x128x4xf32>
    %346 = vector.shape_cast %345 : vector<1x128x4xf32> to vector<128x4xf32>
    %cst_275 = arith.constant dense<0.000000e+00> : vector<2x4xf32>
    %347 = tpu.matmul %344, %346, %cst_275 {dimension_numbers = #tpu.dot_dimension_numbers<[1], [0], [0], [1], [0, 0, 1, 1], [], []>} : vector<2x128xf32>, vector<128x4xf32>, vector<2x4xf32> -> vector<2x4xf32>
    %348 = arith.addf %342, %347 : vector<2x4xf32>
    %349 = vector.extract_strided_slice %324 {offsets = [0, 8, 0], sizes = [2, 2, 128], strides = [1, 1, 1]} : vector<2x21x128xf32> to vector<2x2x128xf32>
    %cst_276 = arith.constant dense<0xFF800000> : vector<2x128xf32>
    %350 = vector.multi_reduction <maximumf>, %349, %cst_276 [1] : vector<2x2x128xf32> to vector<2x128xf32>
    %c4_277 = arith.constant 4 : index
    %c0_278 = arith.constant 0 : index
    %c0_279 = arith.constant 0 : index
    %351 = vector.load %arg9[%c4_277, %c0_278, %c0_279] : memref<20x128x4xf32, #tpu.memory_space<vmem>>, vector<1x128x4xf32>
    %352 = vector.shape_cast %351 : vector<1x128x4xf32> to vector<128x4xf32>
    %cst_280 = arith.constant dense<0.000000e+00> : vector<2x4xf32>
    %353 = tpu.matmul %350, %352, %cst_280 {dimension_numbers = #tpu.dot_dimension_numbers<[1], [0], [0], [1], [0, 0, 1, 1], [], []>} : vector<2x128xf32>, vector<128x4xf32>, vector<2x4xf32> -> vector<2x4xf32>
    %354 = arith.addf %348, %353 : vector<2x4xf32>
    %355 = vector.extract_strided_slice %324 {offsets = [0, 10, 0], sizes = [2, 2, 128], strides = [1, 1, 1]} : vector<2x21x128xf32> to vector<2x2x128xf32>
    %cst_281 = arith.constant dense<0xFF800000> : vector<2x128xf32>
    %356 = vector.multi_reduction <maximumf>, %355, %cst_281 [1] : vector<2x2x128xf32> to vector<2x128xf32>
    %c5_282 = arith.constant 5 : index
    %c0_283 = arith.constant 0 : index
    %c0_284 = arith.constant 0 : index
    %357 = vector.load %arg9[%c5_282, %c0_283, %c0_284] : memref<20x128x4xf32, #tpu.memory_space<vmem>>, vector<1x128x4xf32>
    %358 = vector.shape_cast %357 : vector<1x128x4xf32> to vector<128x4xf32>
    %cst_285 = arith.constant dense<0.000000e+00> : vector<2x4xf32>
    %359 = tpu.matmul %356, %358, %cst_285 {dimension_numbers = #tpu.dot_dimension_numbers<[1], [0], [0], [1], [0, 0, 1, 1], [], []>} : vector<2x128xf32>, vector<128x4xf32>, vector<2x4xf32> -> vector<2x4xf32>
    %360 = arith.addf %354, %359 : vector<2x4xf32>
    %361 = vector.extract_strided_slice %324 {offsets = [0, 12, 0], sizes = [2, 2, 128], strides = [1, 1, 1]} : vector<2x21x128xf32> to vector<2x2x128xf32>
    %cst_286 = arith.constant dense<0xFF800000> : vector<2x128xf32>
    %362 = vector.multi_reduction <maximumf>, %361, %cst_286 [1] : vector<2x2x128xf32> to vector<2x128xf32>
    %c6_287 = arith.constant 6 : index
    %c0_288 = arith.constant 0 : index
    %c0_289 = arith.constant 0 : index
    %363 = vector.load %arg9[%c6_287, %c0_288, %c0_289] : memref<20x128x4xf32, #tpu.memory_space<vmem>>, vector<1x128x4xf32>
    %364 = vector.shape_cast %363 : vector<1x128x4xf32> to vector<128x4xf32>
    %cst_290 = arith.constant dense<0.000000e+00> : vector<2x4xf32>
    %365 = tpu.matmul %362, %364, %cst_290 {dimension_numbers = #tpu.dot_dimension_numbers<[1], [0], [0], [1], [0, 0, 1, 1], [], []>} : vector<2x128xf32>, vector<128x4xf32>, vector<2x4xf32> -> vector<2x4xf32>
    %366 = arith.addf %360, %365 : vector<2x4xf32>
    %367 = vector.extract_strided_slice %324 {offsets = [0, 14, 0], sizes = [2, 2, 128], strides = [1, 1, 1]} : vector<2x21x128xf32> to vector<2x2x128xf32>
    %cst_291 = arith.constant dense<0xFF800000> : vector<2x128xf32>
    %368 = vector.multi_reduction <maximumf>, %367, %cst_291 [1] : vector<2x2x128xf32> to vector<2x128xf32>
    %c7_292 = arith.constant 7 : index
    %c0_293 = arith.constant 0 : index
    %c0_294 = arith.constant 0 : index
    %369 = vector.load %arg9[%c7_292, %c0_293, %c0_294] : memref<20x128x4xf32, #tpu.memory_space<vmem>>, vector<1x128x4xf32>
    %370 = vector.shape_cast %369 : vector<1x128x4xf32> to vector<128x4xf32>
    %cst_295 = arith.constant dense<0.000000e+00> : vector<2x4xf32>
    %371 = tpu.matmul %368, %370, %cst_295 {dimension_numbers = #tpu.dot_dimension_numbers<[1], [0], [0], [1], [0, 0, 1, 1], [], []>} : vector<2x128xf32>, vector<128x4xf32>, vector<2x4xf32> -> vector<2x4xf32>
    %372 = arith.addf %366, %371 : vector<2x4xf32>
    %373 = vector.extract_strided_slice %324 {offsets = [0, 16, 0], sizes = [2, 2, 128], strides = [1, 1, 1]} : vector<2x21x128xf32> to vector<2x2x128xf32>
    %cst_296 = arith.constant dense<0xFF800000> : vector<2x128xf32>
    %374 = vector.multi_reduction <maximumf>, %373, %cst_296 [1] : vector<2x2x128xf32> to vector<2x128xf32>
    %c8_297 = arith.constant 8 : index
    %c0_298 = arith.constant 0 : index
    %c0_299 = arith.constant 0 : index
    %375 = vector.load %arg9[%c8_297, %c0_298, %c0_299] : memref<20x128x4xf32, #tpu.memory_space<vmem>>, vector<1x128x4xf32>
    %376 = vector.shape_cast %375 : vector<1x128x4xf32> to vector<128x4xf32>
    %cst_300 = arith.constant dense<0.000000e+00> : vector<2x4xf32>
    %377 = tpu.matmul %374, %376, %cst_300 {dimension_numbers = #tpu.dot_dimension_numbers<[1], [0], [0], [1], [0, 0, 1, 1], [], []>} : vector<2x128xf32>, vector<128x4xf32>, vector<2x4xf32> -> vector<2x4xf32>
    %378 = arith.addf %372, %377 : vector<2x4xf32>
    %379 = vector.extract_strided_slice %324 {offsets = [0, 18, 0], sizes = [2, 2, 128], strides = [1, 1, 1]} : vector<2x21x128xf32> to vector<2x2x128xf32>
    %cst_301 = arith.constant dense<0xFF800000> : vector<2x128xf32>
    %380 = vector.multi_reduction <maximumf>, %379, %cst_301 [1] : vector<2x2x128xf32> to vector<2x128xf32>
    %c9_302 = arith.constant 9 : index
    %c0_303 = arith.constant 0 : index
    %c0_304 = arith.constant 0 : index
    %381 = vector.load %arg9[%c9_302, %c0_303, %c0_304] : memref<20x128x4xf32, #tpu.memory_space<vmem>>, vector<1x128x4xf32>
    %382 = vector.shape_cast %381 : vector<1x128x4xf32> to vector<128x4xf32>
    %cst_305 = arith.constant dense<0.000000e+00> : vector<2x4xf32>
    %383 = tpu.matmul %380, %382, %cst_305 {dimension_numbers = #tpu.dot_dimension_numbers<[1], [0], [0], [1], [0, 0, 1, 1], [], []>} : vector<2x128xf32>, vector<128x4xf32>, vector<2x4xf32> -> vector<2x4xf32>
    %384 = arith.addf %378, %383 : vector<2x4xf32>
    %cst_306 = arith.constant 0.000000e+00 : f32
    %385 = vector.broadcast %cst_306 : f32 to vector<2x20x128xf32>
    %386 = vector.extract_strided_slice %308 {offsets = [0, 0, 0], sizes = [2, 20, 32], strides = [1, 1, 1]} : vector<2x22x32xf32> to vector<2x20x32xf32>
    %c0_307 = arith.constant 0 : index
    %c0_308 = arith.constant 0 : index
    %c0_309 = arith.constant 0 : index
    %387 = vector.load %arg4[%c0_307, %c0_308, %c0_309] : memref<3x32x128xf32, #tpu.memory_space<vmem>>, vector<1x32x128xf32>
    %388 = vector.shape_cast %387 : vector<1x32x128xf32> to vector<32x128xf32>
    %cst_310 = arith.constant dense<0.000000e+00> : vector<2x20x128xf32>
    %389 = tpu.matmul %386, %388, %cst_310 {dimension_numbers = #tpu.dot_dimension_numbers<[2], [0], [0, 1], [1], [0, 0, 0, 1, 1, 1], [], []>} : vector<2x20x32xf32>, vector<32x128xf32>, vector<2x20x128xf32> -> vector<2x20x128xf32>
    %390 = arith.addf %385, %389 : vector<2x20x128xf32>
    %391 = vector.extract_strided_slice %308 {offsets = [0, 1, 0], sizes = [2, 20, 32], strides = [1, 1, 1]} : vector<2x22x32xf32> to vector<2x20x32xf32>
    %c1_311 = arith.constant 1 : index
    %c0_312 = arith.constant 0 : index
    %c0_313 = arith.constant 0 : index
    %392 = vector.load %arg4[%c1_311, %c0_312, %c0_313] : memref<3x32x128xf32, #tpu.memory_space<vmem>>, vector<1x32x128xf32>
    %393 = vector.shape_cast %392 : vector<1x32x128xf32> to vector<32x128xf32>
    %cst_314 = arith.constant dense<0.000000e+00> : vector<2x20x128xf32>
    %394 = tpu.matmul %391, %393, %cst_314 {dimension_numbers = #tpu.dot_dimension_numbers<[2], [0], [0, 1], [1], [0, 0, 0, 1, 1, 1], [], []>} : vector<2x20x32xf32>, vector<32x128xf32>, vector<2x20x128xf32> -> vector<2x20x128xf32>
    %395 = arith.addf %390, %394 : vector<2x20x128xf32>
    %396 = vector.extract_strided_slice %308 {offsets = [0, 2, 0], sizes = [2, 20, 32], strides = [1, 1, 1]} : vector<2x22x32xf32> to vector<2x20x32xf32>
    %c2_315 = arith.constant 2 : index
    %c0_316 = arith.constant 0 : index
    %c0_317 = arith.constant 0 : index
    %397 = vector.load %arg4[%c2_315, %c0_316, %c0_317] : memref<3x32x128xf32, #tpu.memory_space<vmem>>, vector<1x32x128xf32>
    %398 = vector.shape_cast %397 : vector<1x32x128xf32> to vector<32x128xf32>
    %cst_318 = arith.constant dense<0.000000e+00> : vector<2x20x128xf32>
    %399 = tpu.matmul %396, %398, %cst_318 {dimension_numbers = #tpu.dot_dimension_numbers<[2], [0], [0, 1], [1], [0, 0, 0, 1, 1, 1], [], []>} : vector<2x20x32xf32>, vector<32x128xf32>, vector<2x20x128xf32> -> vector<2x20x128xf32>
    %400 = arith.addf %395, %399 : vector<2x20x128xf32>
    %c0_319 = arith.constant 0 : index
    %c0_320 = arith.constant 0 : index
    %401 = vector.load %arg7[%c0_319, %c0_320] : memref<1x128xf32, #tpu.memory_space<vmem>>, vector<1x128xf32>
    %402 = vector.shape_cast %401 : vector<1x128xf32> to vector<1x1x128xf32>
    %403 = vector.broadcast %402 : vector<1x1x128xf32> to vector<2x20x128xf32>
    %404 = arith.addf %400, %403 : vector<2x20x128xf32>
    %405 = vector.extract_strided_slice %404 {offsets = [0, 0, 0], sizes = [2, 3, 128], strides = [1, 1, 1]} : vector<2x20x128xf32> to vector<2x3x128xf32>
    %cst_321 = arith.constant dense<0xFF800000> : vector<2x128xf32>
    %406 = vector.multi_reduction <maximumf>, %405, %cst_321 [1] : vector<2x3x128xf32> to vector<2x128xf32>
    %c10_322 = arith.constant 10 : index
    %c0_323 = arith.constant 0 : index
    %c0_324 = arith.constant 0 : index
    %407 = vector.load %arg9[%c10_322, %c0_323, %c0_324] : memref<20x128x4xf32, #tpu.memory_space<vmem>>, vector<1x128x4xf32>
    %408 = vector.shape_cast %407 : vector<1x128x4xf32> to vector<128x4xf32>
    %cst_325 = arith.constant dense<0.000000e+00> : vector<2x4xf32>
    %409 = tpu.matmul %406, %408, %cst_325 {dimension_numbers = #tpu.dot_dimension_numbers<[1], [0], [0], [1], [0, 0, 1, 1], [], []>} : vector<2x128xf32>, vector<128x4xf32>, vector<2x4xf32> -> vector<2x4xf32>
    %410 = arith.addf %384, %409 : vector<2x4xf32>
    %411 = vector.extract_strided_slice %404 {offsets = [0, 3, 0], sizes = [2, 3, 128], strides = [1, 1, 1]} : vector<2x20x128xf32> to vector<2x3x128xf32>
    %cst_326 = arith.constant dense<0xFF800000> : vector<2x128xf32>
    %412 = vector.multi_reduction <maximumf>, %411, %cst_326 [1] : vector<2x3x128xf32> to vector<2x128xf32>
    %c11_327 = arith.constant 11 : index
    %c0_328 = arith.constant 0 : index
    %c0_329 = arith.constant 0 : index
    %413 = vector.load %arg9[%c11_327, %c0_328, %c0_329] : memref<20x128x4xf32, #tpu.memory_space<vmem>>, vector<1x128x4xf32>
    %414 = vector.shape_cast %413 : vector<1x128x4xf32> to vector<128x4xf32>
    %cst_330 = arith.constant dense<0.000000e+00> : vector<2x4xf32>
    %415 = tpu.matmul %412, %414, %cst_330 {dimension_numbers = #tpu.dot_dimension_numbers<[1], [0], [0], [1], [0, 0, 1, 1], [], []>} : vector<2x128xf32>, vector<128x4xf32>, vector<2x4xf32> -> vector<2x4xf32>
    %416 = arith.addf %410, %415 : vector<2x4xf32>
    %417 = vector.extract_strided_slice %404 {offsets = [0, 6, 0], sizes = [2, 3, 128], strides = [1, 1, 1]} : vector<2x20x128xf32> to vector<2x3x128xf32>
    %cst_331 = arith.constant dense<0xFF800000> : vector<2x128xf32>
    %418 = vector.multi_reduction <maximumf>, %417, %cst_331 [1] : vector<2x3x128xf32> to vector<2x128xf32>
    %c12_332 = arith.constant 12 : index
    %c0_333 = arith.constant 0 : index
    %c0_334 = arith.constant 0 : index
    %419 = vector.load %arg9[%c12_332, %c0_333, %c0_334] : memref<20x128x4xf32, #tpu.memory_space<vmem>>, vector<1x128x4xf32>
    %420 = vector.shape_cast %419 : vector<1x128x4xf32> to vector<128x4xf32>
    %cst_335 = arith.constant dense<0.000000e+00> : vector<2x4xf32>
    %421 = tpu.matmul %418, %420, %cst_335 {dimension_numbers = #tpu.dot_dimension_numbers<[1], [0], [0], [1], [0, 0, 1, 1], [], []>} : vector<2x128xf32>, vector<128x4xf32>, vector<2x4xf32> -> vector<2x4xf32>
    %422 = arith.addf %416, %421 : vector<2x4xf32>
    %423 = vector.extract_strided_slice %404 {offsets = [0, 9, 0], sizes = [2, 3, 128], strides = [1, 1, 1]} : vector<2x20x128xf32> to vector<2x3x128xf32>
    %cst_336 = arith.constant dense<0xFF800000> : vector<2x128xf32>
    %424 = vector.multi_reduction <maximumf>, %423, %cst_336 [1] : vector<2x3x128xf32> to vector<2x128xf32>
    %c13_337 = arith.constant 13 : index
    %c0_338 = arith.constant 0 : index
    %c0_339 = arith.constant 0 : index
    %425 = vector.load %arg9[%c13_337, %c0_338, %c0_339] : memref<20x128x4xf32, #tpu.memory_space<vmem>>, vector<1x128x4xf32>
    %426 = vector.shape_cast %425 : vector<1x128x4xf32> to vector<128x4xf32>
    %cst_340 = arith.constant dense<0.000000e+00> : vector<2x4xf32>
    %427 = tpu.matmul %424, %426, %cst_340 {dimension_numbers = #tpu.dot_dimension_numbers<[1], [0], [0], [1], [0, 0, 1, 1], [], []>} : vector<2x128xf32>, vector<128x4xf32>, vector<2x4xf32> -> vector<2x4xf32>
    %428 = arith.addf %422, %427 : vector<2x4xf32>
    %429 = vector.extract_strided_slice %404 {offsets = [0, 12, 0], sizes = [2, 3, 128], strides = [1, 1, 1]} : vector<2x20x128xf32> to vector<2x3x128xf32>
    %cst_341 = arith.constant dense<0xFF800000> : vector<2x128xf32>
    %430 = vector.multi_reduction <maximumf>, %429, %cst_341 [1] : vector<2x3x128xf32> to vector<2x128xf32>
    %c14_342 = arith.constant 14 : index
    %c0_343 = arith.constant 0 : index
    %c0_344 = arith.constant 0 : index
    %431 = vector.load %arg9[%c14_342, %c0_343, %c0_344] : memref<20x128x4xf32, #tpu.memory_space<vmem>>, vector<1x128x4xf32>
    %432 = vector.shape_cast %431 : vector<1x128x4xf32> to vector<128x4xf32>
    %cst_345 = arith.constant dense<0.000000e+00> : vector<2x4xf32>
    %433 = tpu.matmul %430, %432, %cst_345 {dimension_numbers = #tpu.dot_dimension_numbers<[1], [0], [0], [1], [0, 0, 1, 1], [], []>} : vector<2x128xf32>, vector<128x4xf32>, vector<2x4xf32> -> vector<2x4xf32>
    %434 = arith.addf %428, %433 : vector<2x4xf32>
    %435 = vector.extract_strided_slice %404 {offsets = [0, 15, 0], sizes = [2, 3, 128], strides = [1, 1, 1]} : vector<2x20x128xf32> to vector<2x3x128xf32>
    %cst_346 = arith.constant dense<0xFF800000> : vector<2x128xf32>
    %436 = vector.multi_reduction <maximumf>, %435, %cst_346 [1] : vector<2x3x128xf32> to vector<2x128xf32>
    %c15_347 = arith.constant 15 : index
    %c0_348 = arith.constant 0 : index
    %c0_349 = arith.constant 0 : index
    %437 = vector.load %arg9[%c15_347, %c0_348, %c0_349] : memref<20x128x4xf32, #tpu.memory_space<vmem>>, vector<1x128x4xf32>
    %438 = vector.shape_cast %437 : vector<1x128x4xf32> to vector<128x4xf32>
    %cst_350 = arith.constant dense<0.000000e+00> : vector<2x4xf32>
    %439 = tpu.matmul %436, %438, %cst_350 {dimension_numbers = #tpu.dot_dimension_numbers<[1], [0], [0], [1], [0, 0, 1, 1], [], []>} : vector<2x128xf32>, vector<128x4xf32>, vector<2x4xf32> -> vector<2x4xf32>
    %440 = arith.addf %434, %439 : vector<2x4xf32>
    %cst_351 = arith.constant 0.000000e+00 : f32
    %441 = vector.broadcast %cst_351 : f32 to vector<2x19x128xf32>
    %442 = vector.extract_strided_slice %308 {offsets = [0, 0, 0], sizes = [2, 19, 32], strides = [1, 1, 1]} : vector<2x22x32xf32> to vector<2x19x32xf32>
    %c0_352 = arith.constant 0 : index
    %c0_353 = arith.constant 0 : index
    %c0_354 = arith.constant 0 : index
    %443 = vector.load %arg5[%c0_352, %c0_353, %c0_354] : memref<4x32x128xf32, #tpu.memory_space<vmem>>, vector<1x32x128xf32>
    %444 = vector.shape_cast %443 : vector<1x32x128xf32> to vector<32x128xf32>
    %cst_355 = arith.constant dense<0.000000e+00> : vector<2x19x128xf32>
    %445 = tpu.matmul %442, %444, %cst_355 {dimension_numbers = #tpu.dot_dimension_numbers<[2], [0], [0, 1], [1], [0, 0, 0, 1, 1, 1], [], []>} : vector<2x19x32xf32>, vector<32x128xf32>, vector<2x19x128xf32> -> vector<2x19x128xf32>
    %446 = arith.addf %441, %445 : vector<2x19x128xf32>
    %447 = vector.extract_strided_slice %308 {offsets = [0, 1, 0], sizes = [2, 19, 32], strides = [1, 1, 1]} : vector<2x22x32xf32> to vector<2x19x32xf32>
    %c1_356 = arith.constant 1 : index
    %c0_357 = arith.constant 0 : index
    %c0_358 = arith.constant 0 : index
    %448 = vector.load %arg5[%c1_356, %c0_357, %c0_358] : memref<4x32x128xf32, #tpu.memory_space<vmem>>, vector<1x32x128xf32>
    %449 = vector.shape_cast %448 : vector<1x32x128xf32> to vector<32x128xf32>
    %cst_359 = arith.constant dense<0.000000e+00> : vector<2x19x128xf32>
    %450 = tpu.matmul %447, %449, %cst_359 {dimension_numbers = #tpu.dot_dimension_numbers<[2], [0], [0, 1], [1], [0, 0, 0, 1, 1, 1], [], []>} : vector<2x19x32xf32>, vector<32x128xf32>, vector<2x19x128xf32> -> vector<2x19x128xf32>
    %451 = arith.addf %446, %450 : vector<2x19x128xf32>
    %452 = vector.extract_strided_slice %308 {offsets = [0, 2, 0], sizes = [2, 19, 32], strides = [1, 1, 1]} : vector<2x22x32xf32> to vector<2x19x32xf32>
    %c2_360 = arith.constant 2 : index
    %c0_361 = arith.constant 0 : index
    %c0_362 = arith.constant 0 : index
    %453 = vector.load %arg5[%c2_360, %c0_361, %c0_362] : memref<4x32x128xf32, #tpu.memory_space<vmem>>, vector<1x32x128xf32>
    %454 = vector.shape_cast %453 : vector<1x32x128xf32> to vector<32x128xf32>
    %cst_363 = arith.constant dense<0.000000e+00> : vector<2x19x128xf32>
    %455 = tpu.matmul %452, %454, %cst_363 {dimension_numbers = #tpu.dot_dimension_numbers<[2], [0], [0, 1], [1], [0, 0, 0, 1, 1, 1], [], []>} : vector<2x19x32xf32>, vector<32x128xf32>, vector<2x19x128xf32> -> vector<2x19x128xf32>
    %456 = arith.addf %451, %455 : vector<2x19x128xf32>
    %457 = vector.extract_strided_slice %308 {offsets = [0, 3, 0], sizes = [2, 19, 32], strides = [1, 1, 1]} : vector<2x22x32xf32> to vector<2x19x32xf32>
    %c3_364 = arith.constant 3 : index
    %c0_365 = arith.constant 0 : index
    %c0_366 = arith.constant 0 : index
    %458 = vector.load %arg5[%c3_364, %c0_365, %c0_366] : memref<4x32x128xf32, #tpu.memory_space<vmem>>, vector<1x32x128xf32>
    %459 = vector.shape_cast %458 : vector<1x32x128xf32> to vector<32x128xf32>
    %cst_367 = arith.constant dense<0.000000e+00> : vector<2x19x128xf32>
    %460 = tpu.matmul %457, %459, %cst_367 {dimension_numbers = #tpu.dot_dimension_numbers<[2], [0], [0, 1], [1], [0, 0, 0, 1, 1, 1], [], []>} : vector<2x19x32xf32>, vector<32x128xf32>, vector<2x19x128xf32> -> vector<2x19x128xf32>
    %461 = arith.addf %456, %460 : vector<2x19x128xf32>
    %c0_368 = arith.constant 0 : index
    %c0_369 = arith.constant 0 : index
    %462 = vector.load %arg8[%c0_368, %c0_369] : memref<1x128xf32, #tpu.memory_space<vmem>>, vector<1x128xf32>
    %463 = vector.shape_cast %462 : vector<1x128xf32> to vector<1x1x128xf32>
    %464 = vector.broadcast %463 : vector<1x1x128xf32> to vector<2x19x128xf32>
    %465 = arith.addf %461, %464 : vector<2x19x128xf32>
    %466 = vector.extract_strided_slice %465 {offsets = [0, 0, 0], sizes = [2, 4, 128], strides = [1, 1, 1]} : vector<2x19x128xf32> to vector<2x4x128xf32>
    %cst_370 = arith.constant dense<0xFF800000> : vector<2x128xf32>
    %467 = vector.multi_reduction <maximumf>, %466, %cst_370 [1] : vector<2x4x128xf32> to vector<2x128xf32>
    %c16_371 = arith.constant 16 : index
    %c0_372 = arith.constant 0 : index
    %c0_373 = arith.constant 0 : index
    %468 = vector.load %arg9[%c16_371, %c0_372, %c0_373] : memref<20x128x4xf32, #tpu.memory_space<vmem>>, vector<1x128x4xf32>
    %469 = vector.shape_cast %468 : vector<1x128x4xf32> to vector<128x4xf32>
    %cst_374 = arith.constant dense<0.000000e+00> : vector<2x4xf32>
    %470 = tpu.matmul %467, %469, %cst_374 {dimension_numbers = #tpu.dot_dimension_numbers<[1], [0], [0], [1], [0, 0, 1, 1], [], []>} : vector<2x128xf32>, vector<128x4xf32>, vector<2x4xf32> -> vector<2x4xf32>
    %471 = arith.addf %440, %470 : vector<2x4xf32>
    %472 = vector.extract_strided_slice %465 {offsets = [0, 4, 0], sizes = [2, 4, 128], strides = [1, 1, 1]} : vector<2x19x128xf32> to vector<2x4x128xf32>
    %cst_375 = arith.constant dense<0xFF800000> : vector<2x128xf32>
    %473 = vector.multi_reduction <maximumf>, %472, %cst_375 [1] : vector<2x4x128xf32> to vector<2x128xf32>
    %c17_376 = arith.constant 17 : index
    %c0_377 = arith.constant 0 : index
    %c0_378 = arith.constant 0 : index
    %474 = vector.load %arg9[%c17_376, %c0_377, %c0_378] : memref<20x128x4xf32, #tpu.memory_space<vmem>>, vector<1x128x4xf32>
    %475 = vector.shape_cast %474 : vector<1x128x4xf32> to vector<128x4xf32>
    %cst_379 = arith.constant dense<0.000000e+00> : vector<2x4xf32>
    %476 = tpu.matmul %473, %475, %cst_379 {dimension_numbers = #tpu.dot_dimension_numbers<[1], [0], [0], [1], [0, 0, 1, 1], [], []>} : vector<2x128xf32>, vector<128x4xf32>, vector<2x4xf32> -> vector<2x4xf32>
    %477 = arith.addf %471, %476 : vector<2x4xf32>
    %478 = vector.extract_strided_slice %465 {offsets = [0, 8, 0], sizes = [2, 4, 128], strides = [1, 1, 1]} : vector<2x19x128xf32> to vector<2x4x128xf32>
    %cst_380 = arith.constant dense<0xFF800000> : vector<2x128xf32>
    %479 = vector.multi_reduction <maximumf>, %478, %cst_380 [1] : vector<2x4x128xf32> to vector<2x128xf32>
    %c18_381 = arith.constant 18 : index
    %c0_382 = arith.constant 0 : index
    %c0_383 = arith.constant 0 : index
    %480 = vector.load %arg9[%c18_381, %c0_382, %c0_383] : memref<20x128x4xf32, #tpu.memory_space<vmem>>, vector<1x128x4xf32>
    %481 = vector.shape_cast %480 : vector<1x128x4xf32> to vector<128x4xf32>
    %cst_384 = arith.constant dense<0.000000e+00> : vector<2x4xf32>
    %482 = tpu.matmul %479, %481, %cst_384 {dimension_numbers = #tpu.dot_dimension_numbers<[1], [0], [0], [1], [0, 0, 1, 1], [], []>} : vector<2x128xf32>, vector<128x4xf32>, vector<2x4xf32> -> vector<2x4xf32>
    %483 = arith.addf %477, %482 : vector<2x4xf32>
    %484 = vector.extract_strided_slice %465 {offsets = [0, 12, 0], sizes = [2, 4, 128], strides = [1, 1, 1]} : vector<2x19x128xf32> to vector<2x4x128xf32>
    %cst_385 = arith.constant dense<0xFF800000> : vector<2x128xf32>
    %485 = vector.multi_reduction <maximumf>, %484, %cst_385 [1] : vector<2x4x128xf32> to vector<2x128xf32>
    %c19_386 = arith.constant 19 : index
    %c0_387 = arith.constant 0 : index
    %c0_388 = arith.constant 0 : index
    %486 = vector.load %arg9[%c19_386, %c0_387, %c0_388] : memref<20x128x4xf32, #tpu.memory_space<vmem>>, vector<1x128x4xf32>
    %487 = vector.shape_cast %486 : vector<1x128x4xf32> to vector<128x4xf32>
    %cst_389 = arith.constant dense<0.000000e+00> : vector<2x4xf32>
    %488 = tpu.matmul %485, %487, %cst_389 {dimension_numbers = #tpu.dot_dimension_numbers<[1], [0], [0], [1], [0, 0, 1, 1], [], []>} : vector<2x128xf32>, vector<128x4xf32>, vector<2x4xf32> -> vector<2x4xf32>
    %489 = arith.addf %483, %488 : vector<2x4xf32>
    %c0_390 = arith.constant 0 : index
    %c0_391 = arith.constant 0 : index
    %490 = vector.load %arg10[%c0_390, %c0_391] : memref<1x4xf32, #tpu.memory_space<vmem>>, vector<1x4xf32>
    %491 = vector.broadcast %490 : vector<1x4xf32> to vector<2x4xf32>
    %492 = arith.addf %489, %491 : vector<2x4xf32>
    %cst_392 = arith.constant dense<0xFF800000> : vector<2xf32>
    %493 = vector.multi_reduction <maximumf>, %492, %cst_392 [1] : vector<2x4xf32> to vector<2xf32>
    %494 = vector.shape_cast %493 : vector<2xf32> to vector<2x1xf32>
    %495 = vector.broadcast %494 : vector<2x1xf32> to vector<2x4xf32>
    %496 = arith.subf %492, %495 : vector<2x4xf32>
    %497 = math.exp %496 : vector<2x4xf32>
    %cst_393 = arith.constant dense<0.000000e+00> : vector<2xf32>
    %498 = vector.multi_reduction <add>, %497, %cst_393 [1] : vector<2x4xf32> to vector<2xf32>
    %499 = vector.shape_cast %498 : vector<2xf32> to vector<2x1xf32>
    %500 = math.log %499 : vector<2x1xf32>
    %501 = vector.broadcast %500 : vector<2x1xf32> to vector<2x4xf32>
    %502 = arith.subf %496, %501 : vector<2x4xf32>
    %c0_394 = arith.constant 0 : index
    %c0_395 = arith.constant 0 : index
    %503 = vector.load %arg11[%c0_394, %c0_395] : memref<2x4xf32, #tpu.memory_space<vmem>>, vector<2x4xf32>
    tpu.vector_store %arg11[%c0_394, %c0_395], %502 {strides = array<i32>} : memref<2x4xf32, #tpu.memory_space<vmem>>, vector<2x4xf32>,
    return
  }
  func.func @transform_0(%arg0: i32, %arg1: memref<2x22xi32, #tpu.memory_space<smem>>) -> (i32, i32) {
    %c0_i32 = arith.constant 0 : i32
    %c0_i32_0 = arith.constant 0 : i32
    %c0_i32_1 = arith.constant 0 : i32
    return %c0_i32, %c0_i32_0 : i32, i32
  }
  func.func @transform_1(%arg0: i32, %arg1: memref<2x22xi32, #tpu.memory_space<smem>>) -> (i32, i32, i32) {
    %c0_i32 = arith.constant 0 : i32
    %c0_i32_0 = arith.constant 0 : i32
    %c0_i32_1 = arith.constant 0 : i32
    %c0_i32_2 = arith.constant 0 : i32
    return %c0_i32, %c0_i32_0, %c0_i32_1 : i32, i32, i32
  }
  func.func @transform_2(%arg0: i32, %arg1: memref<2x22xi32, #tpu.memory_space<smem>>) -> (i32, i32, i32) {
    %c0_i32 = arith.constant 0 : i32
    %c0_i32_0 = arith.constant 0 : i32
    %c0_i32_1 = arith.constant 0 : i32
    %c0_i32_2 = arith.constant 0 : i32
    return %c0_i32, %c0_i32_0, %c0_i32_1 : i32, i32, i32
  }
  func.func @transform_3(%arg0: i32, %arg1: memref<2x22xi32, #tpu.memory_space<smem>>) -> (i32, i32, i32) {
    %c0_i32 = arith.constant 0 : i32
    %c0_i32_0 = arith.constant 0 : i32
    %c0_i32_1 = arith.constant 0 : i32
    %c0_i32_2 = arith.constant 0 : i32
    return %c0_i32, %c0_i32_0, %c0_i32_1 : i32, i32, i32
  }
  func.func @transform_4(%arg0: i32, %arg1: memref<2x22xi32, #tpu.memory_space<smem>>) -> (i32, i32) {
    %c0_i32 = arith.constant 0 : i32
    %c0_i32_0 = arith.constant 0 : i32
    %c0_i32_1 = arith.constant 0 : i32
    return %c0_i32, %c0_i32_0 : i32, i32
  }
  func.func @transform_5(%arg0: i32, %arg1: memref<2x22xi32, #tpu.memory_space<smem>>) -> (i32, i32) {
    %c0_i32 = arith.constant 0 : i32
    %c0_i32_0 = arith.constant 0 : i32
    %c0_i32_1 = arith.constant 0 : i32
    return %c0_i32, %c0_i32_0 : i32, i32
  }
  func.func @transform_6(%arg0: i32, %arg1: memref<2x22xi32, #tpu.memory_space<smem>>) -> (i32, i32) {
    %c0_i32 = arith.constant 0 : i32
    %c0_i32_0 = arith.constant 0 : i32
    %c0_i32_1 = arith.constant 0 : i32
    return %c0_i32, %c0_i32_0 : i32, i32
  }
  func.func @transform_7(%arg0: i32, %arg1: memref<2x22xi32, #tpu.memory_space<smem>>) -> (i32, i32, i32) {
    %c0_i32 = arith.constant 0 : i32
    %c0_i32_0 = arith.constant 0 : i32
    %c0_i32_1 = arith.constant 0 : i32
    %c0_i32_2 = arith.constant 0 : i32
    return %c0_i32, %c0_i32_0, %c0_i32_1 : i32, i32, i32
  }
  func.func @transform_8(%arg0: i32, %arg1: memref<2x22xi32, #tpu.memory_space<smem>>) -> (i32, i32) {
    %c0_i32 = arith.constant 0 : i32
    %c0_i32_0 = arith.constant 0 : i32
    %c0_i32_1 = arith.constant 0 : i32
    return %c0_i32, %c0_i32_0 : i32, i32
  }
  func.func @transform_9(%arg0: i32, %arg1: memref<2x22xi32, #tpu.memory_space<smem>>) -> (i32, i32) {
    %c0_i32 = arith.constant 0 : i32
    %c0_i32_0 = arith.constant 0 : i32
    %c0_i32_1 = arith.constant 0 : i32
    return %c0_i32, %c0_i32_0 : i32, i32
  }
}

</mosaic_0001>

<bundles_post_ra>
// kernel: discriminator_forward.1
= control target key start
LH: loop header
LB: loop body
LE: loop exit
PB: predicated region body
PF: predicated region fallthrough
CT: control target
= control target key end

     0   :  { %s12163_s0 = inlined_call_operand.vmem [shape: s32[2,22], index: 0, kind: input, shape index: {}]   ;;  %s12164_s1 = inlined_call_operand.vmem [shape: f32[50,32], index: 1, kind: input, shape index: {}]   ;;  %s12165_s2 = inlined_call_operand.vmem [shape: f32[2,32,128], index: 2, kind: input, shape index: {}]   ;;  %s12166_s3 = inlined_call_operand.vmem [shape: f32[3,32,128], index: 3, kind: input, shape index: {}]   ;;  %s12167_s4 = inlined_call_operand.vmem [shape: f32[4,32,128], index: 4, kind: input, shape index: {}]   ;;  %s12168_s5 = inlined_call_operand.vmem [shape: f32[1,128], index: 5, kind: input, shape index: {}]   ;;  %s12169_s6 = inlined_call_operand.vmem [shape: f32[1,128], index: 6, kind: input, shape index: {}]   ;;  %s12170_s7 = inlined_call_operand.vmem [shape: f32[1,128], index: 7, kind: input, shape index: {}]   ;;  %s12171_s8 = inlined_call_operand.vmem [shape: f32[20,128,4], index: 8, kind: input, shape index: {}]   ;;  %s12172_s9 = inlined_call_operand.vmem [shape: f32[1,4], index: 9, kind: input, shape index: {}]   ;;  %s12173_s10 = inlined_call_operand.hbm [shape: f32[2,4], index: 10, kind: output, shape index: {}]  }
   0x1   :  { %s15_s15 = sshll.u32 %s12163_s0, 4  ;;  %s16_s15 = int_to_ptr.vmem [resolvable:$true] %s15_s15 }
   0x2   :  { %s8819_s16 = scalar_lea.vmem %s16_s15, 32  ;;  %p8824_p1 = scmp.lt.s32.totalorder %s16_s15, %s16_s15 }
   0x3   :  { %p8820_p0 = scmp.ne.s32.totalorder %s16_s15, %s8819_s16  ;;  %p8825_p2 = scmp.lt.s32.totalorder %s8819_s16, %s8819_s16 }
   0x5   :  { %p8826_p3 = por %p8825_p2, %p8824_p1 }
   0x7   :  { %p8827_p4 = pnand %p8826_p3, %p8820_p0 }
   0x9   :  { %8830 = shalt.err (!%p8827_p4)  }
   0xa   :  { %s8857_s17 = smov [#allocation4]  }
   0xb   :  { %18 = dma.vmem_to_smem %s16_s15, 32, %s8857_s17, [#allocation3] }
   0xc   :  { %8853 = dma.done.wait [#allocation3], 32 }
   0xd   :  { %8854 = vsyncadd [#allocation3], 4294967264 }
   0xe   :  { %20 = sfence }
   0xf   :  { %v6525_v0 = vld [vmem:[%s12165_s2 + $0x20] sm:$0xff]  ;;  %v6526_v1 = vld [vmem:[%s12165_s2 + $0x28] sm:$0xff]  ;;  %v6527_v2 = vld [vmem:[%s12165_s2 + $0x30] sm:$0xff]  ;;  %s40_s23 = sld [smem:[#allocation4]]  ;;  %s6482_s26 = sld [smem:[#allocation4 + $0x1]]  ;;  %vm43_vm0 = vcmask 253952  }
  0x10   :  { %v8236_v3 = vpack.c.bf16 %v6526_v1, %v6525_v0  ;;  %v6528_v4 = vld [vmem:[%s12165_s2 + $0x38] sm:$0xff]  ;;  %s6483_s27 = sld [smem:[#allocation4 + $0x2]]  ;;  %s8933_s28 = sld [smem:[#allocation4 + $0x3]]  ;;  %v224_v6 = vld [vmem:[%s12165_s2] sm:$0xff]  ;;  %v225_v7 = vld [vmem:[%s12165_s2 + $0x8] sm:$0xff] }
  0x11   :  { %v8240_v5 = vpack.c.bf16 %v6528_v4, %v6527_v2  ;;  %s8935_s29 = sld [smem:[#allocation4 + $0x4]]  ;;  %s8937_s30 = sld [smem:[#allocation4 + $0x5]]  ;;  %v8955_v8 = vpack.c.bf16 %v225_v7, %v224_v6 }
  0x12   :  { %8237 = vmatprep.subr.bf16.mxu0 %v8236_v3  ;;  %s8939_s11 = sld [smem:[#allocation4 + $0x6]]  ;;  %s8944_s14 = sld [smem:[#allocation4 + $0x7]] }
  0x13   :  { %8239 = vmatpush3.bf16.msra.mxu0 %v8236_v3  ;;  %s8946_s15 = sld [smem:[#allocation4 + $0x8]]  ;;  %s8951_s18 = sld [smem:[#allocation4 + $0x9]] }
  0x14   :  { %8241 = vmatprep.subr.bf16.mxu0 %v8240_v5  ;;  %s8953_s19 = sld [smem:[#allocation4 + $0xa]]  ;;  %s8960_s22 = sld [smem:[#allocation4 + $0xb]] }
  0x15   :  { %s41_s0 = scalar_lea.vmem %s12164_s1, %s40_s23 }
  0x16   :  { %21 = vsyncpa [#allocation6], 0  ;;  %v42_v9 = vld [vmem:[%s41_s0] sm:$0x1]  ;;  %s46_s12 = scalar_lea.vmem %s12164_s1, %s6482_s26  ;;  %s50_s17 = scalar_lea.vmem %s12164_s1, %s6483_s27  ;;  %v243_v10 = vlaneseq  ;;  %v8858_v13 = vmov 1966171168  }
  0x17   :  { %8243 = vmatpush3.bf16.msra.mxu0 %v8240_v5  ;;  %44 = vst.msk [vmem:[#allocation2] sm:$0x1] %vm43_vm0, %v42_v9  ;;  %v47_v11 = vld [vmem:[%s46_s12] sm:$0x1]  ;;  %s54_s21 = scalar_lea.vmem %s12164_s1, %s8933_s28  ;;  %s58_s26 = scalar_lea.vmem %s12164_s1, %s8935_s29  ;;  %v241_v14 = vunpack.c.l.s4 %v8858_v13  ;;  %vm789_vm1 = vcmask 261120   ;;  %vm8860_vm2 = vmmov 0  }
  0x18   :  { %v51_v12 = vld [vmem:[%s50_s17] sm:$0x1]  ;;  %48 = vst.msk [vmem:[#allocation2 + $0x1] sm:$0x1] %vm43_vm0, %v47_v11  ;;  %s62_s12 = scalar_lea.vmem %s12164_s1, %s8937_s30  ;;  %s66_s16 = scalar_lea.vmem %s12164_s1, %s8939_s11  ;;  %8245 = vmatprep.subr.bf16.mxu0 %v8955_v8  ;;  %v244_v21 = vshrl.u32 %v243_v10, 7  ;;  %vm1708_vm3 = vcmask 1041408  }
  0x19   :  { %52 = vst.msk [vmem:[#allocation2 + $0x2] sm:$0x1] %vm43_vm0, %v51_v12  ;;  %v55_v15 = vld [vmem:[%s54_s21] sm:$0x1]  ;;  %s70_s23 = scalar_lea.vmem %s12164_s1, %s8944_s14  ;;  %s74_s30 = scalar_lea.vmem %s12164_s1, %s8946_s15  ;;  %v242_v24 = vunpack.c.0.s8 %v241_v14  ;;  %vm1808_vm4 = vcmask 1041409   ;;  %vm3365_vm5 = vcmask 1045508  }
  0x1a   :  { %v59_v16 = vld [vmem:[%s58_s26] sm:$0x1]  ;;  %56 = vst.msk [vmem:[#allocation2 + $0x3] sm:$0x1] %vm43_vm0, %v55_v15  ;;  %s78_s24 = scalar_lea.vmem %s12164_s1, %s8951_s18  ;;  %s82_s25 = scalar_lea.vmem %s12164_s1, %s8953_s19  ;;  %vm10670_vm6 = vmor %vm1708_vm3, %vm3365_vm5  ;;  %vm3100_vm7 = vcmask 1042432   ;;  %vm3101_vm8 = vcmask 1046532  }
  0x1b   :  { %60 = vst.msk [vmem:[#allocation2 + $0x4] sm:$0x1] %vm43_vm0, %v59_v16  ;;  %v63_v17 = vld [vmem:[%s62_s12] sm:$0x1]  ;;  %s86_s12 = scalar_lea.vmem %s12164_s1, %s8960_s22  ;;  %s6493_s28 = sld [smem:[#allocation4 + $0xc]]  ;;  %v9021_v26 = vsub.s32 %v242_v24, %v244_v21  ;;  %vm10704_vm9 = vmor %vm3100_vm7, %vm3101_vm8  ;;  %vm3662_vm10 = vcmask 1045507  }
  0x1c   :  { %v67_v18 = vld [vmem:[%s66_s16] sm:$0x1]  ;;  %64 = vst.msk [vmem:[#allocation2 + $0x5] sm:$0x1] %vm43_vm0, %v63_v17  ;;  %s6494_s18 = sld [smem:[#allocation4 + $0xd]]  ;;  %s6495_s19 = sld [smem:[#allocation4 + $0xe]] }
  0x1d   :  { %68 = vst.msk [vmem:[#allocation2 + $0x6] sm:$0x1] %vm43_vm0, %v67_v18  ;;  %v71_v19 = vld [vmem:[%s70_s23] sm:$0x1]  ;;  %s6496_s13 = sld [smem:[#allocation4 + $0xf]]  ;;  %s6497_s16 = sld [smem:[#allocation4 + $0x10]] }
  0x1e   :  { %v75_v20 = vld [vmem:[%s74_s30] sm:$0x1]  ;;  %72 = vst.msk [vmem:[#allocation2 + $0x7] sm:$0x1] %vm43_vm0, %v71_v19  ;;  %s9017_s29 = sld [smem:[#allocation4 + $0x11]]  ;;  %s9019_s17 = sld [smem:[#allocation4 + $0x12]] }
  0x1f   :  { %76 = vst.msk [vmem:[#allocation2 + $0x8] sm:$0x1] %vm43_vm0, %v75_v20  ;;  %v79_v22 = vld [vmem:[%s78_s24] sm:$0x1]  ;;  %s9023_s22 = sld [smem:[#allocation4 + $0x13]]  ;;  %s9025_s23 = sld [smem:[#allocation4 + $0x14]] }
  0x20   :  { %v83_v23 = vld [vmem:[%s82_s25] sm:$0x1]  ;;  %80 = vst.msk [vmem:[#allocation2 + $0x9] sm:$0x1] %vm43_vm0, %v79_v22  ;;  %s9027_s20 = sld [smem:[#allocation4 + $0x15]]  ;;  %s9029_s21 = sld [smem:[#allocation4 + $0x80]] }
  0x21   :  { %84 = vst.msk [vmem:[#allocation2 + $0xa] sm:$0x1] %vm43_vm0, %v83_v23  ;;  %v87_v25 = vld [vmem:[%s86_s12] sm:$0x1]  ;;  %s90_s0 = scalar_lea.vmem %s12164_s1, %s6493_s28  ;;  %s9034_s24 = sld [smem:[#allocation4 + $0x81]]  ;;  %vm3882_vm11 = vcmask 1043457  }
  0x22   :  { %88 = vst.msk [vmem:[#allocation2 + $0xb] sm:$0x1] %vm43_vm0, %v87_v25  ;;  %v91_v27 = vld [vmem:[%s90_s0] sm:$0x1]  ;;  %s94_s25 = scalar_lea.vmem %s12164_s1, %s6494_s18  ;;  %s98_s12 = scalar_lea.vmem %s12164_s1, %s6495_s19  ;;  %vm3775_vm12 = vcmask 1044482   ;;  %vm5803_vm13 = vcmask 1043456  }
  0x23   :  { %92 = vst.msk [vmem:[#allocation2 + $0xc] sm:$0x1] %vm43_vm0, %v91_v27  ;;  %v95_v29 = vld [vmem:[%s94_s25] sm:$0x1]  ;;  %s102_s11 = scalar_lea.vmem %s12164_s1, %s6496_s13  ;;  %s106_s26 = scalar_lea.vmem %s12164_s1, %s6497_s16  ;;  %vm6410_vm14 = vcmask 25600  }
  0x24   :  { %v99_v30 = vld [vmem:[%s98_s12] sm:$0x1]  ;;  %96 = vst.msk [vmem:[#allocation2 + $0xd] sm:$0x1] %vm43_vm0, %v95_v29  ;;  %s110_s13 = scalar_lea.vmem %s12164_s1, %s9017_s29  ;;  %s114_s15 = scalar_lea.vmem %s12164_s1, %s9019_s17 }
  0x25   :  { %v218_v28 = vld [vmem:[#allocation2] sm:$0xff]  ;;  %100 = vst.msk [vmem:[#allocation2 + $0xe] sm:$0x1] %vm43_vm0, %v99_v30  ;;  %s118_s29 = scalar_lea.vmem %s12164_s1, %s9023_s22  ;;  %s122_s17 = scalar_lea.vmem %s12164_s1, %s9025_s23 }
  0x26   :  { %v9046_v31 = vcombine.high %v218_v28, %v218_v28  ;;  %v246_v32 = vrot.slane %v218_v28, %v9021_v26  ;;  %v103_v33 = vld [vmem:[%s102_s11] sm:$0x1]  ;;  %s126_s18 = scalar_lea.vmem %s12164_s1, %s9027_s20  ;;  %s130_s27 = scalar_lea.vmem %s12164_s1, %s9029_s21 }
  0x27   :  { %v107_v34 = vld [vmem:[%s106_s26] sm:$0x1]  ;;  %104 = vst.msk [vmem:[#allocation2 + $0xf] sm:$0x1] %vm43_vm0, %v103_v33  ;;  %s135_s20 = scalar_lea.vmem %s12164_s1, %s9034_s24  ;;  %s9097_s21 = sld [smem:[#allocation4 + $0x83]] }
  0x28   :  { %12257 = vst [vmem:[#allocation9_spill] sm:$0xff] %v9046_v31  ;;  %v253_v35 = vrot.slane %v9046_v31, %v9021_v26  ;;  %v254_v36 = vcombine.high %v246_v32, %v246_v32  ;;  %v262_v37 = vrot.slane %v246_v32, %v9021_v26  ;;  %108 = vst.msk [vmem:[#allocation2 + $0x10] sm:$0x1] %vm43_vm0, %v107_v34  ;;  %v111_v38 = vld [vmem:[%s110_s13] sm:$0x1]  ;;  %s9093_s13 = sld [smem:[#allocation4 + $0x82]] }
  0x29   :  { %v115_v39 = vld [vmem:[%s114_s15] sm:$0x1]  ;;  %112 = vst.msk [vmem:[#allocation2 + $0x11] sm:$0x1] %vm43_vm0, %v111_v38  ;;  %s9099_s25 = sld [smem:[#allocation4 + $0x84]]  ;;  %s9103_s14 = sld [smem:[#allocation4 + $0x85]] }
  0x2a   :  { %116 = vst.msk [vmem:[#allocation2 + $0x12] sm:$0x1] %vm43_vm0, %v115_v39  ;;  %v119_v40 = vld [vmem:[%s118_s29] sm:$0x1]  ;;  %v255_v42 = vcombine.high %v253_v35, %v253_v35  ;;  %v269_v43 = vrot.slane %v253_v35, %v9021_v26  ;;  %v276_v44 = vrot.slane %v254_v36, %v9021_v26  ;;  %v284_v45 = vcombine.high %v262_v37, %v262_v37  ;;  %s9105_s24 = sld [smem:[#allocation4 + $0x86]]  ;;  %s9107_s15 = sld [smem:[#allocation4 + $0x87]] }
  0x2b   :  { %v123_v41 = vld [vmem:[%s122_s17] sm:$0x1]  ;;  %120 = vst.msk [vmem:[#allocation2 + $0x13] sm:$0x1] %vm43_vm0, %v119_v40  ;;  %s9109_s16 = sld [smem:[#allocation4 + $0x88]]  ;;  %s9112_s12 = sld [smem:[#allocation4 + $0x89]] }
  0x2c   :  { %124 = vst.msk [vmem:[#allocation2 + $0x14] sm:$0x1] %vm43_vm0, %v123_v41  ;;  %v127_v46 = vld [vmem:[%s126_s18] sm:$0x1]  ;;  %v283_v49 = vrot.slane %v255_v42, %v9021_v26  ;;  %v285_v50 = vcombine.high %v269_v43, %v269_v43  ;;  %v286_v51 = vcombine.high %v276_v44, %v276_v44  ;;  %v529_v52 = vcombine.low %v276_v44, %v284_v45  ;;  %s9114_s29 = sld [smem:[#allocation4 + $0x8a]]  ;;  %s9116_s30 = sld [smem:[#allocation4 + $0x8b]] }
  0x2d   :  { %v131_v47 = vld [vmem:[%s130_s27] sm:$0x1]  ;;  %128 = vst.msk [vmem:[#allocation2 + $0x15] sm:$0x1] %vm43_vm0, %v127_v46  ;;  %v897_v53 = vcombine.low %v262_v37, %v276_v44  ;;  %v6540_v54 = vcombine.high %v262_v37, %v276_v44  ;;  %s9118_s28 = sld [smem:[#allocation4 + $0x8c]]  ;;  %s9137_s18 = sld [smem:[#allocation4 + $0x8d]] }
  0x2e   :  { %133 = vst.msk [vmem:[#allocation2 + $0x18] sm:$0x1] %vm43_vm0, %v131_v47  ;;  %v136_v48 = vld [vmem:[%s135_s20] sm:$0x1]  ;;  %v287_v55 = vcombine.high %v283_v49, %v283_v49  ;;  %v530_v56 = vcombine.low %v286_v51, %v269_v43  ;;  %v531_v57 = vcombine.low %v283_v49, %v285_v50  ;;  %v539_v58 = vrot.slane %v529_v52, %v9021_v26  ;;  %v219_v59 = vld [vmem:[#allocation2 + $0x8] sm:$0xff]  ;;  %s139_s0 = scalar_lea.vmem %s12164_s1, %s9093_s13  ;;  %s143_s27 = scalar_lea.vmem %s12164_s1, %s9097_s21 }
  0x2f   :  { %137 = vst.msk [vmem:[#allocation2 + $0x19] sm:$0x1] %vm43_vm0, %v136_v48  ;;  %v899_v60 = vcombine.low %v269_v43, %v283_v49  ;;  %v6541_v61 = vcombine.high %v269_v43, %v283_v49  ;;  %v9121_v62 = vrot.slane %v897_v53, %v9021_v26  ;;  %v9124_v63 = vrot.slane %v6540_v54, %v9021_v26  ;;  %v140_v4 = vld [vmem:[%s139_s0] sm:$0x1]  ;;  %s147_s20 = scalar_lea.vmem %s12164_s1, %s9099_s25  ;;  %s151_s25 = scalar_lea.vmem %s12164_s1, %s9103_s14 }
  0x30   :  { %v9126_v0 = vcombine.high %v219_v59, %v219_v59  ;;  %v295_v1 = vrot.slane %v219_v59, %v9021_v26  ;;  %v546_v2 = vrot.slane %v530_v56, %v9021_v26  ;;  %v9131_v3 = vrot.slane %v531_v57, %v9021_v26  ;;  %141 = vst.msk [vmem:[#allocation2 + $0x1a] sm:$0x1] %vm43_vm0, %v140_v4  ;;  %v144_v14 = vld [vmem:[%s143_s27] sm:$0x1]  ;;  %s155_s0 = scalar_lea.vmem %s12164_s1, %s9105_s24  ;;  %s159_s19 = scalar_lea.vmem %s12164_s1, %s9107_s15 }
  0x31   :  { %12258 = vst [vmem:[#allocation10_spill] sm:$0xff] %v9124_v63  ;;  %v9148_v5 = vrot.slane %v899_v60, %v9021_v26  ;;  %v9151_v6 = vrot.slane %v6541_v61, %v9021_v26  ;;  %v929_v7 = vcombine.low %v9121_v62, %v9124_v63  ;;  %v148_v15 = vld [vmem:[%s147_s20] sm:$0x1]  ;;  %145 = vst.msk [vmem:[#allocation2 + $0x1b] sm:$0x1] %vm43_vm0, %v144_v14  ;;  %s163_s22 = scalar_lea.vmem %s12164_s1, %s9109_s16  ;;  %s167_s23 = scalar_lea.vmem %s12164_s1, %s9112_s12  ;;  %v226_v62 = vld [vmem:[%s12165_s2 + $0x10] sm:$0xff] }
  0x32   :  { %12259 = vst [vmem:[#allocation11_spill] sm:$0xff] %v9126_v0  ;;  %v303_v9 = vcombine.high %v295_v1, %v295_v1  ;;  %v9156_v10 = vrot.slane %v295_v1, %v9021_v26  ;;  %v9158_v11 = vcombine.low %v539_v58, %v546_v2  ;;  %v5217_v12 = vcombine.low %v546_v2, %v9131_v3  ;;  %v152_v18 = vld [vmem:[%s151_s25] sm:$0x1]  ;;  %s171_s21 = scalar_lea.vmem %s12164_s1, %s9114_s29  ;;  %s175_s29 = scalar_lea.vmem %s12164_s1, %s9116_s30 }
  0x33   :  { %12260 = vst [vmem:[#allocation12_spill] sm:$0xff] %v9148_v5  ;;  %12261 = vst [vmem:[#allocation13_spill] sm:$0xff] %v9151_v6  ;;  %v302_v16 = vrot.slane %v9126_v0, %v9021_v26  ;;  %v156_v19 = vld [vmem:[%s155_s0] sm:$0x1]  ;;  %v930_v21 = vcombine.low %v9148_v5, %v9151_v6  ;;  %s179_s0 = scalar_lea.vmem %s12164_s1, %s9118_s28  ;;  %s183_s28 = scalar_lea.vmem %s12164_s1, %s9137_s18 }
  0x34   :  { %v220_v13 = vld [vmem:[#allocation2 + $0x10] sm:$0x3f]  ;;  %149 = vst.msk [vmem:[#allocation2 + $0x1c] sm:$0x1] %vm43_vm0, %v148_v15  ;;  %v9188_v22 = vrot.slane %v303_v9, %v9021_v26  ;;  %v333_v23 = vcombine.high %v9156_v10, %v9156_v10  ;;  %v532_v24 = vcombine.low %v287_v55, %v9156_v10  ;;  %v569_v25 = vrot.slane %v9158_v11, %v9021_v26  ;;  %v160_v27 = vld [vmem:[%s159_s19] sm:$0x1] }
  0x35   :  { %v344_v17 = vrot.slane %v220_v13, %v9021_v26  ;;  %v9179_v20 = vcombine.high %v220_v13, %v220_v13  ;;  %153 = vst.msk [vmem:[#allocation2 + $0x1d] sm:$0x1] %vm43_vm0, %v152_v18  ;;  %157 = vst.msk [vmem:[#allocation2 + $0x1e] sm:$0x1] %vm43_vm0, %v156_v19  ;;  %v164_v28 = vld [vmem:[%s163_s22] sm:$0x1]  ;;  %v9206_v29 = vrot.slane %v5217_v12, %v9021_v26 }
  0x36   :  { %v304_v30 = vcombine.high %v302_v16, %v302_v16  ;;  %v9209_v32 = vrot.slane %v302_v16, %v9021_v26  ;;  %161 = vst.msk [vmem:[#allocation2 + $0x1f] sm:$0x1] %vm43_vm0, %v160_v27  ;;  %165 = vst.msk [vmem:[#allocation2 + $0x20] sm:$0x1] %vm43_vm0, %v164_v28  ;;  %v168_v34 = vld [vmem:[%s167_s23] sm:$0x1]  ;;  %v560_v36 = vrot.slane %v532_v24, %v9021_v26 }
  0x37   :  { %12262 = vst [vmem:[#allocation14_spill] sm:$0xff] %v9179_v20  ;;  %12263 = vst [vmem:[#allocation15_spill] sm:$0xff] %v9206_v29  ;;  %v9212_v33 = vrot.slane %v344_v17, %v9021_v26  ;;  %v172_v35 = vld [vmem:[%s171_s21] sm:$0x1]  ;;  %v578_v37 = vcombine.low %v9188_v22, %v333_v23  ;;  %v335_v38 = vcombine.high %v9188_v22, %v9188_v22  ;;  %s9236_s14 = sld [smem:[#allocation4 + $0x8e]]  ;;  %s9249_s19 = sld [smem:[#allocation4 + $0x8f]] }
  0x38   :  { %v351_v39 = vrot.slane %v9179_v20, %v9021_v26  ;;  %169 = vst.msk [vmem:[#allocation2 + $0x21] sm:$0x1] %vm43_vm0, %v168_v34  ;;  %173 = vst.msk [vmem:[#allocation2 + $0x22] sm:$0x1] %vm43_vm0, %v172_v35  ;;  %v176_v40 = vld [vmem:[%s175_s29] sm:$0x1]  ;;  %v9239_v42 = vrot.slane %v304_v30, %v9021_v26  ;;  %v334_v43 = vcombine.high %v9209_v32, %v9209_v32 }
  0x39   :  { %v180_v41 = vld [vmem:[%s179_s0] sm:$0x1]  ;;  %v352_v44 = vcombine.high %v344_v17, %v344_v17  ;;  %v9245_v45 = vcombine.high %v9212_v33, %v9212_v33  ;;  %177 = vst.msk [vmem:[#allocation2 + $0x23] sm:$0x1] %vm43_vm0, %v176_v40  ;;  %s9251_s18 = sld [smem:[#allocation4 + $0x90]]  ;;  %v562_v47 = vcombine.low %v9131_v3, %v560_v36  ;;  %v588_v48 = vrot.slane %v578_v37, %v9021_v26  ;;  %s9257_s24 = sld [smem:[#allocation4 + $0x91]] }
  0x3a   :  { %181 = vst.msk [vmem:[#allocation2 + $0x24] sm:$0x1] %vm43_vm0, %v180_v41  ;;  %v184_v46 = vld [vmem:[%s183_s28] sm:$0x1]  ;;  %v579_v49 = vcombine.low %v335_v38, %v9209_v32  ;;  %v353_v50 = vcombine.high %v351_v39, %v351_v39  ;;  %s9259_s27 = sld [smem:[#allocation4 + $0x92]]  ;;  %v336_v51 = vcombine.high %v9239_v42, %v9239_v42  ;;  %v580_v52 = vcombine.low %v9239_v42, %v334_v43  ;;  %s9270_s22 = sld [smem:[#allocation4 + $0x93]] }
  0x3b   :  { %12264 = vst [vmem:[#allocation16_spill] sm:$0xff] %v9245_v45  ;;  %185 = vst.msk [vmem:[#allocation2 + $0x25] sm:$0x1] %vm43_vm0, %v184_v46  ;;  %v9265_v53 = vrot.slane %v351_v39, %v9021_v26  ;;  %v9268_v54 = vrot.slane %v352_v44, %v9021_v26  ;;  %s9272_s15 = sld [smem:[#allocation4 + $0x94]]  ;;  %v576_v55 = vrot.slane %v562_v47, %v9021_v26  ;;  %s9281_s16 = sld [smem:[#allocation4 + $0x95]] }
  0x3c   :  { %v5218_v56 = vcombine.low %v560_v36, %v588_v48  ;;  %v9276_v57 = vrot.slane %v579_v49, %v9021_v26  ;;  %v9279_v58 = vrot.slane %v353_v50, %v9021_v26  ;;  %v581_v59 = vcombine.low %v336_v51, %v9212_v33 }
  0x3d   :  { %12265 = vst [vmem:[#allocation17_spill] sm:$0xff] %v9265_v53  ;;  %v9285_v60 = vrot.slane %v580_v52, %v9021_v26  ;;  %v9289_v61 = vcombine.high %v9268_v54, %v9268_v54  ;;  %v627_v1 = vcombine.low %v9268_v54, %v9245_v45  ;;  %v9293_v2 = vcombine.low %v569_v25, %v576_v55  ;;  %v221_v9 = vld [vmem:[#allocation2 + $0x18] sm:$0xff]  ;;  %s187_s13 = scalar_lea.vmem %s12164_s1, %s9236_s14  ;;  %s191_s25 = scalar_lea.vmem %s12164_s1, %s9249_s19 }
  0x3e   :  { %12266 = vst [vmem:[#allocation18_spill] sm:$0xff] %v9276_v57  ;;  %12267 = vst [vmem:[#allocation19_spill] sm:$0xff] %v9279_v58  ;;  %v9296_v3 = vrot.slane %v5218_v56, %v9021_v26  ;;  %v610_v4 = vcombine.low %v588_v48, %v9276_v57  ;;  %v937_v11 = vrot.slane %v929_v7, %v9021_v26  ;;  %v188_v16 = vld [vmem:[%s187_s13] sm:$0x1]  ;;  %v227_v7 = vld [vmem:[%s12165_s2 + $0x18] sm:$0xff] }
  0x3f   :  { %12268 = vst [vmem:[#allocation20_spill] sm:$0xff] %v9285_v60  ;;  %12269 = vst [vmem:[#allocation21_spill] sm:$0xff] %v9289_v61  ;;  %v9308_v12 = vrot.slane %v581_v59, %v9021_v26  ;;  %v391_v13 = vrot.slane %v221_v9, %v9021_v26  ;;  %v628_v14 = vcombine.low %v9289_v61, %v9265_v53  ;;  %s195_s28 = scalar_lea.vmem %s12164_s1, %s9251_s18  ;;  %7349 = vmatprep.mubr.msk.f32.mxu0 %vm789_vm1, %v9293_v2  ;;  %v192_v19 = vld [vmem:[%s191_s25] sm:$0x1]  ;;  %s199_s19 = scalar_lea.vmem %s12164_s1, %s9257_s24 }
  0x40   :  { %12270 = vst [vmem:[#allocation22_spill] sm:$0xff] %v9293_v2  ;;  %12271 = vst [vmem:[#allocation23_spill] sm:$0xff] %v9296_v3  ;;  %v9314_v15 = vrot.slane %v627_v1, %v9021_v26  ;;  %v618_v18 = vrot.slane %v610_v4, %v9021_v26  ;;  %v9336_v23 = vcombine.high %v221_v9, %v221_v9  ;;  %v196_v24 = vld [vmem:[%s195_s28] sm:$0x1]  ;;  %s203_s20 = scalar_lea.vmem %s12164_s1, %s9259_s27  ;;  %s207_s13 = scalar_lea.vmem %s12164_s1, %s9270_s22  ;;  %v9902_v2 = vld [vmem:[%s12171_s8 + $0x1a8] sm:$0xff] }
  0x41   :  { %12272 = vst [vmem:[#allocation24_spill] sm:$0xff] %v9308_v12  ;;  %189 = vst.msk [vmem:[#allocation2 + $0x26] sm:$0x1] %vm43_vm0, %v188_v16  ;;  %v944_v25 = vrot.slane %v930_v21, %v9021_v26  ;;  %v611_v27 = vcombine.low %v9285_v60, %v9308_v12  ;;  %v399_v28 = vcombine.high %v391_v13, %v391_v13  ;;  %v200_v35 = vld [vmem:[%s199_s19] sm:$0x1]  ;;  %s211_s25 = scalar_lea.vmem %s12164_s1, %s9272_s15  ;;  %s215_s11 = scalar_lea.vmem %s12164_s1, %s9281_s16 }
  0x42   :  { %12273 = vst [vmem:[#allocation25_spill] sm:$0xff] %v9314_v15  ;;  %12274 = vst [vmem:[#allocation26_spill] sm:$0xff] %v9336_v23  ;;  %v9353_v30 = vrot.slane %v391_v13, %v9021_v26  ;;  %v9356_v34 = vrot.slane %v628_v14, %v9021_v26  ;;  %v204_v36 = vld [vmem:[%s203_s20] sm:$0x1]  ;;  %v398_v21 = vrot.slane %v9336_v23, %v9021_v26  ;;  %s8862_s1 = smov [#allocation5]  }
  0x43   :  { %193 = vst.msk [vmem:[#allocation2 + $0x27] sm:$0x1] %vm43_vm0, %v192_v19  ;;  %197 = vst.msk [vmem:[#allocation2 + $0x28] sm:$0x1] %vm43_vm0, %v196_v24  ;;  %v8248_v37 = vpack.c.bf16 %v227_v7, %v226_v62  ;;  %v208_v38 = vld [vmem:[%s207_s13] sm:$0x1]  ;;  %v946_v40 = vcombine.low %v9156_v10, %v9188_v22  ;;  %v6542_v41 = vcombine.high %v9156_v10, %v9188_v22 }
  0x44   :  { %12275 = vst [vmem:[#allocation27_spill] sm:$0xff] %v9353_v30  ;;  %12276 = vst [vmem:[#allocation28_spill] sm:$0xff] %v9356_v34  ;;  %v212_v39 = vld [vmem:[%s211_s25] sm:$0x1]  ;;  %v625_v43 = vrot.slane %v611_v27, %v9021_v26  ;;  %v9382_v44 = vrot.slane %v399_v28, %v9021_v26  ;;  %v659_v46 = vcombine.low %v9314_v15, %v9356_v34 }
  0x45   :  { %201 = vst.msk [vmem:[#allocation2 + $0x29] sm:$0x1] %vm43_vm0, %v200_v35  ;;  %205 = vst.msk [vmem:[#allocation2 + $0x2a] sm:$0x1] %vm43_vm0, %v204_v36  ;;  %v216_v47 = vld [vmem:[%s215_s11] sm:$0x1]  ;;  %v400_v49 = vcombine.high %v398_v21, %v398_v21  ;;  %v9391_v50 = vrot.slane %v398_v21, %v9021_v26  ;;  %v9395_v10 = vrot.slane %v946_v40, %v9021_v26 }
  0x46   :  { %12277 = vst [vmem:[#allocation29_spill] sm:$0xff] %v9382_v44  ;;  %209 = vst.msk [vmem:[#allocation2 + $0x2b] sm:$0x1] %vm43_vm0, %v208_v38  ;;  %v9398_v22 = vrot.slane %v6542_v41, %v9021_v26  ;;  %v9400_v51 = vcombine.low %v618_v18, %v625_v43  ;;  %v629_v52 = vcombine.low %v9279_v58, %v9382_v44 }
  0x47   :  { %213 = vst.msk [vmem:[#allocation2 + $0x2c] sm:$0x1] %vm43_vm0, %v212_v39  ;;  %217 = vst.msk [vmem:[#allocation2 + $0x2d] sm:$0x1] %vm43_vm0, %v216_v47  ;;  %v6529_v55 = vcombine.high %v9353_v30, %v9382_v44  ;;  %v9406_v56 = vcombine.low %v937_v11, %v944_v25  ;;  %v9409_v59 = vrot.slane %v400_v49, %v9021_v26 }
  0x48   :  { %12278 = vst [vmem:[#allocation30_spill] sm:$0xff] %v9395_v10  ;;  %12279 = vst [vmem:[#allocation31_spill] sm:$0xff] %v9398_v22  ;;  %v978_v1 = vcombine.low %v9395_v10, %v9398_v22  ;;  %v948_v9 = vcombine.low %v9209_v32, %v9239_v42  ;;  %7350 = vmatmul.mubr.msk.f32.vlgmr.msra.gmra.mrb[0].mxu0 %vm789_vm1, %v9400_v51  ;;  %v651_v13 = vrot.slane %v629_v52, %v9021_v26 }
  0x49   :  { %12280 = vst [vmem:[#allocation32_spill] sm:$0xff] %v9400_v51  ;;  %12281 = vst [vmem:[#allocation33_spill] sm:$0xff] %v9406_v56  ;;  %v9421_v11 = vrot.slane %v6529_v55, %v9021_v26  ;;  %v667_v14 = vrot.slane %v659_v46, %v9021_v26  ;;  %v6543_v16 = vcombine.high %v9209_v32, %v9239_v42  ;;  %8247 = vmatpush3.bf16.msra.mxu0 %v8955_v8 }
  0x4a   :  { %v222_v62 = vld [vmem:[#allocation2 + $0x20] sm:$0xff]  ;;  %v676_v7 = vcombine.low %v9391_v50, %v9409_v59  ;;  %v6530_v18 = vcombine.high %v9391_v50, %v9409_v59  ;;  %v9432_v19 = vrot.slane %v948_v9, %v9021_v26  ;;  %v9436_v24 = vcombine.high %v9353_v30, %v9353_v30  ;;  %8249 = vmatprep.subr.bf16.mxu0 %v8248_v37 }
  0x4b   :  { %12282 = vst [vmem:[#allocation34_spill] sm:$0xff] %v9421_v11  ;;  %v660_v25 = vcombine.low %v651_v13, %v9421_v11  ;;  %v440_v32 = vrot.slane %v222_v62, %v9021_v26  ;;  %v9440_v8 = vcombine.high %v222_v62, %v222_v62  ;;  %v9443_v42 = vrot.slane %v978_v1, %v9021_v26 }
  0x4c   :  { %12283 = vst [vmem:[#allocation35_spill] sm:$0xff] %v9432_v19  ;;  %12284 = vst [vmem:[#allocation36_spill] sm:$0xff] %v9436_v24  ;;  %v9446_v27 = vrot.slane %v676_v7, %v9021_v26  ;;  %v9449_v28 = vrot.slane %v6530_v18, %v9021_v26  ;;  %v9452_v35 = vrot.slane %v6543_v16, %v9021_v26 }
  0x4d   :  { %12285 = vst [vmem:[#allocation37_spill] sm:$0xff] %v9440_v8  ;;  %v995_v36 = vcombine.low %v9212_v33, %v9268_v54  ;;  %v674_v21 = vrot.slane %v660_v25, %v9021_v26  ;;  %v448_v38 = vcombine.high %v440_v32, %v440_v32  ;;  %v9458_v39 = vrot.slane %v440_v32, %v9021_v26 }
  0x4e   :  { %12286 = vst [vmem:[#allocation38_spill] sm:$0xff] %v9446_v27  ;;  %12287 = vst [vmem:[#allocation39_spill] sm:$0xff] %v9449_v28  ;;  %v223_v40 = vld [vmem:[#allocation2 + $0x28] sm:$0x3f]  ;;  %v447_v41 = vrot.slane %v9440_v8, %v9021_v26  ;;  %v708_v43 = vcombine.low %v9446_v27, %v9449_v28  ;;  %8251 = vmatpush3.bf16.msra.mxu0 %v8248_v37  ;;  %v6544_v49 = vcombine.high %v9212_v33, %v9268_v54 }
  0x4f   :  { %12288 = vst [vmem:[#allocation40_spill] sm:$0xff] %v9452_v35  ;;  %v489_v46 = vrot.slane %v223_v40, %v9021_v26  ;;  %v9465_v47 = vcombine.high %v223_v40, %v223_v40  ;;  %v675_v52 = vcombine.low %v667_v14, %v674_v21  ;;  %v9470_v55 = vrot.slane %v448_v38, %v9021_v26 }
  0x50   :  { %v449_v1 = vcombine.high %v447_v41, %v447_v41  ;;  %v9473_v9 = vrot.slane %v447_v41, %v9021_v26  ;;  %v979_v62 = vcombine.low %v9432_v19, %v9452_v35  ;;  %v9488_v14 = vrot.slane %v708_v43, %v9021_v26 }
  0x51   :  { %12289 = vst [vmem:[#allocation41_spill] sm:$0xff] %v9465_v47  ;;  %v497_v13 = vcombine.high %v489_v46, %v489_v46  ;;  %v9476_v16 = vrot.slane %v489_v46, %v9021_v26  ;;  %v496_v37 = vrot.slane %v9465_v47, %v9021_v26  ;;  %7352 = vmatprep.mubr.msk.f32.mxu0 %vm789_vm1, %v675_v52 }
  0x52   :  { %v678_v33 = vcombine.low %v9458_v39, %v9470_v55  ;;  %v6531_v54 = vcombine.high %v9458_v39, %v9470_v55  ;;  %12290 = vst [vmem:[#allocation42_spill] sm:$0xff] %v9488_v14  ;;  %v9491_v7 = vrot.slane %v449_v1, %v9021_v26  ;;  %v997_v21 = vcombine.low %v9265_v53, %v9353_v30  ;;  %v9881_v30 = vld [vmem:[%s12171_s8 + $0x110] sm:$0xff] }
  0x53   :  { %v9494_v18 = vrot.slane %v497_v13, %v9021_v26  ;;  %v498_v25 = vcombine.high %v496_v37, %v496_v37  ;;  %v9497_v32 = vrot.slane %v496_v37, %v9021_v26  ;;  %v993_v13 = vrot.slane %v979_v62, %v9021_v26 }
  0x54   :  { %v9502_v38 = vrot.slane %v678_v33, %v9021_v26  ;;  %v9505_v40 = vrot.slane %v6531_v54, %v9021_v26  ;;  %v725_v41 = vcombine.low %v9473_v9, %v9491_v7  ;;  %v6532_v43 = vcombine.high %v9473_v9, %v9491_v7 }
  0x55   :  { %v727_v46 = vcombine.low %v9476_v16, %v9494_v18  ;;  %v6533_v52 = vcombine.high %v9476_v16, %v9494_v18  ;;  %v526_v1 = vrot.slane %v498_v25, %v9021_v26  ;;  %v998_v17 = vcombine.low %v9382_v44, %v9436_v24 }
  0x56   :  { %12291 = vst [vmem:[#allocation43_spill] sm:$0xff] %v9502_v38  ;;  %12292 = vst [vmem:[#allocation44_spill] sm:$0xff] %v9505_v40  ;;  %v709_v37 = vcombine.low %v9502_v38, %v9505_v40  ;;  %v9520_v33 = vrot.slane %v725_v41, %v9021_v26  ;;  %v9523_v54 = vrot.slane %v6532_v43, %v9021_v26 }
  0x57   :  { %v9528_v4 = vrot.slane %v727_v46, %v9021_v26  ;;  %v9531_v48 = vrot.slane %v6533_v52, %v9021_v26  ;;  %v774_v62 = vcombine.low %v9497_v32, %v526_v1  ;;  %v9535_v25 = vrot.slane %v995_v36, %v9021_v26 }
  0x58   :  { %12293 = vst [vmem:[#allocation45_spill] sm:$0xff] %v9520_v33  ;;  %12294 = vst [vmem:[#allocation46_spill] sm:$0xff] %v9523_v54  ;;  %v9538_v41 = vrot.slane %v709_v37, %v9021_v26  ;;  %v757_v43 = vcombine.low %v9520_v33, %v9523_v54  ;;  %v9543_v3 = vrot.slane %v6544_v49, %v9021_v26  ;;  %v9866_v54 = vld [vmem:[%s12171_s8 + $0x190] sm:$0xff] }
  0x59   :  { %12295 = vst [vmem:[#allocation47_spill] sm:$0xff] %v9528_v4  ;;  %12296 = vst [vmem:[#allocation48_spill] sm:$0xff] %v9531_v48  ;;  %v1019_v46 = vrot.slane %v997_v21, %v9021_v26  ;;  %v758_v52 = vcombine.low %v9528_v4, %v9531_v48  ;;  %v781_v29 = vrot.slane %v774_v62, %v9021_v26 }
  0x5a   :  { %12297 = vst [vmem:[#allocation49_spill] sm:$0xff] %v9535_v25  ;;  %12298 = vst [vmem:[#allocation50_spill] sm:$0xff] %v9538_v41  ;;  %v9550_v1 = vrot.slane %v998_v17, %v9021_v26  ;;  %v430_v36 = vcombine.high %v9391_v50, %v9391_v50  ;;  %v724_v37 = vcombine.low %v9488_v14, %v9538_v41 }
  0x5b   :  { %12299 = vst [vmem:[#allocation51_spill] sm:$0xff] %v9543_v3  ;;  %v9557_v34 = vrot.slane %v757_v43, %v9021_v26  ;;  %v1027_v49 = vcombine.low %v9535_v25, %v9543_v3  ;;  %v9563_v21 = vcombine.high %v9382_v44, %v9382_v44  ;;  %v9566_v62 = vrot.slane %v758_v52, %v9021_v26  ;;  %v9897_v3 = vld [vmem:[%s12171_s8 + $0x1a0] sm:$0xff] }
  0x5c   :  { %12300 = vst [vmem:[#allocation52_spill] sm:$0xff] %v9550_v1  ;;  %v9569_v17 = vrot.slane %v781_v29, %v9021_v26  ;;  %v1028_v12 = vcombine.low %v1019_v46, %v9550_v1  ;;  %v432_v41 = vcombine.high %v9409_v59, %v9409_v59  ;;  %7353 = vmatmul.mubr.msk.f32.gmra.mrb[2].mxu0 %vm789_vm1, %v724_v37 }
  0x5d   :  { %12301 = vst [vmem:[#allocation53_spill] sm:$0xff] %v9557_v34  ;;  %12302 = vst [vmem:[#allocation54_spill] sm:$0xff] %v9563_v21  ;;  %v1035_v43 = vrot.slane %v1027_v49, %v9021_v26  ;;  %v478_v14 = vcombine.high %v9458_v39, %v9458_v39  ;;  %v1044_v57 = vcombine.low %v9563_v21, %v9391_v50 }
  0x5e   :  { %12303 = vst [vmem:[#allocation55_spill] sm:$0xff] %v9566_v62  ;;  %12304 = vst [vmem:[#allocation56_spill] sm:$0xff] %v9569_v17  ;;  %v1045_v52 = vcombine.low %v9409_v59, %v430_v36  ;;  %v773_v29 = vcombine.low %v9557_v34, %v9566_v62  ;;  %v1042_v46 = vrot.slane %v1028_v12, %v9021_v26  ;;  %v6566_v62 = vld [vmem:[%s12171_s8 + $0xf0] sm:$0xff] }
  0x5f   :  { %v1046_v60 = vcombine.low %v432_v41, %v9458_v39  ;;  %v479_v37 = vcombine.high %v9473_v9, %v9473_v9  ;;  %v1047_v49 = vcombine.low %v9470_v55, %v478_v14  ;;  %v9589_v1 = vrot.slane %v1044_v57, %v9021_v26 }
  0x60   :  { %v9592_v58 = vrot.slane %v1045_v52, %v9021_v26  ;;  %v480_v50 = vcombine.high %v9470_v55, %v9470_v55  ;;  %7355 = vmatprep.mubr.msk.f32.mxu0 %vm789_vm1, %v773_v29  ;;  %v9598_v12 = vcombine.low %v9443_v42, %v993_v13  ;;  %v481_v39 = vcombine.high %v9491_v7, %v9491_v7 }
  0x61   :  { %12305 = vst [vmem:[#allocation57_spill] sm:$0xff] %v9589_v1  ;;  %v9601_v59 = vrot.slane %v1046_v60, %v9021_v26  ;;  %v527_v57 = vcombine.high %v9476_v16, %v9476_v16  ;;  %7356 = vmatmul.mubr.msk.f32.gmra.mrb[4].mxu0 %vm789_vm1, %v9569_v17  ;;  %v9610_v14 = vrot.slane %v1047_v49, %v9021_v26 }
  0x62   :  { %12306 = vst [vmem:[#allocation58_spill] sm:$0xff] %v9592_v58  ;;  %12307 = vst [vmem:[#allocation59_spill] sm:$0xff] %v9598_v12  ;;  %v1076_v55 = vcombine.low %v9589_v1, %v9592_v58  ;;  %v1093_v42 = vcombine.low %v480_v50, %v9473_v9  ;;  %v1094_v60 = vcombine.low %v9491_v7, %v479_v37  ;;  %7366 = vmatprep.mubr.msk.f32.mxu0 %vm789_vm1, %v9406_v56 }
  0x63   :  { %12308 = vst [vmem:[#allocation60_spill] sm:$0xff] %v9601_v59  ;;  %12309 = vst [vmem:[#allocation61_spill] sm:$0xff] %v9610_v14  ;;  %v1043_v13 = vcombine.low %v1035_v43, %v1042_v46  ;;  %v1095_v41 = vcombine.low %v481_v39, %v9476_v16  ;;  %v1096_v36 = vcombine.low %v9494_v18, %v527_v57 }
  0x64   :  { %v528_v52 = vcombine.high %v9494_v18, %v9494_v18  ;;  %v1077_v29 = vcombine.low %v9601_v59, %v9610_v14  ;;  %v9625_v49 = vrot.slane %v1076_v55, %v9021_v26  ;;  %v9628_v9 = vrot.slane %v1093_v42, %v9021_v26  ;;  %v9838_v14 = vld [vmem:[%s12171_s8 + $0x188] sm:$0xff] }
  0x65   :  { %v9631_v7 = vrot.slane %v1094_v60, %v9021_v26  ;;  %v9634_v43 = vrot.slane %v1095_v41, %v9021_v26  ;;  %v9637_v16 = vrot.slane %v1096_v36, %v9021_v26  ;;  %7367 = vmatmul.mubr.msk.f32.vlgmr.msra.gmra.mrb[0].mxu0 %vm789_vm1, %v9598_v12  ;;  %v1723_v41 = vld [vmem:[%s12171_s8] sm:$0xff]  ;;  %v1724_v36 = vld [vmem:[%s12171_s8 + $0x8] sm:$0xff] }
  0x66   :  { %12310 = vst [vmem:[#allocation62_spill] sm:$0xff] %v9625_v49  ;;  %12311 = vst [vmem:[#allocation63_spill] sm:$0xff] %v9628_v9  ;;  %v1142_v18 = vcombine.low %v528_v52, %v9497_v32  ;;  %v9643_v46 = vrot.slane %v1077_v29, %v9021_v26  ;;  %7369 = vmatprep.mubr.msk.f32.mxu0 %vm789_vm1, %v1043_v13  ;;  %v12186_v13 = vmov 0.0|0.0   ;;  %v8277_v52 = vpack.c.bf16 %v1724_v36, %v1723_v41  ;;  %v6552_v29 = vld [vmem:[%s12171_s8 + $0x80] sm:$0xff]  ;;  %v6555_v41 = vld [vmem:[%s12171_s8 + $0x98] sm:$0xff] }
  0x67   :  { %12312 = vst [vmem:[#allocation64_spill] sm:$0xff] %v9631_v7  ;;  %12313 = vst [vmem:[#allocation65_spill] sm:$0xff] %v9634_v43  ;;  %v1125_v37 = vcombine.low %v9628_v9, %v9631_v7  ;;  %v1126_v50 = vcombine.low %v9634_v43, %v9637_v16  ;;  %8276 = vmatprep.subr.bf16.mxu0 %v12186_v13  ;;  %8252 = vmatprep.subr.bf16.mxu1 %v12186_v13 }
  0x68   :  { %12314 = vst [vmem:[#allocation66_spill] sm:$0xff] %v9637_v16  ;;  %12315 = vst [vmem:[#allocation67_spill] sm:$0xff] %v9643_v46  ;;  %v1149_v39 = vrot.slane %v1142_v18, %v9021_v26  ;;  %v1092_v57 = vcombine.low %v9625_v49, %v9643_v46  ;;  %8278 = vmatpush3.bf16.msra.mxu0 %v8277_v52  ;;  %v6553_v18 = vld [vmem:[%s12171_s8 + $0x88] sm:$0xff]  ;;  %v1727_v52 = vld [vmem:[%s12171_s8 + $0x20] sm:$0xff] }
  0x69   :  { %v9654_v32 = vrot.slane %v1125_v37, %v9021_v26  ;;  %v9657_v55 = vrot.slane %v1126_v50, %v9021_v26  ;;  %8279 = vmatprep.subr.bf16.mxu0 %v12186_v13  ;;  %v8253_v37 = vpack.c.bf16 %v6553_v18, %v6552_v29  ;;  %v1725_v50 = vld [vmem:[%s12171_s8 + $0x10] sm:$0xff]  ;;  %v1728_v29 = vld [vmem:[%s12171_s8 + $0x28] sm:$0xff] }
  0x6a   :  { %7370 = vmatmul.mubr.msk.f32.gmra.mrb[2].mxu0 %vm789_vm1, %v1092_v57  ;;  %v9661_v42 = vrot.slane %v1149_v39, %v9021_v26  ;;  %v1726_v39 = vld [vmem:[%s12171_s8 + $0x18] sm:$0xff]  ;;  %v8283_v18 = vpack.c.bf16 %v1728_v29, %v1727_v52 }
  0x6b   :  { %12316 = vst [vmem:[#allocation68_spill] sm:$0xff] %v9654_v32  ;;  %12317 = vst [vmem:[#allocation69_spill] sm:$0xff] %v9657_v55  ;;  %v1141_v60 = vcombine.low %v9654_v32, %v9657_v55  ;;  %8254 = vmatpush3.bf16.msra.mxu1 %v8253_v37  ;;  %v8280_v57 = vpack.c.bf16 %v1726_v39, %v1725_v50  ;;  %v6556_v37 = vld [vmem:[%s12171_s8 + $0xa0] sm:$0xff]  ;;  %v6557_v50 = vld [vmem:[%s12171_s8 + $0xa8] sm:$0xff] }
  0x6c   :  { %12318 = vst [vmem:[#allocation70_spill] sm:$0xff] %v9661_v42  ;;  %8255 = vmatprep.subr.bf16.mxu1 %v12186_v13  ;;  %v8259_v39 = vpack.c.bf16 %v6557_v50, %v6556_v37  ;;  %v6559_v52 = vld [vmem:[%s12171_s8 + $0xb8] sm:$0xff]  ;;  %v1732_v37 = vld [vmem:[%s12171_s8 + $0x48] sm:$0xff]  ;;  %v9844_v55 = vld [vmem:[%s12171_s8 + $0x100] sm:$0xff] }
  0x6d   :  { %7372 = vmatprep.mubr.msk.f32.mxu0 %vm789_vm1, %v1141_v60  ;;  %8281 = vmatpush3.bf16.msra.mxu0 %v8280_v57  ;;  %v6554_v60 = vld [vmem:[%s12171_s8 + $0x90] sm:$0xff] }
  0x6e   :  { %7373 = vmatmul.mubr.msk.f32.gmra.mrb[4].mxu0 %vm789_vm1, %v9661_v42  ;;  %v8256_v36 = vpack.c.bf16 %v6555_v41, %v6554_v60  ;;  %8282 = vmatprep.subr.bf16.mxu0 %v12186_v13  ;;  %v1729_v57 = vld [vmem:[%s12171_s8 + $0x30] sm:$0xff]  ;;  %v1730_v60 = vld [vmem:[%s12171_s8 + $0x38] sm:$0xff]  ;;  %v9849_v42 = vld [vmem:[%s12171_s8 + $0x108] sm:$0xff] }
  0x6f   :  { %v8286_v41 = vpack.c.bf16 %v1730_v60, %v1729_v57  ;;  %v6561_v57 = vld [vmem:[%s12171_s8 + $0xc8] sm:$0xff] }
  0x70   :  { %8257 = vmatpush3.bf16.msra.mxu1 %v8256_v36  ;;  %v6558_v36 = vld [vmem:[%s12171_s8 + $0xb0] sm:$0xff] }
  0x71   :  { %8258 = vmatprep.subr.bf16.mxu1 %v12186_v13  ;;  %8284 = vmatpush3.bf16.msra.mxu0 %v8283_v18  ;;  %v8262_v29 = vpack.c.bf16 %v6559_v52, %v6558_v36  ;;  %v1731_v18 = vld [vmem:[%s12171_s8 + $0x40] sm:$0xff]  ;;  %v1734_v36 = vld [vmem:[%s12171_s8 + $0x58] sm:$0xff] }
  0x72   :  { %8285 = vmatprep.subr.bf16.mxu0 %v12186_v13  ;;  %v8289_v50 = vpack.c.bf16 %v1732_v37, %v1731_v18  ;;  %v6563_v18 = vld [vmem:[%s12171_s8 + $0xd8] sm:$0xff]  ;;  %v1735_v37 = vld [vmem:[%s12171_s8 + $0x60] sm:$0xff] }
  0x74   :  { %8260 = vmatpush3.bf16.msra.mxu1 %v8259_v39  ;;  %v6560_v39 = vld [vmem:[%s12171_s8 + $0xc0] sm:$0xff] }
  0x75   :  { %8261 = vmatprep.subr.bf16.mxu1 %v12186_v13  ;;  %8287 = vmatpush3.bf16.msra.mxu0 %v8286_v41  ;;  %v8265_v60 = vpack.c.bf16 %v6561_v57, %v6560_v39  ;;  %v1733_v41 = vld [vmem:[%s12171_s8 + $0x50] sm:$0xff]  ;;  %v1736_v39 = vld [vmem:[%s12171_s8 + $0x68] sm:$0xff]  ;;  %v6564_v57 = vld [vmem:[%s12171_s8 + $0xe0] sm:$0xff] }
  0x76   :  { %8288 = vmatprep.subr.bf16.mxu0 %v12186_v13  ;;  %v8292_v52 = vpack.c.bf16 %v1734_v36, %v1733_v41  ;;  %v12188_v41 = vmov 0.0   ;;  %v8295_v36 = vpack.c.bf16 %v1736_v39, %v1735_v37  ;;  %v6567_v37 = vld [vmem:[%s12171_s8 + $0xf8] sm:$0xff] }
  0x77   :  { %7442 = vmatprep.mubr.msk.f32.mxu0 %vm8860_vm2, %v12188_v41  ;;  %7407 = vmatprep.mubr.msk.f32.mxu1 %vm8860_vm2, %v12188_v41  ;;  %v8274_v17 = vpack.c.bf16 %v6567_v37, %v6566_v62 }
  0x78   :  { %8263 = vmatpush3.bf16.msra.mxu1 %v8262_v29  ;;  %v6562_v29 = vld [vmem:[%s12171_s8 + $0xd0] sm:$0xff] }
  0x79   :  { %8264 = vmatprep.subr.bf16.mxu1 %v12186_v13  ;;  %8290 = vmatpush3.bf16.msra.mxu0 %v8289_v50  ;;  %v8268_v50 = vpack.c.bf16 %v6563_v18, %v6562_v29  ;;  %v1738_v29 = vld [vmem:[%s12171_s8 + $0x78] sm:$0xff] }
  0x7a   :  { %8291 = vmatprep.subr.bf16.mxu0 %v12186_v13 }
  0x7c   :  { %8266 = vmatpush3.bf16.msra.mxu1 %v8265_v60  ;;  %v6565_v60 = vld [vmem:[%s12171_s8 + $0xe8] sm:$0xff] }
  0x7d   :  { %8267 = vmatprep.subr.bf16.mxu1 %v12186_v13  ;;  %8293 = vmatpush3.bf16.msra.mxu0 %v8292_v52  ;;  %v1737_v52 = vld [vmem:[%s12171_s8 + $0x70] sm:$0xff]  ;;  %v8271_v18 = vpack.c.bf16 %v6565_v60, %v6564_v57 }
  0x7e   :  { %8294 = vmatprep.subr.bf16.mxu0 %v12186_v13  ;;  %v8298_v39 = vpack.c.bf16 %v1738_v29, %v1737_v52 }
  0x80   :  { %8269 = vmatpush3.bf16.msra.mxu1 %v8268_v50  ;;  %v6551_v50 = vld [vmem:[%s12168_s5] ss:$0 sm:$0xff] }
  0x81   :  { %8270 = vmatprep.subr.bf16.mxu1 %v12186_v13  ;;  %8296 = vmatpush3.bf16.msra.mxu0 %v8295_v36  ;;  %v1575_v57 = vcombine.high %v6551_v50, %v6551_v50  ;;  %v1582_v60 = vrot.slane %v6551_v50, %v9021_v26 }
  0x82   :  { %8297 = vmatprep.subr.bf16.mxu0 %v12186_v13 }
  0x83   :  { %v1589_v36 = vrot.slane %v1575_v57, %v9021_v26  ;;  %v1590_v52 = vcombine.high %v1582_v60, %v1582_v60 }
  0x84   :  { %8272 = vmatpush3.bf16.msra.mxu1 %v8271_v18 }
  0x85   :  { %8273 = vmatprep.subr.bf16.mxu1 %v12186_v13  ;;  %8299 = vmatpush3.bf16.msra.mxu0 %v8298_v39  ;;  %v1591_v29 = vcombine.high %v1589_v36, %v1589_v36  ;;  %v9793_v39 = vrot.slane %v1582_v60, %v9021_v26  ;;  %v9799_v41 = vrot.slane %v1590_v52, %v9021_v26 }
  0x86   :  { %8324 = vmatprep.subr.bf16.mxu0 %v12186_v13 }
  0x87   :  { %v9802_v50 = vrot.slane %v1591_v29, %v9021_v26 }
  0x88   :  { %8275 = vmatpush3.bf16.msra.mxu1 %v8274_v17  ;;  %v9796_v17 = vrot.slane %v1589_v36, %v9021_v26 }
  0x89   :  { %8300 = vmatprep.subr.bf16.mxu1 %v12186_v13 }
  0x8a   :  { %v9814_v29 = vcombine.high %v9796_v17, %v9796_v17 }
 0x138   :  { %v7368_v62 = vpop.f32.mrb[0].mxu0 }
 0x139   :  { %v1319_v18 = vcombine.high %v7368_v62, %v7368_v62  ;;  %v1326_v37 = vrot.slane %v7368_v62, %v9021_v26  ;;  %v1235_v13 = vpop.f32.mrb[1].mxu0 }
 0x13a   :  { %v1270_v57 = vcombine.high %v1235_v13, %v1235_v13  ;;  %v1277_v34 = vrot.slane %v1235_v13, %v9021_v26 }
 0x13b   :  { %v1333_v16 = vrot.slane %v1319_v18, %v9021_v26  ;;  %v1334_v7 = vcombine.high %v1326_v37, %v1326_v37  ;;  %v1342_v62 = vrot.slane %v1326_v37, %v9021_v26  ;;  %v9820_v37 = vcombine.high %v9793_v39, %v9793_v39 }
 0x13c   :  { %v1284_v60 = vrot.slane %v1270_v57, %v9021_v26  ;;  %v1285_v43 = vcombine.high %v1277_v34, %v1277_v34  ;;  %v9824_v57 = vcombine.high %v9799_v41, %v9799_v41  ;;  %v1293_v49 = vrot.slane %v1277_v34, %v9021_v26  ;;  %v9876_v34 = vld [vmem:[%s12171_s8 + $0x198] sm:$0xff] }
 0x13d   :  { %v9808_v36 = vpop.f32.mrb[2].mxu0  ;;  %v1335_v12 = vcombine.high %v1333_v16, %v1333_v16  ;;  %v1349_v52 = vrot.slane %v1333_v16, %v9021_v26  ;;  %v1356_v56 = vrot.slane %v1334_v7, %v9021_v26  ;;  %v1364_v18 = vcombine.high %v1342_v62, %v1342_v62  ;;  %v9833_v7 = vld [vmem:[%s12171_s8 + $0x180] sm:$0xff] }
 0x13e   :  { %v9816_v13 = vpop.f32.mrb[3].mxu0  ;;  %v9828_v16 = vcombine.high %v9802_v50, %v9802_v50  ;;  %v1286_v1 = vcombine.high %v1284_v60, %v1284_v60  ;;  %v1307_v46 = vrot.slane %v1285_v43, %v9021_v26  ;;  %v1632_v38 = vadd.f32 %v9793_v39, %v1293_v49 }
 0x13f   :  { %v1363_v9 = vrot.slane %v1335_v12, %v9021_v26  ;;  %v1365_v58 = vcombine.high %v1349_v52, %v1349_v52  ;;  %v1366_v59 = vcombine.high %v1356_v56, %v1356_v56  ;;  %v1641_v21 = vadd.f32 %v9799_v41, %v1356_v56 }
 0x140   :  { %v1640_v56 = vadd.f32 %v9793_v39, %v1342_v62  ;;  %v9886_v62 = vld [vmem:[%s12171_s8 + $0x118] sm:$0xff]  ;;  %v1314_v51 = vrot.slane %v1286_v1, %v9021_v26  ;;  %v1644_v40 = vadd.f32 %v9796_v17, %v1349_v52  ;;  %v1317_v33 = vcombine.high %v1307_v46, %v1307_v46  ;;  %v9909_v1 = vld [vmem:[%s12171_s8 + $0x120] sm:$0xff] }
 0x141   :  { %v9853_v32 = vpop.f32.mrb[4].mxu0  ;;  %v1367_v12 = vcombine.high %v1363_v9, %v1363_v9  ;;  %v9856_v48 = vadd.f32 %v9814_v29, %v1365_v58  ;;  %v1643_v43 = vadd.f32 %v9824_v57, %v1366_v59  ;;  %v1645_v4 = vadd.f32 %v9802_v50, %v1363_v9 }
 0x142   :  { %v9859_v45 = vpop.f32.mrb[5].mxu0  ;;  %v1642_v59 = vadd.f32 %v9820_v37, %v1364_v18  ;;  %v1300_v58 = vrot.slane %v1284_v60, %v9021_v26  ;;  %v2243_v18 = vcombine.low %v1640_v56, %v1641_v21  ;;  %v9914_v60 = vld [vmem:[%s12171_s8 + $0x128] sm:$0xff]  ;;  %v1315_v11 = vcombine.high %v1293_v49, %v1293_v49 }
 0x143   :  { %v9890_v9 = vadd.f32 %v9828_v16, %v1367_v12  ;;  %v1633_v12 = vadd.f32 %v9799_v41, %v1307_v46  ;;  %v2527_v56 = vcombine.low %v1644_v40, %v1645_v4  ;;  %v1318_v35 = vcombine.high %v1314_v51, %v1314_v51  ;;  %v9937_v40 = vld [vmem:[%s12171_s8 + $0x1b0] sm:$0xff] }
 0x144   :  { %v2385_v52 = vcombine.low %v1642_v59, %v1643_v43  ;;  %v1316_v15 = vcombine.high %v1300_v58, %v1300_v58  ;;  %v9928_v22 = vrot.slane %v2243_v18, %v9021_v26  ;;  %v1635_v21 = vadd.f32 %v9824_v57, %v1317_v33  ;;  %v9954_v59 = vld [vmem:[%s12171_s8 + $0x130] sm:$0xff] }
 0x145   :  { %v1676_v25 = vcombine.low %v1632_v38, %v1633_v12  ;;  %v1637_v19 = vadd.f32 %v9802_v50, %v1314_v51  ;;  %v1417_v4 = vcombine.high %v9808_v36, %v9808_v36  ;;  %v1424_v49 = vrot.slane %v9808_v36, %v9021_v26  ;;  %v9949_v51 = vld [vmem:[%s12171_s8 + $0x1b8] sm:$0xff]  ;;  %12319 = vst [vmem:[#allocation71_spill] sm:$0xff] %v9954_v59 }
 0x146   :  { %v1368_v43 = vcombine.high %v9816_v13, %v9816_v13  ;;  %v1375_v33 = vrot.slane %v9816_v13, %v9021_v26  ;;  %v9962_v36 = vrot.slane %v2385_v52, %v9021_v26  ;;  %v9965_v13 = vrot.slane %v2527_v56, %v9021_v26  ;;  %v9977_v52 = vld [vmem:[%s12171_s8 + $0x1c0] sm:$0xff]  ;;  %v9982_v56 = vld [vmem:[%s12171_s8 + $0x1c8] sm:$0xff] }
 0x147   :  { %v1683_v38 = vrot.slane %v1676_v25, %v9021_v26  ;;  %v9959_v25 = vld [vmem:[%s12171_s8 + $0x138] sm:$0xff]  ;;  %v1634_v18 = vadd.f32 %v9820_v37, %v1315_v11  ;;  %v1431_v12 = vrot.slane %v1417_v4, %v9021_v26  ;;  %v1636_v28 = vadd.f32 %v9796_v17, %v1300_v58  ;;  %12321 = vst [vmem:[#allocation73_spill] sm:$0xff] %v9977_v52 }
 0x148   :  { %12320 = vst [vmem:[#allocation72_spill] sm:$0xff] %v9959_v25  ;;  %v9971_v46 = vadd.f32 %v9828_v16, %v1318_v35  ;;  %v1432_v27 = vcombine.high %v1424_v49, %v1424_v49  ;;  %v1382_v53 = vrot.slane %v1368_v43, %v9021_v26  ;;  %12322 = vst [vmem:[#allocation74_spill] sm:$0xff] %v9982_v56 }
 0x149   :  { %v1690_v11 = vrot.slane %v1683_v38, %v9021_v26  ;;  %v1743_v4 = vcombine.low %v1634_v18, %v1635_v21  ;;  %v9990_v43 = vadd.f32 %v9814_v29, %v1316_v15  ;;  %v1959_v24 = vcombine.low %v1636_v28, %v1637_v19 }
 0x14a   :  { %v1454_v61 = vrot.slane %v1432_v27, %v9021_v26  ;;  %v1383_v44 = vcombine.high %v1375_v33, %v1375_v33  ;;  %v1433_v6 = vcombine.high %v1431_v12, %v1431_v12  ;;  %v1440_v38 = vrot.slane %v1424_v49, %v9021_v26 }
 0x14b   :  { %v2101_v19 = vcombine.low %v9990_v43, %v9971_v46  ;;  %v1384_v27 = vcombine.high %v1382_v53, %v1382_v53  ;;  %v1709_v28 = vsel %vm1708_vm3, %v1690_v11, -inf  ;;  %v10006_v58 = vrot.slane %v1743_v4, %v9021_v26 }
 0x14c   :  { %v1447_v49 = vrot.slane %v1431_v12, %v9021_v26  ;;  %v10010_v35 = vrot.slane %v1375_v33, %v9021_v26  ;;  %v10013_v21 = vrot.slane %v1959_v24, %v9021_v26  ;;  %v1464_v10 = vcombine.high %v1454_v61, %v1454_v61 }
 0x14d   :  { %v1398_v15 = vrot.slane %v1382_v53, %v9021_v26  ;;  %v10017_v18 = vrot.slane %v1383_v44, %v9021_v26  ;;  %v1461_v46 = vrot.slane %v1433_v6, %v9021_v26  ;;  %v1462_v11 = vcombine.high %v1440_v38, %v1440_v38 }
 0x14e   :  { %v1412_v4 = vrot.slane %v1384_v27, %v9021_v26  ;;  %v1413_v12 = vcombine.high %v10010_v35, %v10010_v35  ;;  %v1710_v43 = vrot.slane %v1709_v28, 4  ;;  %v10024_v33 = vadd.f32 %v9824_v57, %v1440_v38 }
 0x14f   :  { %v1414_v24 = vcombine.high %v1398_v15, %v1398_v15  ;;  %v1415_v5 = vcombine.high %v10017_v18, %v10017_v18  ;;  %v1463_v53 = vcombine.high %v1447_v49, %v1447_v49  ;;  %v1659_v44 = vadd.f32 %v9828_v16, %v1447_v49 }
 0x150   :  { %v1416_v63 = vcombine.high %v1412_v4, %v1412_v4  ;;  %v10030_v6 = vadd.f32 %v9820_v37, %v1413_v12  ;;  %v1656_v27 = vadd.f32 %v9796_v17, %v1454_v61  ;;  %v1658_v47 = vadd.f32 %v9814_v29, %v1464_v10 }
 0x151   :  { %v10035_v8 = vadd.f32 %v9824_v57, %v1415_v5  ;;  %v1652_v38 = vadd.f32 %v9793_v39, %v1412_v4  ;;  %v1465_v15 = vcombine.high %v1461_v46, %v1461_v46  ;;  %v1653_v23 = vadd.f32 %v9799_v41, %v1414_v24 }
 0x152   :  { %v1654_v20 = vadd.f32 %v9820_v37, %v1416_v63  ;;  %v1521_v49 = vrot.slane %v9853_v32, %v9021_v26  ;;  %v1657_v12 = vadd.f32 %v9802_v50, %v1462_v11  ;;  %v1466_v10 = vcombine.high %v9859_v45, %v9859_v45 }
 0x153   :  { %v1473_v5 = vrot.slane %v9859_v45, %v9021_v26  ;;  %v1660_v4 = vadd.f32 %v9793_v39, %v1461_v46  ;;  %v1691_v0 = vcombine.low %v1652_v38, %v1653_v23  ;;  %v2116_v31 = vcombine.low %v1658_v47, %v1659_v44 }
 0x154   :  { %v1758_v24 = vcombine.low %v1654_v20, %v10024_v33  ;;  %v1528_v63 = vrot.slane %v1521_v49, %v9021_v26  ;;  %v1480_v32 = vrot.slane %v1466_v10, %v9021_v26  ;;  %v1661_v61 = vadd.f32 %v9799_v41, %v1463_v53 }
 0x155   :  { %v1481_v11 = vcombine.high %v1473_v5, %v1473_v5  ;;  %v1489_v59 = vrot.slane %v1473_v5, %v9021_v26  ;;  %v1698_v25 = vrot.slane %v1691_v0, %v9021_v26  ;;  %v1662_v45 = vadd.f32 %v9820_v37, %v1465_v15 }
 0x156   :  { %v10057_v52 = vadd.f32 %v9824_v57, %v1528_v63  ;;  %v1974_v23 = vcombine.low %v1656_v27, %v1657_v12  ;;  %v1482_v46 = vcombine.high %v1480_v32, %v1480_v32  ;;  %v10061_v20 = vrot.slane %v1480_v32, %v9021_v26 }
 0x157   :  { %v1503_v47 = vrot.slane %v1481_v11, %v9021_v26  ;;  %v1705_v33 = vrot.slane %v1698_v25, %v9021_v26  ;;  %v1511_v44 = vcombine.high %v1489_v59, %v1489_v59  ;;  %v1663_v38 = vadd.f32 %v9824_v57, %v1489_v59 }
 0x158   :  { %12323 = vst [vmem:[#allocation75_spill] sm:$0xff] %v10057_v52  ;;  %v1711_v53 = vmax.f32 %v1709_v28, %v1710_v43  ;;  %v2123_v0 = vrot.slane %v2116_v31, %v9021_v26  ;;  %v10068_v49 = vrot.slane %v1482_v46, %v9021_v26  ;;  %v10074_v12 = vadd.f32 %v9828_v16, %v10061_v20 }
 0x159   :  { %v1513_v10 = vcombine.high %v1503_v47, %v1503_v47  ;;  %v1664_v27 = vadd.f32 %v9796_v17, %v1503_v47  ;;  %v1665_v15 = vadd.f32 %v9802_v50, %v1511_v44  ;;  %v2400_v5 = vcombine.low %v1662_v45, %v1663_v38 }
 0x15a   :  { %v1712_v25 = vrot.slane %v1711_v53, 2  ;;  %v2108_v63 = vrot.slane %v2101_v19, %v9021_v26  ;;  %v2258_v57 = vcombine.low %v1660_v4, %v1661_v61  ;;  %v1514_v31 = vcombine.high %v10068_v49, %v10068_v49 }
 0x15b   :  { %v10080_v59 = vadd.f32 %v9814_v29, %v1513_v10  ;;  %v1981_v28 = vrot.slane %v1974_v23, %v9021_v26  ;;  %v10084_v17 = vrot.slane %v2400_v5, %v9021_v26  ;;  %v1716_v16 = vsel %vm1708_vm3, %v1705_v33, -inf }
 0x15c   :  { %v1713_v50 = vmax.f32 %v1711_v53, %v1712_v25  ;;  %v10088_v43 = vadd.f32 %v9820_v37, %v1514_v31  ;;  %v2542_v32 = vcombine.low %v1664_v27, %v1665_v15  ;;  %v1717_v61 = vrot.slane %v1716_v16, 4 }
 0x15d   :  { %v2684_v19 = vcombine.low %v10080_v59, %v10074_v12  ;;  %v1973_v29 = vrot.slane %v10013_v21, %v9021_v26  ;;  %v2130_v4 = vrot.slane %v2123_v0, %v9021_v26  ;;  %v1757_v45 = vrot.slane %v10006_v58, %v9021_v26 }
 0x15e   :  { %12324 = vst [vmem:[#allocation76_spill] sm:$0xff] %v10088_v43  ;;  %v1714_v11 = vrot.slane %v1713_v50, 1  ;;  %v10098_v23 = vrot.slane %v2258_v57, %v9021_v26  ;;  %v10102_v37 = vadd.f32 %v9799_v41, %v10017_v18  ;;  %v1718_v47 = vmax.f32 %v1716_v16, %v1717_v61 }
 0x15f   :  { %v1988_v33 = vrot.slane %v1981_v28, %v9021_v26  ;;  %v2414_v21 = vrot.slane %v10084_v17, %v9021_v26  ;;  %v1765_v44 = vrot.slane %v1758_v24, %v9021_v26  ;;  %v1775_v58 = vsel %vm1708_vm3, %v1757_v45, -inf }
 0x160   :  { %v10112_v38 = vrot.slane %v2542_v32, %v9021_v26  ;;  %v1715_v53 = vmax.f32 %v1713_v50, %v1714_v11  ;;  %v1719_v18 = vrot.slane %v1718_v47, 2  ;;  %v1776_v0 = vrot.slane %v1775_v58, 4 }
 0x161   :  { %v1772_v10 = vrot.slane %v1765_v44, %v9021_v26  ;;  %v2115_v27 = vrot.slane %v2108_v63, %v9021_v26  ;;  %v2140_v15 = vsel %vm1708_vm3, %v2130_v4, -inf  ;;  %v1991_v12 = vsel %vm1708_vm3, %v1973_v29, -inf }
 0x162   :  { %v1720_v5 = vmax.f32 %v1718_v47, %v1719_v18  ;;  %v1777_v25 = vmax.f32 %v1775_v58, %v1776_v0  ;;  %v2141_v57 = vrot.slane %v2140_v15, 4  ;;  %v1992_v24 = vrot.slane %v1991_v12, 4 }
 0x163   :  { %v1782_v31 = vsel %vm1708_vm3, %v1772_v10, -inf  ;;  %v2133_v59 = vsel %vm1708_vm3, %v2115_v27, -inf  ;;  %v1998_v28 = vsel %vm1708_vm3, %v1988_v33, -inf  ;;  %v12325_v17 = vrot.slane %v9962_v36, %v9021_v26 }
 0x164   :  { %v1721_v63 = vrot.slane %v1720_v5, 1  ;;  %v1778_v16 = vrot.slane %v1777_v25, 2  ;;  %v1783_v32 = vrot.slane %v1782_v31, 4  ;;  %v2134_v61 = vrot.slane %v2133_v59, 4 }
 0x165   :  { %v2417_v50 = vsel %vm1708_vm3, %v12325_v17, -inf  ;;  %v2142_v29 = vmax.f32 %v2140_v15, %v2141_v57  ;;  %v1993_v4 = vmax.f32 %v1991_v12, %v1992_v24  ;;  %v1999_v11 = vrot.slane %v1998_v28, 4 }
 0x166   :  { %v2418_v45 = vrot.slane %v2417_v50, 4  ;;  %v1722_v47 = vmax.f32 %v1720_v5, %v1721_v63  ;;  %v1779_v44 = vmax.f32 %v1777_v25, %v1778_v16  ;;  %v1784_v58 = vmax.f32 %v1782_v31, %v1783_v32 }
 0x167   :  { %v2135_v18 = vmax.f32 %v2133_v59, %v2134_v61  ;;  %v2143_v0 = vrot.slane %v2142_v29, 2  ;;  %v1994_v10 = vrot.slane %v1993_v4, 2  ;;  %v2000_v33 = vmax.f32 %v1998_v28, %v1999_v11 }
 0x168   :  { %v2419_v27 = vmax.f32 %v2417_v50, %v2418_v45  ;;  %v1883_v36 = vsel %vm1808_vm4, %v1722_v47, %v1715_v53  ;;  %v1780_v46 = vrot.slane %v1779_v44, 1  ;;  %v1785_v17 = vrot.slane %v1784_v58, 2 }
 0x169   :  { %v2136_v52 = vrot.slane %v2135_v18, 2  ;;  %7443 = vmatmul.mubr.f32.vlgmr.msra.gmra.mrb[6].mxu0 %v1883_v36  ;;  %v2144_v43 = vmax.f32 %v2142_v29, %v2143_v0  ;;  %v1995_v56 = vmax.f32 %v1993_v4, %v1994_v10  ;;  %v2001_v15 = vrot.slane %v2000_v33, 2 }
 0x16a   :  { %v2420_v12 = vrot.slane %v2419_v27, 2  ;;  %v2691_v57 = vrot.slane %v2684_v19, %v9021_v26  ;;  %v12326_v5 = vpack.c.bf16 %v9838_v14, %v9833_v7  ;;  %v1786_v25 = vmax.f32 %v1784_v58, %v1785_v17 }
 0x16b   :  { %v12327_v24 = vmov 0.0   ;;  %v2137_v31 = vmax.f32 %v2135_v18, %v2136_v52  ;;  %v2424_v53 = vsel %vm1708_vm3, %v2414_v21, -inf  ;;  %v1781_v59 = vmax.f32 %v1779_v44, %v1780_v46 }
 0x16c   :  { %8326 = vmatpush3.bf16.msra.mxu0 %v12326_v5  ;;  %7512 = vmatprep.mubr.msk.f32.mxu0 %vm8860_vm2, %v12327_v24  ;;  %v12328_v28 = vmov 0.0|0.0   ;;  %v2145_v50 = vrot.slane %v2144_v43, 1  ;;  %v1996_v63 = vrot.slane %v1995_v56, 1  ;;  %v2002_v16 = vmax.f32 %v2000_v33, %v2001_v15  ;;  %v10157_v33 = vld [vmem:[%s12171_s8 + $0x1d0] sm:$0xff] }
 0x16d   :  { %8327 = vmatprep.subr.bf16.mxu0 %v12328_v28  ;;  %v1787_v32 = vrot.slane %v1786_v25, 1  ;;  %v2138_v61 = vrot.slane %v2137_v31, 1  ;;  %v2425_v19 = vrot.slane %v2424_v53, 4  ;;  %v2272_v14 = vrot.slane %v10098_v23, %v9021_v26 }
 0x16e   :  { %v2146_v7 = vmax.f32 %v2144_v43, %v2145_v50  ;;  %v1997_v29 = vmax.f32 %v1995_v56, %v1996_v63  ;;  %v2003_v4 = vrot.slane %v2002_v16, 1  ;;  %v2421_v11 = vmax.f32 %v2419_v27, %v2420_v12  ;;  %v10162_v27 = vld [vmem:[%s12171_s8 + $0x1d8] sm:$0xff] }
 0x16f   :  { %v1788_v45 = vmax.f32 %v1786_v25, %v1787_v32  ;;  %v12329_v52 = vpack.c.bf16 %v9876_v34, %v9866_v54  ;;  %v2139_v46 = vmax.f32 %v2137_v31, %v2138_v61  ;;  %v2426_v21 = vmax.f32 %v2424_v53, %v2425_v19 }
 0x170   :  { %v12330_v47 = vrot.slane %v9928_v22, %v9021_v26  ;;  %v2698_v58 = vrot.slane %v2691_v57, %v9021_v26  ;;  %v2004_v43 = vmax.f32 %v2002_v16, %v2003_v4  ;;  %v2282_v23 = vsel %vm1708_vm3, %v2272_v14, -inf }
 0x171   :  { %8329 = vmatpush3.bf16.msra.mxu0 %v12329_v52  ;;  %v1809_v18 = vsel %vm1808_vm4, %v1788_v45, %v1781_v59  ;;  %v10148_v54 = vsel %vm1808_vm4, %v2146_v7, %v2139_v46  ;;  %v2427_v34 = vrot.slane %v2426_v21, 2  ;;  %v2283_v0 = vrot.slane %v2282_v23, 4  ;;  %v12339_v52 = vld [vmem:[#allocation74_spill] sm:$0xff]  ;;  %v12340_v46 = vld [vmem:[#allocation73_spill] sm:$0xff] }
 0x172   :  { %v2275_v44 = vsel %vm1708_vm3, %v12330_v47, -inf  ;;  %8330 = vmatprep.subr.bf16.mxu0 %v12328_v28  ;;  %v12331_v22 = vcombine.low %v9856_v48, %v9890_v9  ;;  %7408 = vmatmul.mubr.f32.vlgmr.msra.gmra.mrb[0].mxu1 %v1809_v18  ;;  %v10165_v36 = vsel %vm1808_vm4, %v2004_v43, %v1997_v29  ;;  %v2422_v17 = vrot.slane %v2421_v11, 1  ;;  %v6576_v47 = vld [vmem:[%s12171_s8 + $0x140] sm:$0xff] }
 0x173   :  { %v2276_v56 = vrot.slane %v2275_v44, 4  ;;  %v1648_v48 = vadd.f32 %v9793_v39, %v10010_v35  ;;  %v12332_v9 = vpack.c.bf16 %v9849_v42, %v9844_v55  ;;  %v12333_v12 = vpack.c.bf16 %v9902_v2, %v9897_v3  ;;  %7477 = vmatprep.mubr.msk.f32.mxu1 %vm8860_vm2, %v12327_v24 }
 0x174   :  { %v2676_v10 = vrot.slane %v12331_v22, %v9021_v26  ;;  %v2428_v57 = vmax.f32 %v2426_v21, %v2427_v34  ;;  %v2284_v5 = vmax.f32 %v2282_v23, %v2283_v0  ;;  %v1512_v25 = vcombine.high %v10061_v20, %v10061_v20 }
 0x175   :  { %v2277_v15 = vmax.f32 %v2275_v44, %v2276_v56  ;;  %8302 = vmatpush3.bf16.msra.mxu1 %v12332_v9  ;;  %8332 = vmatpush3.bf16.msra.mxu0 %v12333_v12  ;;  %v2556_v31 = vrot.slane %v10112_v38, %v9021_v26  ;;  %v2708_v55 = vsel %vm1708_vm3, %v2698_v58, -inf  ;;  %v2811_v42 = vcombine.low %v1648_v48, %v10102_v37  ;;  %v6577_v56 = vld [vmem:[%s12171_s8 + $0x148] sm:$0xff] }
 0x176   :  { %8303 = vmatprep.subr.bf16.mxu1 %v12328_v28  ;;  %8333 = vmatprep.subr.bf16.mxu0 %v12328_v28  ;;  %v8340_v2 = vpack.c.bf16 %v10162_v27, %v10157_v33  ;;  %v2429_v3 = vrot.slane %v2428_v57, 1  ;;  %v2285_v20 = vrot.slane %v2284_v5, 2  ;;  %v12334_v38 = vcombine.low %v10030_v6, %v10035_v8  ;;  %v12342_v9 = vld [vmem:[#allocation72_spill] sm:$0xff]  ;;  %v12343_v12 = vld [vmem:[#allocation71_spill] sm:$0xff] }
 0x177   :  { %v2278_v35 = vrot.slane %v2277_v15, 2  ;;  %v1668_v59 = vadd.f32 %v9793_v39, %v10068_v49  ;;  %v2423_v50 = vmax.f32 %v2421_v11, %v2422_v17  ;;  %v12335_v37 = vpack.c.bf16 %v9886_v62, %v9881_v30 }
 0x178   :  { %v2960_v53 = vrot.slane %v12334_v38, %v9021_v26  ;;  %v12336_v16 = vpack.c.bf16 %v9949_v51, %v9937_v40  ;;  %v2430_v32 = vmax.f32 %v2428_v57, %v2429_v3  ;;  %v2286_v61 = vmax.f32 %v2284_v5, %v2285_v20 }
 0x179   :  { %v2279_v63 = vmax.f32 %v2277_v15, %v2278_v35  ;;  %8305 = vmatpush3.bf16.msra.mxu1 %v12335_v37  ;;  %v2683_v19 = vrot.slane %v2676_v10, %v9021_v26  ;;  %v2709_v14 = vrot.slane %v2708_v55, 4  ;;  %v1669_v8 = vadd.f32 %v9799_v41, %v1512_v25  ;;  %v6578_v25 = vld [vmem:[%s12171_s8 + $0x150] sm:$0xff] }
 0x17a   :  { %8335 = vmatpush3.bf16.msra.mxu0 %v12336_v16  ;;  %8306 = vmatprep.subr.bf16.mxu1 %v12328_v28  ;;  %v12337_v30 = vrot.slane %v9965_v13, %v9021_v26  ;;  %v2566_v40 = vsel %vm1708_vm3, %v2556_v31, -inf  ;;  %v10209_v51 = vsel %vm1808_vm4, %v2430_v32, %v2423_v50  ;;  %v2287_v6 = vrot.slane %v2286_v61, 1  ;;  %v12346_v50 = vld [vmem:[#allocation75_spill] sm:$0xff] }
 0x17b   :  { %8336 = vmatprep.subr.bf16.mxu0 %v12328_v28  ;;  %v2280_v39 = vrot.slane %v2279_v63, 1  ;;  %v2701_v49 = vsel %vm1708_vm3, %v2683_v19, -inf  ;;  %v2710_v7 = vmax.f32 %v2708_v55, %v2709_v14  ;;  %v2967_v41 = vrot.slane %v2960_v53, %v9021_v26  ;;  %v6579_v55 = vld [vmem:[%s12171_s8 + $0x158] sm:$0xff] }
 0x17c   :  { %v2559_v62 = vsel %vm1708_vm3, %v12337_v30, -inf  ;;  %v2702_v29 = vrot.slane %v2701_v49, 4  ;;  %v2567_v11 = vrot.slane %v2566_v40, 4  ;;  %v2818_v45 = vrot.slane %v2811_v42, %v9021_v26  ;;  %v6598_v42 = vld [vmem:[%s12171_s8 + $0x1f0] sm:$0xff]  ;;  %v6581_v30 = vld [vmem:[%s12171_s8 + $0x168] sm:$0xff] }
 0x17d   :  { %v2560_v4 = vrot.slane %v2559_v62, 4  ;;  %v12338_v13 = vpack.c.bf16 %v9914_v60, %v9909_v1  ;;  %v12341_v21 = vpack.c.bf16 %v12339_v52, %v12340_v46  ;;  %v2281_v44 = vmax.f32 %v2279_v63, %v2280_v39  ;;  %v6596_v1 = vld [vmem:[%s12171_s8 + $0x1e0] sm:$0xff]  ;;  %v6597_v60 = vld [vmem:[%s12171_s8 + $0x1e8] sm:$0xff] }
 0x17e   :  { %v2288_v58 = vmax.f32 %v2286_v61, %v2287_v6  ;;  %v2711_v43 = vrot.slane %v2710_v7, 2  ;;  %v2703_v23 = vmax.f32 %v2701_v49, %v2702_v29  ;;  %v2568_v34 = vmax.f32 %v2566_v40, %v2567_v11  ;;  %v6580_v39 = vld [vmem:[%s12171_s8 + $0x160] sm:$0xff]  ;;  %v6617_v49 = vld [vmem:[%s12171_s8 + $0x288] sm:$0xff] }
 0x17f   :  { %8308 = vmatpush3.bf16.msra.mxu1 %v12338_v13  ;;  %8338 = vmatpush3.bf16.msra.mxu0 %v12341_v21  ;;  %v2561_v18 = vmax.f32 %v2559_v62, %v2560_v4  ;;  %v2826_v0 = vcombine.low %v1668_v59, %v1669_v8  ;;  %v2985_v15 = vsel %vm1708_vm3, %v2967_v41, -inf  ;;  %v2825_v48 = vrot.slane %v2818_v45, %v9021_v26  ;;  %v12345_v59 = vld [vmem:[#allocation76_spill] sm:$0xff]  ;;  %v6616_v6 = vld [vmem:[%s12171_s8 + $0x280] sm:$0xff] }
 0x180   :  { %8309 = vmatprep.subr.bf16.mxu1 %v12328_v28  ;;  %8339 = vmatprep.subr.bf16.mxu0 %v12328_v28  ;;  %v10235_v22 = vsel %vm1808_vm4, %v2288_v58, %v2281_v44  ;;  %v2712_v10 = vmax.f32 %v2710_v7, %v2711_v43  ;;  %v2704_v33 = vrot.slane %v2703_v23, 2  ;;  %v2569_v17 = vrot.slane %v2568_v34, 2  ;;  %v6582_v44 = vld [vmem:[%s12171_s8 + $0x170] sm:$0xff] }
 0x181   :  { %v2562_v27 = vrot.slane %v2561_v18, 2  ;;  %v12344_v57 = vpack.c.bf16 %v12342_v9, %v12343_v12  ;;  %v8313_v5 = vpack.c.bf16 %v6577_v56, %v6576_v47  ;;  %v8343_v31 = vpack.c.bf16 %v6597_v60, %v6596_v1  ;;  %v6583_v60 = vld [vmem:[%s12171_s8 + $0x178] sm:$0xff]  ;;  %v6600_v9 = vld [vmem:[%s12171_s8 + $0x200] sm:$0xff] }
 0x182   :  { %v2713_v35 = vrot.slane %v2712_v10, 1  ;;  %v2705_v3 = vmax.f32 %v2703_v23, %v2704_v33  ;;  %v2570_v38 = vmax.f32 %v2568_v34, %v2569_v17  ;;  %v2833_v53 = vrot.slane %v2826_v0, %v9021_v26  ;;  %v6618_v23 = vld [vmem:[%s12171_s8 + $0x290] sm:$0xff] }
 0x183   :  { %8311 = vmatpush3.bf16.msra.mxu1 %v12344_v57  ;;  %8341 = vmatpush3.bf16.msra.mxu0 %v8340_v2  ;;  %v6599_v2 = vld [vmem:[%s12171_s8 + $0x1f8] sm:$0xff]  ;;  %v2563_v20 = vmax.f32 %v2561_v18, %v2562_v27  ;;  %v12347_v63 = vcombine.low %v12345_v59, %v12346_v50  ;;  %v2986_v16 = vrot.slane %v2985_v15, 4  ;;  %v8316_v8 = vpack.c.bf16 %v6579_v55, %v6578_v25  ;;  %v6601_v57 = vld [vmem:[%s12171_s8 + $0x208] sm:$0xff]  ;;  %v6622_v59 = vld [vmem:[%s12171_s8 + $0x2b0] sm:$0xff] }
 0x184   :  { %8312 = vmatprep.subr.bf16.mxu1 %v12328_v28  ;;  %8342 = vmatprep.subr.bf16.mxu0 %v12328_v28  ;;  %v2706_v32 = vrot.slane %v2705_v3, 1  ;;  %v2714_v61 = vmax.f32 %v2712_v10, %v2713_v35  ;;  %v2571_v14 = vrot.slane %v2570_v38, 1  ;;  %v8346_v62 = vpack.c.bf16 %v6599_v2, %v6598_v42  ;;  %v6619_v18 = vld [vmem:[%s12171_s8 + $0x298] sm:$0xff] }
 0x185   :  { %v2975_v37 = vrot.slane %v12347_v63, %v9021_v26  ;;  %v2564_v19 = vrot.slane %v2563_v20, 1  ;;  %v2843_v40 = vsel %vm1708_vm3, %v2825_v48, -inf  ;;  %v2987_v45 = vmax.f32 %v2985_v15, %v2986_v16  ;;  %v6623_v50 = vld [vmem:[%s12171_s8 + $0x2b8] sm:$0xff] }
 0x186   :  { %v2707_v7 = vmax.f32 %v2705_v3, %v2706_v32  ;;  %v2572_v29 = vmax.f32 %v2570_v38, %v2571_v14  ;;  %v2844_v4 = vrot.slane %v2843_v40, 4  ;;  %v2840_v13 = vrot.slane %v2833_v53, %v9021_v26  ;;  %v6603_v53 = vld [vmem:[%s12171_s8 + $0x218] sm:$0xff] }
 0x187   :  { %8314 = vmatpush3.bf16.msra.mxu1 %v8313_v5  ;;  %8344 = vmatpush3.bf16.msra.mxu0 %v8343_v31  ;;  %v2565_v41 = vmax.f32 %v2563_v20, %v2564_v19  ;;  %v2982_v11 = vrot.slane %v2975_v37, %v9021_v26  ;;  %v8319_v52 = vpack.c.bf16 %v6581_v30, %v6580_v39  ;;  %v2988_v43 = vrot.slane %v2987_v45, 2  ;;  %v6621_v5 = vld [vmem:[%s12171_s8 + $0x2a8] sm:$0xff]  ;;  %v6602_v20 = vld [vmem:[%s12171_s8 + $0x210] sm:$0xff] }
 0x188   :  { %8315 = vmatprep.subr.bf16.mxu1 %v12328_v28  ;;  %8345 = vmatprep.subr.bf16.mxu0 %v12328_v28  ;;  %v10279_v46 = vsel %vm1808_vm4, %v2714_v61, %v2707_v7  ;;  %v2845_v47 = vmax.f32 %v2843_v40, %v2844_v4  ;;  %v8373_v58 = vpack.c.bf16 %v6617_v49, %v6616_v6  ;;  %v2850_v1 = vsel %vm1708_vm3, %v2840_v13, -inf  ;;  %v6605_v30 = vld [vmem:[%s12171_s8 + $0x228] sm:$0xff]  ;;  %v6606_v7 = vld [vmem:[%s12171_s8 + $0x230] sm:$0xff]  ;;  %v6608_v13 = vld [vmem:[%s12171_s8 + $0x240] sm:$0xff] }
 0x189   :  { %v10282_v21 = vsel %vm1808_vm4, %v2572_v29, %v2565_v41  ;;  %v2992_v56 = vsel %vm1708_vm3, %v2982_v11, -inf  ;;  %v2851_v10 = vrot.slane %v2850_v1, 4  ;;  %v2989_v33 = vmax.f32 %v2987_v45, %v2988_v43  ;;  %v6607_v29 = vld [vmem:[%s12171_s8 + $0x238] sm:$0xff]  ;;  %v6626_v4 = vld [vmem:[%s12171_s8 + $0x2d0] sm:$0xff] }
 0x18a   :  { %v2993_v34 = vrot.slane %v2992_v56, 4  ;;  %v2846_v0 = vrot.slane %v2845_v47, 2  ;;  %v8322_v48 = vpack.c.bf16 %v6583_v60, %v6582_v44  ;;  %v8376_v12 = vpack.c.bf16 %v6619_v18, %v6618_v23  ;;  %v6627_v11 = vld [vmem:[%s12171_s8 + $0x2d8] sm:$0xff]  ;;  %v6628_v44 = vld [vmem:[%s12171_s8 + $0x2e0] sm:$0xff]  ;;  %v6630_v23 = vld [vmem:[%s12171_s8 + $0x2f0] sm:$0xff] }
 0x18b   :  { %8317 = vmatpush3.bf16.msra.mxu1 %v8316_v8  ;;  %8347 = vmatpush3.bf16.msra.mxu0 %v8346_v62  ;;  %v2852_v15 = vmax.f32 %v2850_v1, %v2851_v10  ;;  %v2990_v35 = vrot.slane %v2989_v33, 1  ;;  %v8349_v3 = vpack.c.bf16 %v6601_v57, %v6600_v9  ;;  %v8352_v14 = vpack.c.bf16 %v6603_v53, %v6602_v20  ;;  %v6604_v8 = vld [vmem:[%s12171_s8 + $0x220] sm:$0xff]  ;;  %v6625_v62 = vld [vmem:[%s12171_s8 + $0x2c8] sm:$0xff]  ;;  %v6611_v60 = vld [vmem:[%s12171_s8 + $0x258] sm:$0xff] }
 0x18c   :  { %8318 = vmatprep.subr.bf16.mxu1 %v12328_v28  ;;  %8372 = vmatprep.subr.bf16.mxu0 %v12328_v28  ;;  %v2994_v27 = vmax.f32 %v2992_v56, %v2993_v34  ;;  %v2847_v17 = vmax.f32 %v2845_v47, %v2846_v0  ;;  %v8382_v39 = vpack.c.bf16 %v6623_v50, %v6622_v59  ;;  %v6609_v47 = vld [vmem:[%s12171_s8 + $0x248] sm:$0xff]  ;;  %v6610_v56 = vld [vmem:[%s12171_s8 + $0x250] sm:$0xff]  ;;  %v6631_v18 = vld [vmem:[%s12171_s8 + $0x2f8] sm:$0xff] }
 0x18d   :  { %v2853_v31 = vrot.slane %v2852_v15, 2  ;;  %v2991_v16 = vmax.f32 %v2989_v33, %v2990_v35  ;;  %v8355_v49 = vpack.c.bf16 %v6605_v30, %v6604_v8  ;;  %v8358_v45 = vpack.c.bf16 %v6607_v29, %v6606_v7  ;;  %v6612_v0 = vld [vmem:[%s12171_s8 + $0x260] sm:$0xff]  ;;  %v6613_v33 = vld [vmem:[%s12171_s8 + $0x268] sm:$0xff]  ;;  %v6650_v57 = vld [vmem:[%s12171_s8 + $0x390] sm:$0xff] }
 0x18e   :  { %7513 = vmatmul.mubr.f32.vlgmr.msra.gmra.mrb[8].mxu0 %v10148_v54  ;;  %v6620_v54 = vld [vmem:[%s12171_s8 + $0x2a0] sm:$0xff]  ;;  %v2995_v25 = vrot.slane %v2994_v27, 2  ;;  %v2848_v42 = vrot.slane %v2847_v17, 1  ;;  %v8361_v43 = vpack.c.bf16 %v6609_v47, %v6608_v13  ;;  %v8364_v34 = vpack.c.bf16 %v6611_v60, %v6610_v56  ;;  %v6633_v35 = vld [vmem:[%s12171_s8 + $0x308] sm:$0xff]  ;;  %v6635_v20 = vld [vmem:[%s12171_s8 + $0x318] sm:$0xff] }
 0x18f   :  { %8320 = vmatpush3.bf16.msra.mxu1 %v8319_v52  ;;  %8374 = vmatpush3.bf16.msra.mxu0 %v8373_v58  ;;  %v2854_v2 = vmax.f32 %v2852_v15, %v2853_v31  ;;  %v8379_v38 = vpack.c.bf16 %v6621_v5, %v6620_v54  ;;  %v8388_v52 = vpack.c.bf16 %v6627_v11, %v6626_v4  ;;  %v6629_v58 = vld [vmem:[%s12171_s8 + $0x2e8] sm:$0xff]  ;;  %v6651_v54 = vld [vmem:[%s12171_s8 + $0x398] sm:$0xff]  ;;  %v6636_v50 = vld [vmem:[%s12171_s8 + $0x320] sm:$0xff] }
 0x190   :  { %8321 = vmatprep.subr.bf16.mxu1 %v12328_v28  ;;  %8375 = vmatprep.subr.bf16.mxu0 %v12328_v28  ;;  %v2996_v55 = vmax.f32 %v2994_v27, %v2995_v25  ;;  %v2849_v61 = vmax.f32 %v2847_v17, %v2848_v42  ;;  %v8391_v1 = vpack.c.bf16 %v6629_v58, %v6628_v44  ;;  %v6648_v27 = vld [vmem:[%s12171_s8 + $0x380] sm:$0xff]  ;;  %v6649_v17 = vld [vmem:[%s12171_s8 + $0x388] sm:$0xff]  ;;  %v6655_v53 = vld [vmem:[%s12171_s8 + $0x3b8] sm:$0xff] }
 0x191   :  { %7582 = vmatprep.mubr.msk.f32.mxu0 %vm8860_vm2, %v12327_v24  ;;  %v2855_v37 = vrot.slane %v2854_v2, 1  ;;  %v8394_v10 = vpack.c.bf16 %v6631_v18, %v6630_v23  ;;  %v8367_v15 = vpack.c.bf16 %v6613_v33, %v6612_v0  ;;  %v8421_v9 = vpack.c.bf16 %v6649_v17, %v6648_v27  ;;  %v6632_v25 = vld [vmem:[%s12171_s8 + $0x300] sm:$0xff]  ;;  %v6658_v8 = vld [vmem:[%s12171_s8 + $0x3d0] sm:$0xff] }
 0x192   :  { %v2997_v63 = vrot.slane %v2996_v55, 1  ;;  %v8424_v31 = vpack.c.bf16 %v6651_v54, %v6650_v57  ;;  %v8397_v42 = vpack.c.bf16 %v6633_v35, %v6632_v25  ;;  %v6660_v7 = vld [vmem:[%s12171_s8 + $0x3e0] sm:$0xff]  ;;  %v6642_v4 = vld [vmem:[%s12171_s8 + $0x350] sm:$0xff]  ;;  %v6667_v54 = vld [vmem:[%s12171_s8 + $0x418] sm:$0xff] }
 0x193   :  { %8323 = vmatpush3.bf16.msra.mxu1 %v8322_v48  ;;  %8377 = vmatpush3.bf16.msra.mxu0 %v8376_v12  ;;  %v2856_v19 = vmax.f32 %v2854_v2, %v2855_v37  ;;  %v6614_v48 = vld [vmem:[%s12171_s8 + $0x270] sm:$0xff]  ;;  %v6615_v12 = vld [vmem:[%s12171_s8 + $0x278] sm:$0xff]  ;;  %v6637_v37 = vld [vmem:[%s12171_s8 + $0x328] sm:$0xff] }
 0x194   :  { %8348 = vmatprep.subr.bf16.mxu1 %v12328_v28  ;;  %8378 = vmatprep.subr.bf16.mxu0 %v12328_v28  ;;  %v2998_v32 = vmax.f32 %v2996_v55, %v2997_v63  ;;  %v8370_v5 = vpack.c.bf16 %v6615_v12, %v6614_v48  ;;  %v6653_v55 = vld [vmem:[%s12171_s8 + $0x3a8] sm:$0xff]  ;;  %v6634_v2 = vld [vmem:[%s12171_s8 + $0x310] sm:$0xff]  ;;  %v6644_v44 = vld [vmem:[%s12171_s8 + $0x360] sm:$0xff] }
 0x195   :  { %v10350_v6 = vsel %vm1808_vm4, %v2856_v19, %v2849_v61  ;;  %v8400_v59 = vpack.c.bf16 %v6635_v20, %v6634_v2  ;;  %v6638_v61 = vld [vmem:[%s12171_s8 + $0x330] sm:$0xff]  ;;  %v6680_v56 = vld [vmem:[%s12171_s8 + $0x480] sm:$0xff]  ;;  %v6685_v48 = vld [vmem:[%s12171_s8 + $0x4a8] sm:$0xff] }
 0x196   :  { %7478 = vmatmul.mubr.f32.vlgmr.msra.gmra.mrb[2].mxu1 %v10165_v36  ;;  %v6624_v36 = vld [vmem:[%s12171_s8 + $0x2c0] sm:$0xff]  ;;  %v10347_v40 = vsel %vm1808_vm4, %v2998_v32, %v2991_v16  ;;  %v6657_v16 = vld [vmem:[%s12171_s8 + $0x3c8] sm:$0xff]  ;;  %v8403_v32 = vpack.c.bf16 %v6637_v37, %v6636_v50  ;;  %v6662_v13 = vld [vmem:[%s12171_s8 + $0x3f0] sm:$0xff] }
 0x197   :  { %8350 = vmatpush3.bf16.msra.mxu1 %v8349_v3  ;;  %8380 = vmatpush3.bf16.msra.mxu0 %v8379_v38  ;;  %v8385_v41 = vpack.c.bf16 %v6625_v62, %v6624_v36  ;;  %v6654_v38 = vld [vmem:[%s12171_s8 + $0x3b0] sm:$0xff]  ;;  %v6640_v36 = vld [vmem:[%s12171_s8 + $0x340] sm:$0xff]  ;;  %v6687_v25 = vld [vmem:[%s12171_s8 + $0x4b8] sm:$0xff] }
 0x198   :  { %8351 = vmatprep.subr.bf16.mxu1 %v12328_v28  ;;  %8381 = vmatprep.subr.bf16.mxu0 %v12328_v28  ;;  %v8430_v63 = vpack.c.bf16 %v6655_v53, %v6654_v38  ;;  %v6646_v23 = vld [vmem:[%s12171_s8 + $0x370] sm:$0xff]  ;;  %v6664_v27 = vld [vmem:[%s12171_s8 + $0x400] sm:$0xff]  ;;  %v6671_v38 = vld [vmem:[%s12171_s8 + $0x438] sm:$0xff] }
 0x199   :  { %7547 = vmatprep.mubr.msk.f32.mxu1 %vm8860_vm2, %v12327_v24  ;;  %v6682_v0 = vld [vmem:[%s12171_s8 + $0x490] sm:$0xff]  ;;  %v6668_v35 = vld [vmem:[%s12171_s8 + $0x420] sm:$0xff] }
 0x19a   :  { %v6666_v12 = vld [vmem:[%s12171_s8 + $0x410] sm:$0xff] }
 0x19b   :  { %8353 = vmatpush3.bf16.msra.mxu1 %v8352_v14  ;;  %8383 = vmatpush3.bf16.msra.mxu0 %v8382_v39  ;;  %v6639_v14 = vld [vmem:[%s12171_s8 + $0x338] sm:$0xff]  ;;  %v6690_v53 = vld [vmem:[%s12171_s8 + $0x4d0] sm:$0xff] }
 0x19c   :  { %8354 = vmatprep.subr.bf16.mxu1 %v12328_v28  ;;  %8384 = vmatprep.subr.bf16.mxu0 %v12328_v28  ;;  %v6659_v39 = vld [vmem:[%s12171_s8 + $0x3d8] sm:$0xff]  ;;  %v8406_v30 = vpack.c.bf16 %v6639_v14, %v6638_v61 }
 0x19d   :  { %v8436_v62 = vpack.c.bf16 %v6659_v39, %v6658_v8  ;;  %v6675_v8 = vld [vmem:[%s12171_s8 + $0x458] sm:$0xff]  ;;  %v6694_v39 = vld [vmem:[%s12171_s8 + $0x4f0] sm:$0xff] }
 0x19f   :  { %8356 = vmatpush3.bf16.msra.mxu1 %v8355_v49  ;;  %8386 = vmatpush3.bf16.msra.mxu0 %v8385_v41  ;;  %v6641_v49 = vld [vmem:[%s12171_s8 + $0x348] sm:$0xff] }
 0x1a0   :  { %8357 = vmatprep.subr.bf16.mxu1 %v12328_v28  ;;  %8387 = vmatprep.subr.bf16.mxu0 %v12328_v28  ;;  %v6661_v41 = vld [vmem:[%s12171_s8 + $0x3e8] sm:$0xff]  ;;  %v8409_v29 = vpack.c.bf16 %v6641_v49, %v6640_v36  ;;  %v6676_v36 = vld [vmem:[%s12171_s8 + $0x460] sm:$0xff] }
 0x1a1   :  { %v8439_v11 = vpack.c.bf16 %v6661_v41, %v6660_v7  ;;  %v6677_v49 = vld [vmem:[%s12171_s8 + $0x468] sm:$0xff]  ;;  %v6712_v41 = vld [vmem:[%s12166_s3 + $0x40] sm:$0xff] }
 0x1a3   :  { %8359 = vmatpush3.bf16.msra.mxu1 %v8358_v45  ;;  %8389 = vmatpush3.bf16.msra.mxu0 %v8388_v52  ;;  %v6643_v45 = vld [vmem:[%s12171_s8 + $0x358] sm:$0xff] }
 0x1a4   :  { %8360 = vmatprep.subr.bf16.mxu1 %v12328_v28  ;;  %8390 = vmatprep.subr.bf16.mxu0 %v12328_v28  ;;  %v6663_v52 = vld [vmem:[%s12171_s8 + $0x3f8] sm:$0xff]  ;;  %v8412_v47 = vpack.c.bf16 %v6643_v45, %v6642_v4  ;;  %v8463_v45 = vpack.c.bf16 %v6677_v49, %v6676_v36 }
 0x1a5   :  { %v8442_v58 = vpack.c.bf16 %v6663_v52, %v6662_v13  ;;  %v12348_v4 = vld [vmem:[#allocation9_spill] sm:$0xff] }
 0x1a6   :  { %v6678_v13 = vld [vmem:[%s12171_s8 + $0x470] sm:$0xff]  ;;  %v6679_v52 = vld [vmem:[%s12171_s8 + $0x478] sm:$0xff] }
 0x1a7   :  { %8362 = vmatpush3.bf16.msra.mxu1 %v8361_v43  ;;  %8392 = vmatpush3.bf16.msra.mxu0 %v8391_v1  ;;  %v6645_v43 = vld [vmem:[%s12171_s8 + $0x368] sm:$0xff] }
 0x1a8   :  { %8363 = vmatprep.subr.bf16.mxu1 %v12328_v28  ;;  %8393 = vmatprep.subr.bf16.mxu0 %v12328_v28  ;;  %v6681_v1 = vld [vmem:[%s12171_s8 + $0x488] sm:$0xff]  ;;  %v8415_v60 = vpack.c.bf16 %v6645_v43, %v6644_v44  ;;  %v6714_v44 = vld [vmem:[%s12166_s3 + $0x50] sm:$0xff]  ;;  %v10659_v43 = vld [vmem:[#allocation2] sm:$0xff] }
 0x1a9   :  { %v8469_v18 = vpack.c.bf16 %v6681_v1, %v6680_v56  ;;  %v6716_v56 = vrot.slane %v10659_v43, 10 }
 0x1ab   :  { %8365 = vmatpush3.bf16.msra.mxu1 %v8364_v34  ;;  %8395 = vmatpush3.bf16.msra.mxu0 %v8394_v10  ;;  %v6647_v34 = vld [vmem:[%s12171_s8 + $0x378] sm:$0xff] }
 0x1ac   :  { %8366 = vmatprep.subr.bf16.mxu1 %v12328_v28  ;;  %8420 = vmatprep.subr.bf16.mxu0 %v12328_v28  ;;  %v6683_v10 = vld [vmem:[%s12171_s8 + $0x498] sm:$0xff]  ;;  %v8418_v33 = vpack.c.bf16 %v6647_v34, %v6646_v23 }
 0x1ad   :  { %v8472_v17 = vpack.c.bf16 %v6683_v10, %v6682_v0  ;;  %v8466_v10 = vpack.c.bf16 %v6679_v52, %v6678_v13  ;;  %v10742_v13 = vld [vmem:[#allocation2 + $0x28] sm:$0x3f] }
 0x1ae   :  { %7583 = vmatmul.mubr.f32.vlgmr.msra.gmra.mrb[10].mxu0 %v10209_v51  ;;  %v6652_v51 = vld [vmem:[%s12171_s8 + $0x3a0] sm:$0xff] }
 0x1af   :  { %8368 = vmatpush3.bf16.msra.mxu1 %v8367_v15  ;;  %8422 = vmatpush3.bf16.msra.mxu0 %v8421_v9  ;;  %v8427_v3 = vpack.c.bf16 %v6653_v55, %v6652_v51  ;;  %v6665_v15 = vld [vmem:[%s12171_s8 + $0x408] sm:$0xff] }
 0x1b0   :  { %8369 = vmatprep.subr.bf16.mxu1 %v12328_v28  ;;  %8423 = vmatprep.subr.bf16.mxu0 %v12328_v28  ;;  %v8445_v9 = vpack.c.bf16 %v6665_v15, %v6664_v27  ;;  %v6669_v55 = vld [vmem:[%s12171_s8 + $0x428] sm:$0xff] }
 0x1b1   :  { %7652 = vmatprep.mubr.msk.f32.mxu0 %vm8860_vm2, %v12327_v24  ;;  %v8451_v2 = vpack.c.bf16 %v6669_v55, %v6668_v35  ;;  %v6697_v27 = vld [vmem:[%s12166_s3 + $0x28] sm:$0xff] }
 0x1b3   :  { %8371 = vmatpush3.bf16.msra.mxu1 %v8370_v5  ;;  %8425 = vmatpush3.bf16.msra.mxu0 %v8424_v31  ;;  %v6686_v5 = vld [vmem:[%s12171_s8 + $0x4b0] sm:$0xff]  ;;  %v8448_v31 = vpack.c.bf16 %v6667_v54, %v6666_v12 }
 0x1b4   :  { %8396 = vmatprep.subr.bf16.mxu1 %v12328_v28  ;;  %8426 = vmatprep.subr.bf16.mxu0 %v12328_v28  ;;  %v8478_v51 = vpack.c.bf16 %v6687_v25, %v6686_v5  ;;  %v6698_v5 = vld [vmem:[%s12166_s3 + $0x30] sm:$0xff]  ;;  %v6699_v25 = vld [vmem:[%s12166_s3 + $0x38] sm:$0xff] }
 0x1b6   :  { %7548 = vmatmul.mubr.f32.vlgmr.msra.gmra.mrb[4].mxu1 %v10235_v22  ;;  %v6656_v22 = vld [vmem:[%s12171_s8 + $0x3c0] sm:$0xff] }
 0x1b7   :  { %8398 = vmatpush3.bf16.msra.mxu1 %v8397_v42  ;;  %8428 = vmatpush3.bf16.msra.mxu0 %v8427_v3  ;;  %v8433_v19 = vpack.c.bf16 %v6657_v16, %v6656_v22  ;;  %v6689_v42 = vld [vmem:[%s12171_s8 + $0x4c8] sm:$0xff]  ;;  %v6670_v3 = vld [vmem:[%s12171_s8 + $0x430] sm:$0xff]  ;;  %v6692_v16 = vld [vmem:[%s12171_s8 + $0x4e0] sm:$0xff] }
 0x1b8   :  { %8399 = vmatprep.subr.bf16.mxu1 %v12328_v28  ;;  %8429 = vmatprep.subr.bf16.mxu0 %v12328_v28  ;;  %v8454_v50 = vpack.c.bf16 %v6671_v38, %v6670_v3  ;;  %v6673_v22 = vld [vmem:[%s12171_s8 + $0x448] sm:$0xff]  ;;  %v12354_v3 = vld [vmem:[#allocation14_spill] sm:$0xff] }
 0x1b9   :  { %7617 = vmatprep.mubr.msk.f32.mxu1 %vm8860_vm2, %v12327_v24  ;;  %v10709_v38 = vld [vmem:[#allocation2 + $0x18] sm:$0xff] }
 0x1bb   :  { %8401 = vmatpush3.bf16.msra.mxu1 %v8400_v59  ;;  %8431 = vmatpush3.bf16.msra.mxu0 %v8430_v63  ;;  %v6691_v59 = vld [vmem:[%s12171_s8 + $0x4d8] sm:$0xff]  ;;  %v6672_v63 = vld [vmem:[%s12171_s8 + $0x440] sm:$0xff] }
 0x1bc   :  { %8402 = vmatprep.subr.bf16.mxu1 %v12328_v28  ;;  %8432 = vmatprep.subr.bf16.mxu0 %v12328_v28  ;;  %v8484_v37 = vpack.c.bf16 %v6691_v59, %v6690_v53  ;;  %v8457_v61 = vpack.c.bf16 %v6673_v22, %v6672_v63  ;;  %v6717_v53 = vrot.slane %v10709_v38, 10  ;;  %v12355_v63 = vld [vmem:[#allocation26_spill] sm:$0xff] }
 0x1bd   :  { %v10717_v22 = vld [vmem:[#allocation2 + $0x20] sm:$0xff] }
 0x1bf   :  { %8404 = vmatpush3.bf16.msra.mxu1 %v8403_v32  ;;  %8434 = vmatpush3.bf16.msra.mxu0 %v8433_v19  ;;  %v6693_v32 = vld [vmem:[%s12171_s8 + $0x4e8] sm:$0xff]  ;;  %v6674_v19 = vld [vmem:[%s12171_s8 + $0x450] sm:$0xff] }
 0x1c0   :  { %8405 = vmatprep.subr.bf16.mxu1 %v12328_v28  ;;  %8435 = vmatprep.subr.bf16.mxu0 %v12328_v28  ;;  %v8487_v14 = vpack.c.bf16 %v6693_v32, %v6692_v16  ;;  %v3388_v16 = vrot.slane %v10717_v22, 6  ;;  %v8496_v32 = vpack.c.bf16 %v6699_v25, %v6698_v5 }
 0x1c3   :  { %8407 = vmatpush3.bf16.msra.mxu1 %v8406_v30  ;;  %8437 = vmatpush3.bf16.msra.mxu0 %v8436_v62  ;;  %v6695_v30 = vld [vmem:[%s12171_s8 + $0x4f8] sm:$0xff]  ;;  %v8460_v62 = vpack.c.bf16 %v6675_v8, %v6674_v19  ;;  %v3092_v8 = vld [vmem:[%s12166_s3 + $0x8] sm:$0xff] }
 0x1c4   :  { %8408 = vmatprep.subr.bf16.mxu1 %v12328_v28  ;;  %8438 = vmatprep.subr.bf16.mxu0 %v12328_v28  ;;  %v8490_v7 = vpack.c.bf16 %v6695_v30, %v6694_v39 }
 0x1c7   :  { %8410 = vmatpush3.bf16.msra.mxu1 %v8409_v29  ;;  %8440 = vmatpush3.bf16.msra.mxu0 %v8439_v11  ;;  %v6713_v29 = vld [vmem:[%s12166_s3 + $0x48] sm:$0xff]  ;;  %v3369_v11 = vrot.slane %v12348_v4, 6 }
 0x1c8   :  { %8411 = vmatprep.subr.bf16.mxu1 %v12328_v28  ;;  %8441 = vmatprep.subr.bf16.mxu0 %v12328_v28 }
 0x1c9   :  { %v3371_v1 = vrot.slane %v3369_v11, 4 }
 0x1cb   :  { %8413 = vmatpush3.bf16.msra.mxu1 %v8412_v47  ;;  %8443 = vmatpush3.bf16.msra.mxu0 %v8442_v58  ;;  %v8505_v47 = vpack.c.bf16 %v6713_v29, %v6712_v41  ;;  %v6715_v58 = vld [vmem:[%s12166_s3 + $0x58] sm:$0xff]  ;;  %v3390_v29 = vrot.slane %v3388_v16, 4 }
 0x1cc   :  { %8414 = vmatprep.subr.bf16.mxu1 %v12328_v28  ;;  %8468 = vmatprep.subr.bf16.mxu0 %v12328_v28  ;;  %v8508_v15 = vpack.c.bf16 %v6715_v58, %v6714_v44  ;;  %v3117_v44 = vrot.slane %v12354_v3, 5 }
 0x1ce   :  { %7653 = vmatmul.mubr.f32.vlgmr.msra.gmra.mrb[12].mxu0 %v10279_v46  ;;  %v6684_v46 = vld [vmem:[%s12171_s8 + $0x4a0] sm:$0xff] }
 0x1cf   :  { %8416 = vmatpush3.bf16.msra.mxu1 %v8415_v60  ;;  %8470 = vmatpush3.bf16.msra.mxu0 %v8469_v18  ;;  %v8475_v57 = vpack.c.bf16 %v6685_v48, %v6684_v46  ;;  %v10662_v60 = vld [vmem:[#allocation2 + $0x8] sm:$0xff]  ;;  %v10682_v46 = vld [vmem:[#allocation2 + $0x10] sm:$0x3f] }
 0x1d0   :  { %8417 = vmatprep.subr.bf16.mxu1 %v12328_v28  ;;  %8471 = vmatprep.subr.bf16.mxu0 %v12328_v28  ;;  %v3372_v23 = vrot.slane %v10662_v60, 6  ;;  %v12349_v18 = vld [vmem:[#allocation11_spill] sm:$0xff]  ;;  %v3378_v48 = vrot.slane %v10682_v46, 6  ;;  %v3114_v30 = vrot.slane %v10682_v46, 5 }
 0x1d1   :  { %7722 = vmatprep.mubr.msk.f32.mxu0 %vm8860_vm2, %v12327_v24  ;;  %v3375_v34 = vrot.slane %v12349_v18, 6  ;;  %v3111_v55 = vrot.slane %v12349_v18, 5 }
 0x1d2   :  { %v3373_v12 = vsel %vm10670_vm6, %v3371_v1, %v3372_v23  ;;  %v6701_v1 = vrot.slane %v10709_v38, 9 }
 0x1d3   :  { %8419 = vmatpush3.bf16.msra.mxu1 %v8418_v33  ;;  %8473 = vmatpush3.bf16.msra.mxu0 %v8472_v17  ;;  %v6696_v33 = vld [vmem:[%s12166_s3 + $0x20] sm:$0xff]  ;;  %v3105_v17 = vrot.slane %v12348_v4, 5  ;;  %v3377_v54 = vrot.slane %v3375_v34, 4  ;;  %v3113_v36 = vrot.slane %v3111_v55, 4 }
 0x1d4   :  { %8444 = vmatprep.subr.bf16.mxu1 %v12328_v28  ;;  %8474 = vmatprep.subr.bf16.mxu0 %v12328_v28 }
 0x1d5   :  { %v3107_v35 = vrot.slane %v3105_v17, 4 }
 0x1d6   :  { %7618 = vmatmul.mubr.f32.vlgmr.msra.gmra.mrb[6].mxu1 %v10282_v21  ;;  %v6688_v21 = vld [vmem:[%s12171_s8 + $0x4c0] sm:$0xff] }
 0x1d7   :  { %8446 = vmatpush3.bf16.msra.mxu1 %v8445_v9  ;;  %8476 = vmatpush3.bf16.msra.mxu0 %v8475_v57  ;;  %v8481_v20 = vpack.c.bf16 %v6689_v42, %v6688_v21  ;;  %v3370_v9 = vsel %vm10670_vm6, %v6716_v56, %v3369_v11  ;;  %v3374_v57 = vrot.slane %v3372_v23, 4  ;;  %v12356_v11 = vld [vmem:[#allocation37_spill] sm:$0xff]  ;;  %v3116_v56 = vrot.slane %v3114_v30, 4 }
 0x1d8   :  { %8447 = vmatprep.subr.bf16.mxu1 %v12328_v28  ;;  %8477 = vmatprep.subr.bf16.mxu0 %v12328_v28  ;;  %v3399_v42 = vcombine.low %v3370_v9, %v3373_v12  ;;  %v3121_v23 = vrot.slane %v12355_v63, 5  ;;  %v3127_v25 = vrot.slane %v12356_v11, 5  ;;  %v3241_v21 = vcombine.low %v10662_v60, %v12349_v18 }
 0x1d9   :  { %7687 = vmatprep.mubr.msk.f32.mxu1 %vm8860_vm2, %v12327_v24  ;;  %v3376_v59 = vsel %vm10670_vm6, %v3374_v57, %v3375_v34  ;;  %v3115_v34 = vsel %vm10704_vm9, %v3113_v36, %v3114_v30  ;;  %v12357_v57 = vld [vmem:[#allocation41_spill] sm:$0xff]  ;;  %v3242_v30 = vcombine.low %v10682_v46, %v10709_v38  ;;  %v6725_v36 = vld [vmem:[%s12171_s8 + $0x508] sm:$0xff] }
 0x1db   :  { %8449 = vmatpush3.bf16.msra.mxu1 %v8448_v31  ;;  %8479 = vmatpush3.bf16.msra.mxu0 %v8478_v51  ;;  %v6700_v31 = vrot.slane %v10659_v43, 9  ;;  %v3108_v51 = vrot.slane %v10662_v60, 5 }
 0x1dc   :  { %8450 = vmatprep.subr.bf16.mxu1 %v12328_v28  ;;  %8480 = vmatprep.subr.bf16.mxu0 %v12328_v28 }
 0x1dd   :  { %v3109_v19 = vsel %vm10704_vm9, %v3107_v35, %v3108_v51  ;;  %v3110_v39 = vrot.slane %v3108_v51, 4  ;;  %v3122_v35 = vsel %vm10704_vm9, %v6701_v1, %v3121_v23  ;;  %v3123_v51 = vrot.slane %v3121_v23, 4  ;;  %v6742_v23 = vld [vmem:[%s12171_s8 + $0x590] sm:$0xff] }
 0x1df   :  { %8452 = vmatpush3.bf16.msra.mxu1 %v8451_v2  ;;  %8482 = vmatpush3.bf16.msra.mxu0 %v8481_v20  ;;  %v3380_v2 = vrot.slane %v3378_v48, 4  ;;  %v3381_v20 = vrot.slane %v12354_v3, 6  ;;  %v3112_v58 = vsel %vm10704_vm9, %v3110_v39, %v3111_v55  ;;  %v3240_v39 = vcombine.low %v10659_v43, %v12348_v4 }
 0x1e0   :  { %8453 = vmatprep.subr.bf16.mxu1 %v12328_v28  ;;  %8483 = vmatprep.subr.bf16.mxu0 %v12328_v28  ;;  %v3243_v4 = vcombine.low %v12355_v63, %v10717_v22  ;;  %v3244_v43 = vcombine.low %v12356_v11, %v10742_v13 }
 0x1e1   :  { %v3382_v49 = vsel %vm10670_vm6, %v3380_v2, %v3381_v20  ;;  %v3130_v2 = vrot.slane %v10742_v13, 5 }
 0x1e3   :  { %8455 = vmatpush3.bf16.msra.mxu1 %v8454_v50  ;;  %8485 = vmatpush3.bf16.msra.mxu0 %v8484_v37  ;;  %v3379_v50 = vsel %vm10670_vm6, %v3377_v54, %v3378_v48  ;;  %v3385_v37 = vrot.slane %v12355_v63, 6  ;;  %v3397_v54 = vrot.slane %v12357_v57, 6 }
 0x1e4   :  { %8456 = vmatprep.subr.bf16.mxu1 %v12328_v28  ;;  %8486 = vmatprep.subr.bf16.mxu0 %v12328_v28 }
 0x1e5   :  { %v3386_v41 = vsel %vm10670_vm6, %v6717_v53, %v3385_v37 }
 0x1e7   :  { %8458 = vmatpush3.bf16.msra.mxu1 %v8457_v61  ;;  %8488 = vmatpush3.bf16.msra.mxu0 %v8487_v14  ;;  %v3106_v61 = vsel %vm10704_vm9, %v6700_v31, %v3105_v17  ;;  %v3091_v14 = vld [vmem:[%s12166_s3] sm:$0xff]  ;;  %v3401_v17 = vcombine.low %v3382_v49, %v3386_v41  ;;  %v3136_v31 = vcombine.low %v3112_v58, %v3115_v34  ;;  %v6743_v34 = vld [vmem:[%s12171_s8 + $0x598] sm:$0xff] }
 0x1e8   :  { %8459 = vmatprep.subr.bf16.mxu1 %v12328_v28  ;;  %8489 = vmatprep.subr.bf16.mxu0 %v12328_v28  ;;  %v3135_v52 = vcombine.low %v3106_v61, %v3109_v19  ;;  %v6728_v58 = vld [vmem:[%s12171_s8 + $0x520] sm:$0xff] }
 0x1eb   :  { %8461 = vmatpush3.bf16.msra.mxu1 %v8460_v62  ;;  %8491 = vmatpush3.bf16.msra.mxu0 %v8490_v7  ;;  %v3400_v62 = vcombine.low %v3376_v59, %v3379_v50  ;;  %v3387_v7 = vrot.slane %v3385_v37, 4  ;;  %v3129_v59 = vrot.slane %v3127_v25, 4 }
 0x1ec   :  { %8462 = vmatprep.subr.bf16.mxu1 %v12328_v28  ;;  %8504 = vmatprep.subr.bf16.mxu0 %v12328_v28 }
 0x1ed   :  { %v3131_v19 = vsel %vm10704_vm9, %v3129_v59, %v3130_v2  ;;  %v6737_v59 = vld [vmem:[%s12171_s8 + $0x568] sm:$0xff] }
 0x1ee   :  { %7723 = vmatmul.mubr.f32.vlgmr.msra.gmra.mrb[14].mxu0 %v10347_v40  ;;  %v8493_v40 = vpack.c.bf16 %v6697_v27, %v6696_v33  ;;  %v3094_v33 = vld [vmem:[%s12166_s3 + $0x18] sm:$0xff]  ;;  %v3124_v27 = vrot.slane %v10717_v22, 5  ;;  %v6724_v22 = vld [vmem:[%s12171_s8 + $0x500] sm:$0xff] }
 0x1ef   :  { %8464 = vmatpush3.bf16.msra.mxu1 %v8463_v45  ;;  %8506 = vmatpush3.bf16.msra.mxu0 %v8505_v47  ;;  %v3391_v45 = vrot.slane %v12356_v11, 6  ;;  %v8499_v47 = vpack.c.bf16 %v3092_v8, %v3091_v14 }
 0x1f0   :  { %8465 = vmatprep.subr.bf16.mxu1 %v12328_v28  ;;  %8507 = vmatprep.subr.bf16.mxu0 %v12328_v28  ;;  %v3125_v0 = vsel %vm10704_vm9, %v3123_v51, %v3124_v27 }
 0x1f1   :  { %7779 = vmatprep.mubr.msk.f32.mxu0 %vm8860_vm2, %v12327_v24  ;;  %v3392_v48 = vsel %vm10670_vm6, %v3390_v29, %v3391_v45  ;;  %v3393_v9 = vrot.slane %v3391_v45, 4 }
 0x1f3   :  { %8467 = vmatpush3.bf16.msra.mxu1 %v8466_v10  ;;  %8509 = vmatpush3.bf16.msra.mxu0 %v8508_v15  ;;  %v3093_v10 = vld [vmem:[%s12166_s3 + $0x10] sm:$0xff]  ;;  %v3389_v15 = vsel %vm10670_vm6, %v3387_v7, %v3388_v16  ;;  %v3132_v16 = vrot.slane %v3130_v2, 4  ;;  %v6748_v2 = vld [vmem:[%s12171_s8 + $0x5c0] sm:$0xff] }
 0x1f4   :  { %8492 = vmatprep.subr.bf16.mxu1 %v12328_v28  ;;  %8510 = vmatprep.subr.bf16.mxu0 %v12328_v28  ;;  %v8502_v5 = vpack.c.bf16 %v3094_v33, %v3093_v10  ;;  %v3402_v55 = vcombine.low %v3389_v15, %v3392_v48  ;;  %v8538_v33 = vpack.c.bf16 %v6743_v34, %v6742_v23  ;;  %v6744_v15 = vld [vmem:[%s12171_s8 + $0x5a0] sm:$0xff] }
 0x1f6   :  { %7688 = vmatmul.mubr.f32.vlgmr.msra.gmra.mrb[8].mxu1 %v10350_v6  ;;  %7780 = vmatmul.mubr.msk.f32.vlgmr.msra.gmra.mrb[16].mxu0 %vm789_vm1, %v3399_v42  ;;  %v3394_v6 = vrot.slane %v10742_v13, 6  ;;  %v3126_v42 = vrot.slane %v3124_v27, 4  ;;  %v6726_v13 = vld [vmem:[%s12171_s8 + $0x510] sm:$0xff] }
 0x1f7   :  { %8494 = vmatpush3.bf16.msra.mxu1 %v8493_v40  ;;  %7733 = vmatprep.mubr.msk.f32.mxu1 %vm8860_vm2, %v12327_v24  ;;  %v3118_v40 = vsel %vm10704_vm9, %v3116_v56, %v3117_v44  ;;  %v6741_v44 = vld [vmem:[%s12171_s8 + $0x588] sm:$0xff]  ;;  %v6730_v27 = vld [vmem:[%s12171_s8 + $0x530] sm:$0xff] }
 0x1f8   :  { %8495 = vmatprep.subr.bf16.mxu1 %v12328_v28  ;;  %7782 = vmatprep.mubr.msk.f32.mxu0 %vm8860_vm2, %v12327_v24  ;;  %v3396_v12 = vrot.slane %v3394_v6, 4  ;;  %v3395_v3 = vsel %vm10670_vm6, %v3393_v9, %v3394_v6  ;;  %v3137_v53 = vcombine.low %v3118_v40, %v3122_v35  ;;  %v3128_v37 = vsel %vm10704_vm9, %v3126_v42, %v3127_v25  ;;  %v6727_v6 = vld [vmem:[%s12171_s8 + $0x518] sm:$0xff]  ;;  %v6729_v56 = vld [vmem:[%s12171_s8 + $0x528] sm:$0xff] }
 0x1f9   :  { %v3138_v61 = vcombine.low %v3125_v0, %v3128_v37  ;;  %v8517_v10 = vpack.c.bf16 %v6729_v56, %v6728_v58  ;;  %v6745_v9 = vld [vmem:[%s12171_s8 + $0x5a8] sm:$0xff]  ;;  %v6747_v35 = vld [vmem:[%s12171_s8 + $0x5b8] sm:$0xff]  ;;  %v6750_v0 = vld [vmem:[%s12171_s8 + $0x5d0] sm:$0xff] }
 0x1fa   :  { %7783 = vmatmul.mubr.msk.f32.gmra.mrb[18].mxu0 %vm789_vm1, %v3400_v62  ;;  %v3398_v20 = vsel %vm10670_vm6, %v3396_v12, %v3397_v54  ;;  %v8511_v62 = vpack.c.bf16 %v6725_v36, %v6724_v22  ;;  %v8541_v12 = vpack.c.bf16 %v6745_v9, %v6744_v15  ;;  %v6732_v54 = vld [vmem:[%s12171_s8 + $0x540] sm:$0xff]  ;;  %v6733_v40 = vld [vmem:[%s12171_s8 + $0x548] sm:$0xff]  ;;  %v6735_v42 = vld [vmem:[%s12171_s8 + $0x558] sm:$0xff] }
 0x1fb   :  { %8497 = vmatpush3.bf16.msra.mxu1 %v8496_v32  ;;  %7785 = vmatprep.mubr.msk.f32.mxu0 %vm8860_vm2, %v12327_v24  ;;  %v3403_v50 = vcombine.low %v3395_v3, %v3398_v20  ;;  %v3133_v32 = vrot.slane %v12357_v57, 5  ;;  %v6749_v20 = vld [vmem:[%s12171_s8 + $0x5c8] sm:$0xff]  ;;  %v6751_v37 = vld [vmem:[%s12171_s8 + $0x5d8] sm:$0xff] }
 0x1fc   :  { %8498 = vmatprep.subr.bf16.mxu1 %v12328_v28  ;;  %8512 = vmatpush3.bf16.msra.mxu0 %v8511_v62  ;;  %v12358_v56 = vld [vmem:[#allocation10_spill] sm:$0xff] }
 0x1fd   :  { %v3134_v14 = vsel %vm10704_vm9, %v3132_v16, %v3133_v32  ;;  %8513 = vmatprep.subr.bf16.mxu0 %v12328_v28 }
 0x1fe   :  { %7734 = vmatmul.mubr.msk.f32.vlgmr.msra.gmra.mrb[10].mxu1 %vm789_vm1, %v3135_v52  ;;  %7786 = vmatmul.mubr.msk.f32.gmra.mrb[20].mxu0 %vm789_vm1, %v3401_v17  ;;  %v3139_v8 = vcombine.low %v3131_v19, %v3134_v14  ;;  %v6740_v52 = vld [vmem:[%s12171_s8 + $0x580] sm:$0xff]  ;;  %v6731_v17 = vld [vmem:[%s12171_s8 + $0x538] sm:$0xff]  ;;  %v6738_v19 = vld [vmem:[%s12171_s8 + $0x570] sm:$0xff] }
 0x1ff   :  { %8500 = vmatpush3.bf16.msra.mxu1 %v8499_v47  ;;  %7736 = vmatprep.mubr.msk.f32.mxu1 %vm8860_vm2, %v12327_v24  ;;  %v8514_v47 = vpack.c.bf16 %v6727_v6, %v6726_v13  ;;  %v8535_v1 = vpack.c.bf16 %v6741_v44, %v6740_v52  ;;  %v8520_v48 = vpack.c.bf16 %v6731_v17, %v6730_v27  ;;  %v6739_v14 = vld [vmem:[%s12171_s8 + $0x578] sm:$0xff] }
 0x200   :  { %8501 = vmatprep.subr.bf16.mxu1 %v12328_v28  ;;  %7788 = vmatprep.mubr.msk.f32.mxu0 %vm8860_vm2, %v12327_v24 }
 0x201   :  { %8515 = vmatpush3.bf16.msra.mxu0 %v8514_v47 }
 0x202   :  { %7737 = vmatmul.mubr.msk.f32.gmra.mrb[12].mxu1 %vm789_vm1, %v3136_v31  ;;  %7789 = vmatmul.mubr.msk.f32.gmra.mrb[22].mxu0 %vm789_vm1, %v3402_v55  ;;  %v8523_v31 = vpack.c.bf16 %v6733_v40, %v6732_v54  ;;  %v6734_v55 = vld [vmem:[%s12171_s8 + $0x550] sm:$0xff] }
 0x203   :  { %7739 = vmatprep.mubr.msk.f32.mxu1 %vm8860_vm2, %v12327_v24  ;;  %8503 = vmatpush3.bf16.msra.mxu1 %v8502_v5  ;;  %v6746_v5 = vld [vmem:[%s12171_s8 + $0x5b0] sm:$0xff]  ;;  %v8526_v3 = vpack.c.bf16 %v6735_v42, %v6734_v55 }
 0x204   :  { %7791 = vmatprep.mubr.msk.f32.mxu0 %vm8860_vm2, %v12327_v24  ;;  %8534 = vmatprep.subr.bf16.mxu1 %v12328_v28  ;;  %v8544_v51 = vpack.c.bf16 %v6747_v35, %v6746_v5  ;;  %v10976_v5 = vld [vmem:[%s12169_s6] ss:$0 sm:$0xff] }
 0x205   :  { %8516 = vmatprep.subr.bf16.mxu0 %v12328_v28  ;;  %v10980_v55 = vcombine.high %v10976_v5, %v10976_v5 }
 0x206   :  { %7740 = vmatmul.mubr.msk.f32.gmra.mrb[14].mxu1 %vm789_vm1, %v3137_v53  ;;  %7792 = vmatmul.mubr.msk.f32.gmra.mrb[24].mxu0 %vm789_vm1, %v3403_v50  ;;  %v6736_v53 = vld [vmem:[%s12171_s8 + $0x560] sm:$0xff]  ;;  %v8547_v50 = vpack.c.bf16 %v6749_v20, %v6748_v2 }
 0x207   :  { %7742 = vmatprep.mubr.msk.f32.mxu1 %vm8860_vm2, %v12327_v24  ;;  %7826 = vmatprep.mubr.msk.f32.mxu0 %vm8860_vm2, %v12327_v24  ;;  %v8529_v16 = vpack.c.bf16 %v6737_v59, %v6736_v53  ;;  %v10986_v59 = vld [vmem:[%s12171_s8 + $0x600] sm:$0xff] }
 0x208   :  { %8518 = vmatpush3.bf16.msra.mxu0 %v8517_v10  ;;  %v12361_v10 = vld [vmem:[#allocation13_spill] sm:$0xff] }
 0x209   :  { %8519 = vmatprep.subr.bf16.mxu0 %v12328_v28 }
 0x20a   :  { %7743 = vmatmul.mubr.msk.f32.gmra.mrb[16].mxu1 %vm789_vm1, %v3138_v61  ;;  %v8550_v61 = vpack.c.bf16 %v6751_v37, %v6750_v0 }
 0x20b   :  { %7745 = vmatprep.mubr.msk.f32.mxu1 %vm8860_vm2, %v12327_v24 }
 0x20c   :  { %8521 = vmatpush3.bf16.msra.mxu0 %v8520_v48 }
 0x20d   :  { %8522 = vmatprep.subr.bf16.mxu0 %v12328_v28 }
 0x20e   :  { %7746 = vmatmul.mubr.msk.f32.gmra.mrb[18].mxu1 %vm789_vm1, %v3139_v8 }
 0x20f   :  { %7756 = vmatprep.mubr.msk.f32.mxu1 %vm8860_vm2, %v12327_v24 }
 0x210   :  { %8524 = vmatpush3.bf16.msra.mxu0 %v8523_v31 }
 0x211   :  { %8525 = vmatprep.subr.bf16.mxu0 %v12328_v28 }
 0x212   :  { %7757 = vmatmul.mubr.msk.f32.vlgmr.msra.gmra.mrb[10].mxu1 %vm789_vm1, %v3240_v39 }
 0x213   :  { %7759 = vmatprep.mubr.msk.f32.mxu1 %vm8860_vm2, %v12327_v24  ;;  %8536 = vmatpush3.bf16.msra.mxu1 %v8535_v1  ;;  %v12359_v1 = vld [vmem:[#allocation12_spill] sm:$0xff] }
 0x214   :  { %8537 = vmatprep.subr.bf16.mxu1 %v12328_v28  ;;  %8527 = vmatpush3.bf16.msra.mxu0 %v8526_v3  ;;  %v12360_v23 = vcombine.low %v12358_v56, %v12359_v1 }
 0x215   :  { %8528 = vmatprep.subr.bf16.mxu0 %v12328_v28 }
 0x216   :  { %7760 = vmatmul.mubr.msk.f32.gmra.mrb[12].mxu1 %vm789_vm1, %v3241_v21  ;;  %v6752_v21 = vld [vmem:[%s12171_s8 + $0x5e0] sm:$0xff]  ;;  %v10959_v34 = vrot.slane %v12360_v23, %v9021_v26 }
 0x217   :  { %7762 = vmatprep.mubr.msk.f32.mxu1 %vm8860_vm2, %v12327_v24  ;;  %8539 = vmatpush3.bf16.msra.mxu1 %v8538_v33  ;;  %v12362_v33 = vld [vmem:[#allocation30_spill] sm:$0xff] }
 0x218   :  { %8540 = vmatprep.subr.bf16.mxu1 %v12328_v28  ;;  %8530 = vmatpush3.bf16.msra.mxu0 %v8529_v16  ;;  %v12363_v27 = vcombine.low %v12361_v10, %v12362_v33 }
 0x219   :  { %8531 = vmatprep.subr.bf16.mxu0 %v12328_v28 }
 0x21a   :  { %7763 = vmatmul.mubr.msk.f32.gmra.mrb[14].mxu1 %vm789_vm1, %v3242_v30  ;;  %v6753_v30 = vld [vmem:[%s12171_s8 + $0x5e8] sm:$0xff]  ;;  %v10965_v17 = vrot.slane %v12363_v27, %v9021_v26 }
 0x21b   :  { %7765 = vmatprep.mubr.msk.f32.mxu1 %vm8860_vm2, %v12327_v24  ;;  %8542 = vmatpush3.bf16.msra.mxu1 %v8541_v12 }
 0x21c   :  { %8543 = vmatprep.subr.bf16.mxu1 %v12328_v28  ;;  %v4795_v9 = vcombine.low %v10959_v34, %v10965_v17  ;;  %v12384_v34 = vld [vmem:[#allocation27_spill] sm:$0xff]  ;;  %v12385_v17 = vld [vmem:[#allocation16_spill] sm:$0xff] }
 0x21e   :  { %7766 = vmatmul.mubr.msk.f32.gmra.mrb[16].mxu1 %vm789_vm1, %v3243_v4 }
 0x21f   :  { %7768 = vmatprep.mubr.msk.f32.mxu1 %vm8860_vm2, %v12327_v24  ;;  %8545 = vmatpush3.bf16.msra.mxu1 %v8544_v51 }
 0x220   :  { %8546 = vmatprep.subr.bf16.mxu1 %v12328_v28 }
 0x222   :  { %7769 = vmatmul.mubr.msk.f32.gmra.mrb[18].mxu1 %vm789_vm1, %v3244_v43  ;;  %v8532_v43 = vpack.c.bf16 %v6739_v14, %v6738_v19  ;;  %v10998_v19 = vld [vmem:[%s12171_s8 + $0x610] sm:$0xff]  ;;  %v11003_v14 = vld [vmem:[%s12171_s8 + $0x618] sm:$0xff] }
 0x223   :  { %7861 = vmatprep.mubr.msk.f32.mxu1 %vm8860_vm2, %v12327_v24  ;;  %8548 = vmatpush3.bf16.msra.mxu1 %v8547_v50 }
 0x224   :  { %8549 = vmatprep.subr.bf16.mxu1 %v12328_v28  ;;  %8533 = vmatpush3.bf16.msra.mxu0 %v8532_v43 }
 0x225   :  { %8558 = vmatprep.subr.bf16.mxu0 %v12328_v28 }
 0x227   :  { %8551 = vmatpush3.bf16.msra.mxu1 %v8550_v61  ;;  %v10993_v61 = vld [vmem:[%s12171_s8 + $0x608] sm:$0xff] }
 0x228   :  { %8552 = vmatprep.subr.bf16.mxu1 %v12328_v28 }
 0x23c   :  { %v1951_v60 = vpop.f32.mrb[6].mxu0 }
 0x23d   :  { %v7444_v18 = vpop.f32.mrb[7].mxu0 }
 0x23e   :  { %v6754_v18 = vld [vmem:[%s12171_s8 + $0x5f0] sm:$0xff] }
 0x245   :  { %v1877_v46 = vpop.f32.mrb[0].mxu1 }
 0x246   :  { %v1952_v38 = vadd.f32 %v1951_v60, %v1877_v46  ;;  %v7409_v63 = vpop.f32.mrb[1].mxu1  ;;  %v8553_v60 = vpack.c.bf16 %v6753_v30, %v6752_v21  ;;  %v6755_v46 = vld [vmem:[%s12171_s8 + $0x5f8] sm:$0xff] }
 0x248   :  { %8554 = vmatpush3.bf16.msra.mxu1 %v8553_v60 }
 0x249   :  { %8555 = vmatprep.subr.bf16.mxu1 %v12328_v28 }
 0x261   :  { %v2234_v49 = vpop.f32.mrb[8].mxu0 }
 0x262   :  { %v7514_v7 = vpop.f32.mrb[9].mxu0 }
 0x269   :  { %v2092_v41 = vpop.f32.mrb[2].mxu1 }
 0x26a   :  { %v2096_v29 = vadd.f32 %v2092_v41, %v1952_v38  ;;  %v7479_v11 = vpop.f32.mrb[3].mxu1  ;;  %v8556_v38 = vpack.c.bf16 %v6755_v46, %v6754_v18  ;;  %v8559_v18 = vpack.c.bf16 %v10993_v61, %v10986_v59  ;;  %v8562_v46 = vpack.c.bf16 %v11003_v14, %v10998_v19  ;;  %v6774_v59 = vld [vmem:[%s12171_s8 + $0x690] sm:$0xff]  ;;  %v6775_v61 = vld [vmem:[%s12171_s8 + $0x698] sm:$0xff]  ;;  %v6776_v14 = vld [vmem:[%s12171_s8 + $0x6a0] sm:$0xff] }
 0x26b   :  { %v6763_v19 = vld [vmem:[%s12171_s8 + $0x638] sm:$0xff] }
 0x26c   :  { %v2238_v45 = vadd.f32 %v2234_v49, %v2096_v29  ;;  %8557 = vmatpush3.bf16.msra.mxu1 %v8556_v38 }
 0x26d   :  { %8582 = vmatprep.subr.bf16.mxu1 %v12328_v28 }
 0x281   :  { %v2518_v57 = vpop.f32.mrb[10].mxu0 }
 0x282   :  { %v7584_v25 = vpop.f32.mrb[11].mxu0 }
 0x289   :  { %v2376_v32 = vpop.f32.mrb[4].mxu1 }
 0x28a   :  { %v2380_v8 = vadd.f32 %v2376_v32, %v2238_v45  ;;  %v7549_v39 = vpop.f32.mrb[5].mxu1 }
 0x28c   :  { %v2522_v4 = vadd.f32 %v2518_v57, %v2380_v8 }
 0x2a1   :  { %v2802_v63 = vpop.f32.mrb[12].mxu0 }
 0x2a2   :  { %v7654_v22 = vpop.f32.mrb[13].mxu0 }
 0x2a9   :  { %v2660_v36 = vpop.f32.mrb[6].mxu1 }
 0x2aa   :  { %v2664_v62 = vadd.f32 %v2660_v36, %v2522_v4  ;;  %v7619_v49 = vpop.f32.mrb[7].mxu1 }
 0x2ac   :  { %v2806_v7 = vadd.f32 %v2802_v63, %v2664_v62 }
 0x2c1   :  { %v3086_v41 = vpop.f32.mrb[14].mxu0 }
 0x2c2   :  { %v7724_v29 = vpop.f32.mrb[15].mxu0 }
 0x2c9   :  { %v2944_v11 = vpop.f32.mrb[8].mxu1  ;;  %v3480_v45 = vpop.f32.mrb[16].mxu0 }
 0x2ca   :  { %v2948_v13 = vadd.f32 %v2944_v11, %v2806_v7  ;;  %v7689_v6 = vpop.f32.mrb[9].mxu1  ;;  %v7781_v52 = vpop.f32.mrb[17].mxu0  ;;  %v3509_v25 = vcombine.high %v3480_v45, %v3480_v45 }
 0x2cb   :  { %v11020_v52 = vld [vmem:[%s12171_s8 + $0x680] sm:$0xff] }
 0x2cc   :  { %v10953_v47 = vadd.f32 %v3086_v41, %v2948_v13 }
 0x2cd   :  { %v3485_v44 = vpop.f32.mrb[18].mxu0 }
 0x2ce   :  { %v7784_v58 = vpop.f32.mrb[19].mxu0  ;;  %v3510_v20 = vcombine.high %v3485_v44, %v3485_v44 }
 0x2d1   :  { %v3490_v15 = vpop.f32.mrb[20].mxu0 }
 0x2d2   :  { %v7787_v48 = vpop.f32.mrb[21].mxu0  ;;  %v3511_v43 = vcombine.high %v3490_v15, %v3490_v15 }
 0x2d5   :  { %v10969_v12 = vpop.f32.mrb[22].mxu0 }
 0x2d6   :  { %v7790_v57 = vpop.f32.mrb[23].mxu0  ;;  %v3512_v6 = vcombine.high %v10969_v12, %v10969_v12 }
 0x2d9   :  { %v10971_v54 = vpop.f32.mrb[24].mxu0 }
 0x2da   :  { %v7793_v40 = vpop.f32.mrb[25].mxu0 }
 0x2e5   :  { %v3321_v31 = vpop.f32.mrb[10].mxu1 }
 0x2e6   :  { %v3350_v35 = vcombine.high %v3321_v31, %v3321_v31  ;;  %v3519_v51 = vadd.f32 %v3480_v45, %v3321_v31  ;;  %v7758_v42 = vpop.f32.mrb[11].mxu1 }
 0x2e8   :  { %v3520_v2 = vadd.f32 %v3509_v25, %v3350_v35  ;;  %v3538_v3 = vadd.f32 %v10976_v5, %v3519_v51 }
 0x2e9   :  { %v3326_v53 = vpop.f32.mrb[12].mxu1 }
 0x2ea   :  { %v3539_v50 = vadd.f32 %v10980_v55, %v3520_v2  ;;  %v3548_v0 = vsel %vm3100_vm7, %v3538_v3, -inf  ;;  %v3351_v37 = vcombine.high %v3326_v53, %v3326_v53  ;;  %v3521_v16 = vadd.f32 %v3485_v44, %v3326_v53  ;;  %v7761_v32 = vpop.f32.mrb[13].mxu1  ;;  %v11025_v44 = vld [vmem:[%s12171_s8 + $0x688] sm:$0xff] }
 0x2eb   :  { %v3549_v8 = vrot.slane %v3548_v0, 4  ;;  %v8583_v35 = vpack.c.bf16 %v11025_v44, %v11020_v52 }
 0x2ec   :  { %v3658_v39 = vcombine.low %v3538_v3, %v3539_v50  ;;  %v3522_v21 = vadd.f32 %v3510_v20, %v3351_v37  ;;  %v3540_v30 = vadd.f32 %v10976_v5, %v3521_v16  ;;  %v3513_v37 = vcombine.high %v10971_v54, %v10971_v54 }
 0x2ed   :  { %v3550_v4 = vmax.f32 %v3548_v0, %v3549_v8  ;;  %v3331_v60 = vpop.f32.mrb[14].mxu1 }
 0x2ee   :  { %v3663_v38 = vsel %vm3662_vm10, %v3658_v39, -inf  ;;  %v3541_v63 = vadd.f32 %v10980_v55, %v3522_v21  ;;  %v3771_v22 = vcombine.low %v3539_v50, %v3540_v30  ;;  %v3883_v36 = vsel %vm3882_vm11, %v3540_v30, -inf  ;;  %v7764_v62 = vpop.f32.mrb[15].mxu1 }
 0x2ef   :  { %v3551_v49 = vrot.slane %v3550_v4, 2  ;;  %v3664_v7 = vrot.slane %v3663_v38, 4  ;;  %v3884_v41 = vrot.slane %v3883_v36, 4  ;;  %v3352_v29 = vcombine.high %v3331_v60, %v3331_v60 }
 0x2f0   :  { %v3776_v11 = vsel %vm3775_vm12, %v3771_v22, -inf  ;;  %v3989_v45 = vsel %vm3100_vm7, %v3541_v63, -inf  ;;  %v3523_v13 = vadd.f32 %v3490_v15, %v3331_v60 }
 0x2f1   :  { %v3552_v58 = vmax.f32 %v3550_v4, %v3551_v49  ;;  %v3665_v56 = vmax.f32 %v3663_v38, %v3664_v7  ;;  %v3777_v1 = vrot.slane %v3776_v11, 4  ;;  %v3885_v23 = vmax.f32 %v3883_v36, %v3884_v41  ;;  %v3336_v10 = vpop.f32.mrb[16].mxu1 }
 0x2f2   :  { %v3990_v33 = vrot.slane %v3989_v45, 4  ;;  %v3524_v27 = vadd.f32 %v3511_v43, %v3352_v29  ;;  %v3542_v15 = vadd.f32 %v10976_v5, %v3523_v13  ;;  %v3353_v48 = vcombine.high %v3336_v10, %v3336_v10  ;;  %v7767_v57 = vpop.f32.mrb[17].mxu1 }
 0x2f3   :  { %v3666_v40 = vrot.slane %v3665_v56, 2  ;;  %v3778_v25 = vmax.f32 %v3776_v11, %v3777_v1  ;;  %v3886_v31 = vrot.slane %v3885_v23, 2  ;;  %v3525_v3 = vadd.f32 %v10969_v12, %v3336_v10 }
 0x2f4   :  { %v11030_v51 = vmax.f32 %v3989_v45, %v3990_v33  ;;  %v3543_v42 = vadd.f32 %v10976_v5, %v3524_v27  ;;  %v4099_v2 = vcombine.low %v3541_v63, %v3542_v15  ;;  %v3553_v20 = vrot.slane %v3552_v58, 1 }
 0x2f5   :  { %v11034_v53 = vmax.f32 %v3665_v56, %v3666_v40  ;;  %v3526_v50 = vadd.f32 %v3512_v6, %v3353_v48  ;;  %v3341_v0 = vpop.f32.mrb[18].mxu1  ;;  %v3779_v16 = vrot.slane %v3778_v25, 2  ;;  %v3544_v39 = vadd.f32 %v10980_v55, %v3525_v3 }
 0x2f6   :  { %v3555_v32 = vsel %vm3100_vm7, %v3543_v42, -inf  ;;  %v4103_v8 = vsel %vm3662_vm10, %v4099_v2, -inf  ;;  %v7770_v21 = vpop.f32.mrb[19].mxu1  ;;  %v3354_v43 = vcombine.high %v3341_v0, %v3341_v0  ;;  %v3887_v60 = vmax.f32 %v3885_v23, %v3886_v31 }
 0x2f7   :  { %v3556_v30 = vrot.slane %v3555_v32, 4  ;;  %v4104_v4 = vrot.slane %v4103_v8, 4  ;;  %v3545_v12 = vadd.f32 %v10976_v5, %v3526_v50  ;;  %v3992_v38 = vrot.slane %v11030_v51, 2 }
 0x2f8   :  { %v3659_v63 = vcombine.low %v3543_v42, %v3544_v39  ;;  %v3527_v22 = vadd.f32 %v10971_v54, %v3341_v0  ;;  %v3554_v7 = vmax.f32 %v3552_v58, %v3553_v20  ;;  %v3528_v11 = vadd.f32 %v3513_v37, %v3354_v43 }
 0x2f9   :  { %v3557_v36 = vmax.f32 %v3555_v32, %v3556_v30  ;;  %v3772_v62 = vcombine.low %v3544_v39, %v3545_v12  ;;  %v3890_v49 = vsel %vm3882_vm11, %v3545_v12, -inf  ;;  %v4105_v6 = vmax.f32 %v4103_v8, %v4104_v4 }
 0x2fa   :  { %v3670_v41 = vsel %vm3662_vm10, %v3659_v63, -inf  ;;  %v3891_v29 = vrot.slane %v3890_v49, 4  ;;  %v3546_v45 = vadd.f32 %v10980_v55, %v3527_v22  ;;  %v3547_v54 = vadd.f32 %v10976_v5, %v3528_v11 }
 0x2fb   :  { %v3558_v13 = vrot.slane %v3557_v36, 2  ;;  %v3671_v56 = vrot.slane %v3670_v41, 4  ;;  %v3783_v1 = vsel %vm3775_vm12, %v3772_v62, -inf  ;;  %v3668_v48 = vrot.slane %v11034_v53, 1 }
 0x2fc   :  { %v3784_v23 = vrot.slane %v3783_v1, 4  ;;  %v3892_v10 = vmax.f32 %v3890_v49, %v3891_v29  ;;  %v3996_v33 = vsel %vm3100_vm7, %v3546_v45, -inf  ;;  %v4100_v31 = vcombine.low %v3546_v45, %v3547_v54  ;;  %v6760_v45 = vld [vmem:[%s12171_s8 + $0x620] sm:$0xff] }
 0x2fd   :  { %v3559_v27 = vmax.f32 %v3557_v36, %v3558_v13  ;;  %v3672_v15 = vmax.f32 %v3670_v41, %v3671_v56  ;;  %v3997_v58 = vrot.slane %v3996_v33, 4  ;;  %v3780_v55 = vmax.f32 %v3778_v25, %v3779_v16 }
 0x2fe   :  { %v3785_v57 = vmax.f32 %v3783_v1, %v3784_v23  ;;  %v3893_v40 = vrot.slane %v3892_v10, 2  ;;  %v3888_v20 = vrot.slane %v3887_v60, 1  ;;  %v4106_v50 = vrot.slane %v4105_v6, 2 }
 0x2ff   :  { %v3673_v42 = vrot.slane %v3672_v15, 2  ;;  %v3998_v2 = vmax.f32 %v3996_v33, %v3997_v58  ;;  %v3560_v3 = vrot.slane %v3559_v27, 1  ;;  %v4110_v37 = vsel %vm3662_vm10, %v4100_v31, -inf }
 0x300   :  { %v3786_v0 = vrot.slane %v3785_v57, 2  ;;  %v3894_v5 = vmax.f32 %v3892_v10, %v3893_v40  ;;  %v4111_v39 = vrot.slane %v4110_v37, 4  ;;  %v3781_v30 = vrot.slane %v3780_v55, 1  ;;  %v6764_v40 = vld [vmem:[%s12171_s8 + $0x640] sm:$0xff] }
 0x301   :  { %v3674_v32 = vmax.f32 %v3672_v15, %v3673_v42  ;;  %v3999_v8 = vrot.slane %v3998_v2, 2  ;;  %v3561_v21 = vmax.f32 %v3559_v27, %v3560_v3  ;;  %v3889_v12 = vmax.f32 %v3887_v60, %v3888_v20  ;;  %v6762_v15 = vld [vmem:[%s12171_s8 + $0x630] sm:$0xff] }
 0x302   :  { %v3787_v4 = vmax.f32 %v3785_v57, %v3786_v0  ;;  %v3895_v43 = vrot.slane %v3894_v5, 1  ;;  %v4112_v22 = vmax.f32 %v4110_v37, %v4111_v39  ;;  %v3993_v49 = vmax.f32 %v11030_v51, %v3992_v38  ;;  %v6761_v51 = vld [vmem:[%s12171_s8 + $0x628] sm:$0xff]  ;;  %v6778_v42 = vld [vmem:[%s12171_s8 + $0x6b0] sm:$0xff]  ;;  %v6767_v0 = vld [vmem:[%s12171_s8 + $0x658] sm:$0xff] }
 0x303   :  { %v4000_v63 = vmax.f32 %v3998_v2, %v3999_v8  ;;  %v3581_v25 = vsel %vm1808_vm4, %v3561_v21, %v3554_v7  ;;  %v3675_v16 = vrot.slane %v3674_v32, 1  ;;  %v4107_v41 = vmax.f32 %v4105_v6, %v4106_v50  ;;  %v6779_v2 = vld [vmem:[%s12171_s8 + $0x6b8] sm:$0xff]  ;;  %v6766_v50 = vld [vmem:[%s12171_s8 + $0x650] sm:$0xff]  ;;  %v6780_v37 = vld [vmem:[%s12171_s8 + $0x6c0] sm:$0xff] }
 0x304   :  { %7827 = vmatmul.mubr.f32.vlgmr.msra.gmra.mrb[26].mxu0 %v3581_v25  ;;  %v3788_v36 = vrot.slane %v3787_v4, 1  ;;  %v3896_v62 = vmax.f32 %v3894_v5, %v3895_v43  ;;  %v4113_v29 = vrot.slane %v4112_v22, 2  ;;  %v3669_v11 = vmax.f32 %v11034_v53, %v3668_v48  ;;  %v6781_v5 = vld [vmem:[%s12171_s8 + $0x6c8] sm:$0xff]  ;;  %v6768_v39 = vld [vmem:[%s12171_s8 + $0x660] sm:$0xff] }
 0x305   :  { %8560 = vmatpush3.bf16.msra.mxu0 %v8559_v18  ;;  %v3676_v60 = vmax.f32 %v3674_v32, %v3675_v16  ;;  %7896 = vmatprep.mubr.msk.f32.mxu0 %vm8860_vm2, %v12327_v24  ;;  %v4001_v7 = vrot.slane %v4000_v63, 1  ;;  %v3782_v18 = vmax.f32 %v3780_v55, %v3781_v30  ;;  %v3994_v13 = vrot.slane %v3993_v49, 1  ;;  %v6765_v55 = vld [vmem:[%s12171_s8 + $0x648] sm:$0xff]  ;;  %v6782_v30 = vld [vmem:[%s12171_s8 + $0x6d0] sm:$0xff]  ;;  %v6784_v25 = vld [vmem:[%s12171_s8 + $0x6e0] sm:$0xff] }
 0x306   :  { %8561 = vmatprep.subr.bf16.mxu0 %v12328_v28  ;;  %v3789_v53 = vmax.f32 %v3787_v4, %v3788_v36  ;;  %v11074_v38 = vsel %vm1808_vm4, %v3896_v62, %v3889_v12  ;;  %v4108_v1 = vrot.slane %v4107_v41, 1  ;;  %v4114_v23 = vmax.f32 %v4112_v22, %v4113_v29  ;;  %v6769_v21 = vld [vmem:[%s12171_s8 + $0x668] sm:$0xff]  ;;  %v6783_v4 = vld [vmem:[%s12171_s8 + $0x6d8] sm:$0xff]  ;;  %v6788_v29 = vld [vmem:[%s12171_s8 + $0x700] sm:$0xff] }
 0x307   :  { %v3696_v6 = vsel %vm1808_vm4, %v3676_v60, %v3669_v11  ;;  %v4002_v56 = vmax.f32 %v4000_v63, %v4001_v7  ;;  %v3995_v54 = vmax.f32 %v3993_v49, %v3994_v13  ;;  %v8565_v33 = vpack.c.bf16 %v6761_v51, %v6760_v45  ;;  %v6770_v63 = vld [vmem:[%s12171_s8 + $0x670] sm:$0xff]  ;;  %v6771_v22 = vld [vmem:[%s12171_s8 + $0x678] sm:$0xff]  ;;  %v6785_v16 = vld [vmem:[%s12171_s8 + $0x6e8] sm:$0xff] }
 0x308   :  { %7862 = vmatmul.mubr.f32.vlgmr.msra.gmra.mrb[20].mxu1 %v3696_v6  ;;  %v11078_v10 = vsel %vm1808_vm4, %v3789_v53, %v3782_v18  ;;  %v8586_v27 = vpack.c.bf16 %v6775_v61, %v6774_v59  ;;  %v4115_v58 = vrot.slane %v4114_v23, 1  ;;  %v4109_v44 = vmax.f32 %v4107_v41, %v4108_v1  ;;  %v6786_v49 = vld [vmem:[%s12171_s8 + $0x6f0] sm:$0xff]  ;;  %v6787_v41 = vld [vmem:[%s12171_s8 + $0x6f8] sm:$0xff]  ;;  %v6789_v11 = vld [vmem:[%s12171_s8 + $0x708] sm:$0xff] }
 0x309   :  { %8563 = vmatpush3.bf16.msra.mxu0 %v8562_v46  ;;  %8584 = vmatpush3.bf16.msra.mxu1 %v8583_v35  ;;  %v6777_v46 = vld [vmem:[%s12171_s8 + $0x6a8] sm:$0xff]  ;;  %v11101_v52 = vsel %vm1808_vm4, %v4002_v56, %v3995_v54  ;;  %v8568_v48 = vpack.c.bf16 %v6763_v19, %v6762_v15  ;;  %v8571_v3 = vpack.c.bf16 %v6765_v55, %v6764_v40  ;;  %v6790_v7 = vld [vmem:[%s12171_s8 + $0x710] sm:$0xff]  ;;  %v6791_v51 = vld [vmem:[%s12171_s8 + $0x718] sm:$0xff] }
 0x30a   :  { %8564 = vmatprep.subr.bf16.mxu0 %v12328_v28  ;;  %8585 = vmatprep.subr.bf16.mxu1 %v12328_v28  ;;  %v4116_v35 = vmax.f32 %v4114_v23, %v4115_v58  ;;  %v8589_v57 = vpack.c.bf16 %v6777_v46, %v6776_v14  ;;  %v8592_v20 = vpack.c.bf16 %v6779_v2, %v6778_v42  ;;  %v6804_v59 = vld [vmem:[%s12171_s8 + $0x780] sm:$0xff]  ;;  %v6805_v61 = vld [vmem:[%s12171_s8 + $0x788] sm:$0xff]  ;;  %v6806_v56 = vld [vmem:[%s12171_s8 + $0x790] sm:$0xff] }
 0x30b   :  { %7931 = vmatprep.mubr.msk.f32.mxu1 %vm8860_vm2, %v12327_v24  ;;  %v8574_v32 = vpack.c.bf16 %v6767_v0, %v6766_v50  ;;  %v8595_v8 = vpack.c.bf16 %v6781_v5, %v6780_v37  ;;  %v8577_v12 = vpack.c.bf16 %v6769_v21, %v6768_v39  ;;  %v8598_v43 = vpack.c.bf16 %v6783_v4, %v6782_v30  ;;  %v6792_v13 = vld [vmem:[%s12171_s8 + $0x720] sm:$0xff]  ;;  %v6793_v6 = vld [vmem:[%s12171_s8 + $0x728] sm:$0xff]  ;;  %v6807_v1 = vld [vmem:[%s12171_s8 + $0x798] sm:$0xff] }
 0x30c   :  { %v11109_v31 = vsel %vm1808_vm4, %v4116_v35, %v4109_v44  ;;  %v8580_v36 = vpack.c.bf16 %v6771_v22, %v6770_v63  ;;  %v8601_v62 = vpack.c.bf16 %v6785_v16, %v6784_v25  ;;  %v8604_v60 = vpack.c.bf16 %v6787_v41, %v6786_v49  ;;  %v6794_v54 = vld [vmem:[%s12171_s8 + $0x730] sm:$0xff]  ;;  %v6796_v19 = vld [vmem:[%s12171_s8 + $0x740] sm:$0xff]  ;;  %v6797_v14 = vld [vmem:[%s12171_s8 + $0x748] sm:$0xff] }
 0x30d   :  { %8566 = vmatpush3.bf16.msra.mxu0 %v8565_v33  ;;  %8587 = vmatpush3.bf16.msra.mxu1 %v8586_v27  ;;  %v8607_v45 = vpack.c.bf16 %v6789_v11, %v6788_v29  ;;  %v8610_v18 = vpack.c.bf16 %v6791_v51, %v6790_v7  ;;  %v8631_v53 = vpack.c.bf16 %v6805_v61, %v6804_v59  ;;  %v6795_v33 = vld [vmem:[%s12171_s8 + $0x738] sm:$0xff]  ;;  %v6809_v27 = vld [vmem:[%s12171_s8 + $0x7a8] sm:$0xff]  ;;  %v6810_v46 = vld [vmem:[%s12171_s8 + $0x7b0] sm:$0xff] }
 0x30e   :  { %8567 = vmatprep.subr.bf16.mxu0 %v12328_v28  ;;  %8588 = vmatprep.subr.bf16.mxu1 %v12328_v28  ;;  %v8613_v23 = vpack.c.bf16 %v6793_v6, %v6792_v13  ;;  %v8616_v15 = vpack.c.bf16 %v6795_v33, %v6794_v54  ;;  %v6811_v44 = vld [vmem:[%s12171_s8 + $0x7b8] sm:$0xff]  ;;  %v8619_v35 = vpack.c.bf16 %v6797_v14, %v6796_v19  ;;  %v6812_v55 = vld [vmem:[%s12171_s8 + $0x7c0] sm:$0xff]  ;;  %v6813_v42 = vld [vmem:[%s12171_s8 + $0x7c8] sm:$0xff] }
 0x30f   :  { %v6799_v40 = vld [vmem:[%s12171_s8 + $0x758] sm:$0xff]  ;;  %v6801_v50 = vld [vmem:[%s12171_s8 + $0x768] sm:$0xff]  ;;  %v6814_v0 = vld [vmem:[%s12171_s8 + $0x7d0] sm:$0xff] }
 0x310   :  { %v6815_v37 = vld [vmem:[%s12171_s8 + $0x7d8] sm:$0xff]  ;;  %v6816_v21 = vld [vmem:[%s12171_s8 + $0x7e0] sm:$0xff]  ;;  %v6817_v30 = vld [vmem:[%s12171_s8 + $0x7e8] sm:$0xff] }
 0x311   :  { %8569 = vmatpush3.bf16.msra.mxu0 %v8568_v48  ;;  %8590 = vmatpush3.bf16.msra.mxu1 %v8589_v57  ;;  %v8640_v48 = vpack.c.bf16 %v6811_v44, %v6810_v46  ;;  %v6798_v57 = vld [vmem:[%s12171_s8 + $0x750] sm:$0xff]  ;;  %v6803_v39 = vld [vmem:[%s12171_s8 + $0x778] sm:$0xff]  ;;  %v6820_v22 = vld [vmem:[%s12167_s4 + $0x20] sm:$0xff] }
 0x312   :  { %8570 = vmatprep.subr.bf16.mxu0 %v12328_v28  ;;  %8591 = vmatprep.subr.bf16.mxu1 %v12328_v28  ;;  %v8622_v2 = vpack.c.bf16 %v6799_v40, %v6798_v57  ;;  %v6819_v63 = vld [vmem:[%s12171_s8 + $0x7f8] sm:$0xff]  ;;  %v6821_v25 = vld [vmem:[%s12167_s4 + $0x28] sm:$0xff]  ;;  %v6822_v29 = vld [vmem:[%s12167_s4 + $0x30] sm:$0xff] }
 0x313   :  { %v12364_v16 = vld [vmem:[#allocation29_spill] sm:$0xff]  ;;  %v8655_v41 = vpack.c.bf16 %v6821_v25, %v6820_v22  ;;  %v12366_v51 = vld [vmem:[#allocation36_spill] sm:$0xff]  ;;  %v4209_v6 = vld [vmem:[%s12167_s4] sm:$0xff] }
 0x314   :  { %v6823_v11 = vld [vmem:[%s12167_s4 + $0x38] sm:$0xff]  ;;  %v6836_v13 = vld [vmem:[%s12167_s4 + $0x50] sm:$0xff] }
 0x315   :  { %8572 = vmatpush3.bf16.msra.mxu0 %v8571_v3  ;;  %8593 = vmatpush3.bf16.msra.mxu1 %v8592_v20  ;;  %v8643_v3 = vpack.c.bf16 %v6813_v42, %v6812_v55  ;;  %v6800_v20 = vld [vmem:[%s12171_s8 + $0x760] sm:$0xff]  ;;  %v12367_v59 = vld [vmem:[#allocation17_spill] sm:$0xff]  ;;  %v12371_v33 = vld [vmem:[#allocation40_spill] sm:$0xff] }
 0x316   :  { %8573 = vmatprep.subr.bf16.mxu0 %v12328_v28  ;;  %8594 = vmatprep.subr.bf16.mxu1 %v12328_v28  ;;  %v8625_v5 = vpack.c.bf16 %v6801_v50, %v6800_v20  ;;  %v4813_v61 = vcombine.low %v12367_v59, %v12366_v51  ;;  %v12370_v54 = vld [vmem:[#allocation49_spill] sm:$0xff]  ;;  %v12374_v19 = vld [vmem:[#allocation34_spill] sm:$0xff]  ;;  %v12375_v55 = vld [vmem:[#allocation43_spill] sm:$0xff] }
 0x317   :  { %v12376_v42 = vld [vmem:[#allocation39_spill] sm:$0xff]  ;;  %v12378_v20 = vld [vmem:[#allocation44_spill] sm:$0xff]  ;;  %v6846_v25 = vld [vmem:[%s12167_s4 + $0x78] sm:$0xff] }
 0x318   :  { %v4820_v46 = vrot.slane %v4813_v61, %v9021_v26  ;;  %v6845_v22 = vld [vmem:[%s12167_s4 + $0x70] sm:$0xff] }
 0x319   :  { %8575 = vmatpush3.bf16.msra.mxu0 %v8574_v32  ;;  %8596 = vmatpush3.bf16.msra.mxu1 %v8595_v8  ;;  %v8646_v32 = vpack.c.bf16 %v6815_v37, %v6814_v0  ;;  %v6802_v8 = vld [vmem:[%s12171_s8 + $0x770] sm:$0xff]  ;;  %v4212_v37 = vld [vmem:[%s12167_s4 + $0x18] sm:$0xff] }
 0x31a   :  { %8576 = vmatprep.subr.bf16.mxu0 %v12328_v28  ;;  %8597 = vmatprep.subr.bf16.mxu1 %v12328_v28  ;;  %v8628_v4 = vpack.c.bf16 %v6803_v39, %v6802_v8  ;;  %v4211_v0 = vld [vmem:[%s12167_s4 + $0x10] sm:$0xff]  ;;  %v12380_v39 = vld [vmem:[#allocation51_spill] sm:$0xff] }
 0x31b   :  { %v12387_v59 = vld [vmem:[#allocation48_spill] sm:$0xff] }
 0x31c   :  { %v4274_v61 = vrot.slane %v12387_v59, %v9021_v26 }
 0x31d   :  { %8578 = vmatpush3.bf16.msra.mxu0 %v8577_v12  ;;  %8599 = vmatpush3.bf16.msra.mxu1 %v8598_v43  ;;  %v8649_v12 = vpack.c.bf16 %v6817_v30, %v6816_v21  ;;  %v6818_v43 = vld [vmem:[%s12171_s8 + $0x7f0] sm:$0xff]  ;;  %v4821_v21 = vcombine.low %v12380_v39, %v4820_v46 }
 0x31e   :  { %8579 = vmatprep.subr.bf16.mxu0 %v12328_v28  ;;  %8600 = vmatprep.subr.bf16.mxu1 %v12328_v28  ;;  %v8652_v49 = vpack.c.bf16 %v6819_v63, %v6818_v43  ;;  %v12396_v46 = vld [vmem:[#allocation20_spill] sm:$0xff] }
 0x321   :  { %8581 = vmatpush3.bf16.msra.mxu0 %v8580_v36  ;;  %8602 = vmatpush3.bf16.msra.mxu1 %v8601_v62  ;;  %v12365_v36 = vld [vmem:[#allocation21_spill] sm:$0xff] }
 0x322   :  { %8603 = vmatprep.subr.bf16.mxu1 %v12328_v28  ;;  %8606 = vmatprep.subr.bf16.mxu0 %v12328_v28  ;;  %v4218_v62 = vcombine.low %v12365_v36, %v12364_v16  ;;  %v12381_v16 = vld [vmem:[#allocation32_spill] sm:$0xff] }
 0x324   :  { %7897 = vmatmul.mubr.f32.vlgmr.msra.gmra.mrb[28].mxu0 %v11078_v10  ;;  %v8634_v10 = vpack.c.bf16 %v6807_v1, %v6806_v56  ;;  %v4225_v7 = vrot.slane %v4218_v62, %v9021_v26  ;;  %v4210_v56 = vld [vmem:[%s12167_s4 + $0x8] sm:$0xff]  ;;  %v4828_v62 = vrot.slane %v4821_v21, %v9021_v26 }
 0x325   :  { %8605 = vmatpush3.bf16.msra.mxu1 %v8604_v60  ;;  %8608 = vmatpush3.bf16.msra.mxu0 %v8607_v45  ;;  %v6834_v60 = vld [vmem:[%s12167_s4 + $0x40] sm:$0xff]  ;;  %v6835_v45 = vld [vmem:[%s12167_s4 + $0x48] sm:$0xff] }
 0x326   :  { %8609 = vmatprep.subr.bf16.mxu0 %v12328_v28  ;;  %8630 = vmatprep.subr.bf16.mxu1 %v12328_v28  ;;  %v12368_v1 = vld [vmem:[#allocation35_spill] sm:$0xff] }
 0x327   :  { %7966 = vmatprep.mubr.msk.f32.mxu0 %vm8860_vm2, %v12327_v24 }
 0x328   :  { %7932 = vmatmul.mubr.f32.vlgmr.msra.gmra.mrb[22].mxu1 %v11074_v38  ;;  %v6808_v38 = vld [vmem:[%s12171_s8 + $0x7a0] sm:$0xff] }
 0x329   :  { %8611 = vmatpush3.bf16.msra.mxu0 %v8610_v18  ;;  %8632 = vmatpush3.bf16.msra.mxu1 %v8631_v53  ;;  %v8637_v58 = vpack.c.bf16 %v6809_v27, %v6808_v38  ;;  %v8658_v18 = vpack.c.bf16 %v6823_v11, %v6822_v29  ;;  %v8667_v53 = vpack.c.bf16 %v6835_v45, %v6834_v60  ;;  %v12372_v27 = vld [vmem:[#allocation25_spill] sm:$0xff]  ;;  %v12386_v45 = vld [vmem:[#allocation62_spill] sm:$0xff] }
 0x32a   :  { %8612 = vmatprep.subr.bf16.mxu0 %v12328_v28  ;;  %8633 = vmatprep.subr.bf16.mxu1 %v12328_v28  ;;  %v4797_v38 = vcombine.low %v12371_v33, %v12370_v54  ;;  %v8676_v11 = vpack.c.bf16 %v6846_v25, %v6845_v22  ;;  %v12393_v33 = vld [vmem:[#allocation69_spill] sm:$0xff] }
 0x32b   :  { %8001 = vmatprep.mubr.msk.f32.mxu1 %vm8860_vm2, %v12327_v24  ;;  %v12409_v25 = vld [vmem:[#allocation65_spill] sm:$0xff] }
 0x32c   :  { %v4811_v40 = vrot.slane %v4797_v38, %v9021_v26 }
 0x32d   :  { %8614 = vmatpush3.bf16.msra.mxu0 %v8613_v23  ;;  %8635 = vmatpush3.bf16.msra.mxu1 %v8634_v10  ;;  %v12369_v23 = vld [vmem:[#allocation31_spill] sm:$0xff] }
 0x32e   :  { %8615 = vmatprep.subr.bf16.mxu0 %v12328_v28  ;;  %8636 = vmatprep.subr.bf16.mxu1 %v12328_v28  ;;  %v4796_v10 = vcombine.low %v12369_v23, %v12368_v1  ;;  %v12391_v1 = vld [vmem:[#allocation19_spill] sm:$0xff] }
 0x330   :  { %v4804_v57 = vrot.slane %v4796_v10, %v9021_v26  ;;  %v12392_v10 = vld [vmem:[#allocation70_spill] sm:$0xff] }
 0x331   :  { %8617 = vmatpush3.bf16.msra.mxu0 %v8616_v15  ;;  %8638 = vmatpush3.bf16.msra.mxu1 %v8637_v58  ;;  %v4226_v15 = vcombine.low %v12372_v27, %v4225_v7  ;;  %v12373_v58 = vld [vmem:[#allocation38_spill] sm:$0xff]  ;;  %v4829_v7 = vcombine.low %v4828_v62, %v12386_v45  ;;  %v4831_v38 = vcombine.low %v12393_v33, %v12392_v10  ;;  %v6870_v10 = vld [vmem:[%s12171_s8 + $0x888] sm:$0xff] }
 0x332   :  { %8618 = vmatprep.subr.bf16.mxu0 %v12328_v28  ;;  %8639 = vmatprep.subr.bf16.mxu1 %v12328_v28  ;;  %v4227_v14 = vcombine.low %v12374_v19, %v12373_v58  ;;  %v12394_v58 = vld [vmem:[#allocation57_spill] sm:$0xff]  ;;  %v12395_v19 = vld [vmem:[#allocation52_spill] sm:$0xff] }
 0x334   :  { %v4241_v8 = vrot.slane %v4227_v14, %v9021_v26  ;;  %v4381_v14 = vcombine.low %v12395_v19, %v12394_v58  ;;  %v6871_v19 = vld [vmem:[%s12171_s8 + $0x890] sm:$0xff] }
 0x335   :  { %8620 = vmatpush3.bf16.msra.mxu0 %v8619_v35  ;;  %8641 = vmatpush3.bf16.msra.mxu1 %v8640_v48  ;;  %v8661_v35 = vpack.c.bf16 %v4210_v56, %v4209_v6  ;;  %v6843_v48 = vld [vmem:[%s12167_s4 + $0x60] sm:$0xff] }
 0x336   :  { %8621 = vmatprep.subr.bf16.mxu0 %v12328_v28  ;;  %8642 = vmatprep.subr.bf16.mxu1 %v12328_v28  ;;  %v12390_v56 = vld [vmem:[#allocation54_spill] sm:$0xff] }
 0x337   :  { %v5251_v23 = vcombine.low %v12391_v1, %v12390_v56  ;;  %v6853_v56 = vld [vmem:[%s12171_s8 + $0x800] sm:$0xff]  ;;  %v6854_v1 = vld [vmem:[%s12171_s8 + $0x808] sm:$0xff] }
 0x339   :  { %8623 = vmatpush3.bf16.msra.mxu0 %v8622_v2  ;;  %8644 = vmatpush3.bf16.msra.mxu1 %v8643_v3  ;;  %v4243_v2 = vcombine.low %v12376_v42, %v12375_v55  ;;  %v12377_v3 = vld [vmem:[#allocation45_spill] sm:$0xff]  ;;  %v12399_v55 = vld [vmem:[#allocation60_spill] sm:$0xff]  ;;  %v12400_v42 = vld [vmem:[#allocation58_spill] sm:$0xff] }
 0x33a   :  { %8624 = vmatprep.subr.bf16.mxu0 %v12328_v28  ;;  %8645 = vmatprep.subr.bf16.mxu1 %v12328_v28  ;;  %v4244_v50 = vcombine.low %v12378_v20, %v12377_v3  ;;  %v12401_v3 = vld [vmem:[#allocation63_spill] sm:$0xff]  ;;  %v12402_v20 = vld [vmem:[#allocation61_spill] sm:$0xff] }
 0x33b   :  { %v4251_v43 = vrot.slane %v4243_v2, %v9021_v26  ;;  %v4397_v2 = vcombine.low %v12400_v42, %v12399_v55  ;;  %v6860_v55 = vld [vmem:[%s12171_s8 + $0x838] sm:$0xff] }
 0x33c   :  { %v4258_v63 = vrot.slane %v4244_v50, %v9021_v26  ;;  %v4398_v50 = vcombine.low %v12402_v20, %v12401_v3  ;;  %v6876_v3 = vld [vmem:[%s12171_s8 + $0x8b8] sm:$0xff] }
 0x33d   :  { %8626 = vmatpush3.bf16.msra.mxu0 %v8625_v5  ;;  %8647 = vmatpush3.bf16.msra.mxu1 %v8646_v32  ;;  %v12379_v5 = vld [vmem:[#allocation22_spill] sm:$0xff]  ;;  %v4234_v32 = vrot.slane %v4226_v15, %v9021_v26  ;;  %v4405_v39 = vrot.slane %v4397_v2, %v9021_v26  ;;  %v6875_v2 = vld [vmem:[%s12171_s8 + $0x8b0] sm:$0xff] }
 0x33e   :  { %8627 = vmatprep.subr.bf16.mxu0 %v12328_v28  ;;  %8648 = vmatprep.subr.bf16.mxu1 %v12328_v28  ;;  %v4259_v60 = vcombine.low %v4251_v43, %v4258_v63  ;;  %v4412_v21 = vrot.slane %v4398_v50, %v9021_v26  ;;  %v8712_v20 = vpack.c.bf16 %v6876_v3, %v6875_v2  ;;  %v6861_v50 = vld [vmem:[%s12171_s8 + $0x840] sm:$0xff] }
 0x33f   :  { %v4242_v36 = vcombine.low %v4234_v32, %v4241_v8 }
 0x340   :  { %v4413_v62 = vcombine.low %v4405_v39, %v4412_v21 }
 0x341   :  { %8629 = vmatpush3.bf16.msra.mxu0 %v8628_v4  ;;  %8650 = vmatpush3.bf16.msra.mxu1 %v8649_v12  ;;  %v8664_v4 = vpack.c.bf16 %v4212_v37, %v4211_v0  ;;  %v4812_v12 = vcombine.low %v4804_v57, %v4811_v40  ;;  %v5258_v57 = vrot.slane %v5251_v23, %v9021_v26  ;;  %v12403_v0 = vld [vmem:[#allocation33_spill] sm:$0xff] }
 0x342   :  { %8651 = vmatprep.subr.bf16.mxu1 %v12328_v28  ;;  %8654 = vmatprep.subr.bf16.mxu0 %v12328_v28  ;;  %v4395_v40 = vrot.slane %v4381_v14, %v9021_v26  ;;  %v8679_v23 = vpack.c.bf16 %v6854_v1, %v6853_v56  ;;  %v6872_v14 = vld [vmem:[%s12171_s8 + $0x898] sm:$0xff] }
 0x344   :  { %7967 = vmatmul.mubr.f32.vlgmr.msra.gmra.mrb[30].mxu0 %v11101_v52  ;;  %v6837_v52 = vld [vmem:[%s12167_s4 + $0x58] sm:$0xff] }
 0x345   :  { %8653 = vmatpush3.bf16.msra.mxu1 %v8652_v49  ;;  %8656 = vmatpush3.bf16.msra.mxu0 %v8655_v41  ;;  %v8670_v44 = vpack.c.bf16 %v6837_v52, %v6836_v13  ;;  %v12382_v49 = vld [vmem:[#allocation47_spill] sm:$0xff]  ;;  %v12383_v41 = vld [vmem:[#allocation46_spill] sm:$0xff]  ;;  %v12388_v13 = vld [vmem:[#allocation68_spill] sm:$0xff] }
 0x346   :  { %8657 = vmatprep.subr.bf16.mxu0 %v12328_v28  ;;  %8666 = vmatprep.subr.bf16.mxu1 %v12328_v28  ;;  %v4260_v29 = vcombine.low %v12383_v41, %v12382_v49  ;;  %v12389_v52 = vld [vmem:[#allocation67_spill] sm:$0xff]  ;;  %v12411_v49 = vld [vmem:[#allocation42_spill] sm:$0xff] }
 0x347   :  { %8012 = vmatprep.mubr.msk.f32.mxu0 %vm8860_vm2, %v12327_v24  ;;  %v4830_v6 = vcombine.low %v12389_v52, %v12388_v13 }
 0x348   :  { %8002 = vmatmul.mubr.f32.vlgmr.msra.gmra.mrb[24].mxu1 %v11109_v31  ;;  %v6844_v31 = vld [vmem:[%s12167_s4 + $0x68] sm:$0xff]  ;;  %v4267_v51 = vrot.slane %v4260_v29, %v9021_v26 }
 0x349   :  { %8659 = vmatpush3.bf16.msra.mxu0 %v8658_v18  ;;  %8668 = vmatpush3.bf16.msra.mxu1 %v8667_v53  ;;  %v8673_v30 = vpack.c.bf16 %v6844_v31, %v6843_v48  ;;  %v12398_v48 = vld [vmem:[#allocation24_spill] sm:$0xff] }
 0x34a   :  { %8669 = vmatprep.subr.bf16.mxu1 %v12328_v28  ;;  %8660 = vmatprep.subr.bf16.mxu0 %v12328_v28  ;;  %v4275_v53 = vcombine.low %v4267_v51, %v4274_v61  ;;  %v5235_v31 = vcombine.low %v12398_v48, %v12372_v27  ;;  %v12416_v51 = vld [vmem:[#allocation55_spill] sm:$0xff] }
 0x34b   :  { %8058 = vmatprep.mubr.msk.f32.mxu1 %vm8860_vm2, %v12327_v24 }
 0x34c   :  { %8013 = vmatmul.mubr.msk.f32.vlgmr.msra.gmra.mrb[32].mxu0 %vm789_vm1, %v12379_v5  ;;  %v5249_v37 = vrot.slane %v5235_v31, %v9021_v26  ;;  %v12404_v5 = vld [vmem:[#allocation28_spill] sm:$0xff]  ;;  %v6873_v31 = vld [vmem:[%s12171_s8 + $0x8a0] sm:$0xff] }
 0x34d   :  { %8671 = vmatpush3.bf16.msra.mxu1 %v8670_v44  ;;  %8015 = vmatprep.mubr.msk.f32.mxu0 %vm8860_vm2, %v12327_v24  ;;  %v12397_v44 = vld [vmem:[#allocation18_spill] sm:$0xff]  ;;  %v5259_v32 = vcombine.low %v12404_v5, %v5258_v57  ;;  %v6874_v57 = vld [vmem:[%s12171_s8 + $0x8a8] sm:$0xff] }
 0x34e   :  { %8662 = vmatpush3.bf16.msra.mxu0 %v8661_v35  ;;  %8672 = vmatprep.subr.bf16.mxu1 %v12328_v28  ;;  %v5234_v35 = vcombine.low %v12397_v44, %v12396_v46  ;;  %v8706_v46 = vpack.c.bf16 %v6872_v14, %v6871_v19  ;;  %v6857_v44 = vld [vmem:[%s12171_s8 + $0x820] sm:$0xff] }
 0x34f   :  { %8663 = vmatprep.subr.bf16.mxu0 %v12328_v28  ;;  %v5266_v22 = vrot.slane %v5259_v32, %v9021_v26  ;;  %v6877_v5 = vld [vmem:[%s12171_s8 + $0x8c0] sm:$0xff]  ;;  %v6878_v32 = vld [vmem:[%s12171_s8 + $0x8c8] sm:$0xff] }
 0x350   :  { %8016 = vmatmul.mubr.msk.f32.gmra.mrb[34].mxu0 %vm789_vm1, %v12381_v16  ;;  %8059 = vmatmul.mubr.msk.f32.vlgmr.msra.gmra.mrb[26].mxu1 %vm789_vm1, %v4795_v9  ;;  %v4372_v9 = vcombine.low %v12385_v17, %v12384_v34  ;;  %v5242_v27 = vrot.slane %v5234_v35, %v9021_v26  ;;  %v12410_v16 = vld [vmem:[#allocation64_spill] sm:$0xff]  ;;  %v12413_v17 = vld [vmem:[#allocation53_spill] sm:$0xff]  ;;  %v8715_v21 = vpack.c.bf16 %v6878_v32, %v6877_v5 }
 0x351   :  { %8674 = vmatpush3.bf16.msra.mxu1 %v8673_v30  ;;  %8018 = vmatprep.mubr.msk.f32.mxu0 %vm8860_vm2, %v12327_v24  ;;  %v12405_v30 = vld [vmem:[#allocation59_spill] sm:$0xff]  ;;  %v5267_v41 = vcombine.low %v5266_v22, %v12411_v49  ;;  %v6880_v22 = vld [vmem:[%s12171_s8 + $0x8d8] sm:$0xff] }
 0x352   :  { %8061 = vmatprep.mubr.msk.f32.mxu1 %vm8860_vm2, %v12327_v24  ;;  %8665 = vmatpush3.bf16.msra.mxu0 %v8664_v4  ;;  %v4379_v18 = vrot.slane %v4372_v9, %v9021_v26  ;;  %v12406_v4 = vld [vmem:[#allocation15_spill] sm:$0xff]  ;;  %v5250_v63 = vcombine.low %v5242_v27, %v5249_v37  ;;  %v12414_v9 = vld [vmem:[#allocation50_spill] sm:$0xff] }
 0x353   :  { %8675 = vmatprep.subr.bf16.mxu1 %v12328_v28  ;;  %8678 = vmatprep.subr.bf16.mxu0 %v12328_v28  ;;  %v5268_v45 = vcombine.low %v12414_v9, %v12413_v17  ;;  %v6858_v35 = vld [vmem:[%s12171_s8 + $0x828] sm:$0xff]  ;;  %v6883_v9 = vld [vmem:[%s12171_s8 + $0x8f0] sm:$0xff] }
 0x354   :  { %8019 = vmatmul.mubr.msk.f32.gmra.mrb[36].mxu0 %vm789_vm1, %v4242_v36  ;;  %8062 = vmatmul.mubr.msk.f32.gmra.mrb[28].mxu1 %vm789_vm1, %v4812_v12  ;;  %v4380_v15 = vcombine.low %v12370_v54, %v4379_v18  ;;  %v12407_v12 = vld [vmem:[#allocation23_spill] sm:$0xff]  ;;  %v4414_v36 = vcombine.low %v12410_v16, %v12409_v25  ;;  %v8685_v48 = vpack.c.bf16 %v6858_v35, %v6857_v44 }
 0x355   :  { %8021 = vmatprep.mubr.msk.f32.mxu0 %vm8860_vm2, %v12327_v24  ;;  %8064 = vmatprep.mubr.msk.f32.mxu1 %vm8860_vm2, %v12327_v24  ;;  %v12408_v43 = vcombine.low %v12406_v4, %v12407_v12  ;;  %v6864_v4 = vld [vmem:[%s12171_s8 + $0x858] sm:$0xff]  ;;  %v6866_v49 = vld [vmem:[%s12171_s8 + $0x868] sm:$0xff] }
 0x356   :  { %8677 = vmatpush3.bf16.msra.mxu1 %v8676_v11  ;;  %v4388_v54 = vrot.slane %v4380_v15, %v9021_v26  ;;  %v4421_v29 = vrot.slane %v4414_v36, %v9021_v26  ;;  %v12412_v11 = vld [vmem:[#allocation66_spill] sm:$0xff] }
 0x357   :  { %8702 = vmatprep.subr.bf16.mxu1 %v12328_v28  ;;  %v6856_v15 = vld [vmem:[%s12171_s8 + $0x818] sm:$0xff] }
 0x358   :  { %8022 = vmatmul.mubr.msk.f32.gmra.mrb[38].mxu0 %vm789_vm1, %v4259_v60  ;;  %8065 = vmatmul.mubr.msk.f32.gmra.mrb[30].mxu1 %vm789_vm1, %v4829_v7  ;;  %v4396_v8 = vcombine.low %v4388_v54, %v4395_v40  ;;  %v4428_v60 = vrot.slane %v12412_v11, %v9021_v26  ;;  %v12415_v7 = vld [vmem:[#allocation56_spill] sm:$0xff]  ;;  %v8709_v54 = vpack.c.bf16 %v6874_v57, %v6873_v31 }
 0x359   :  { %8024 = vmatprep.mubr.msk.f32.mxu0 %vm8860_vm2, %v12327_v24  ;;  %8067 = vmatprep.mubr.msk.f32.mxu1 %vm8860_vm2, %v12327_v24  ;;  %v5269_v59 = vcombine.low %v12416_v51, %v12415_v7  ;;  %v6859_v40 = vld [vmem:[%s12171_s8 + $0x830] sm:$0xff]  ;;  %v6882_v11 = vld [vmem:[%s12171_s8 + $0x8e8] sm:$0xff] }
 0x35a   :  { %v4429_v34 = vcombine.low %v4421_v29, %v4428_v60  ;;  %v8688_v42 = vpack.c.bf16 %v6860_v55, %v6859_v40  ;;  %v6867_v60 = vld [vmem:[%s12171_s8 + $0x870] sm:$0xff] }
 0x35c   :  { %8025 = vmatmul.mubr.msk.f32.gmra.mrb[40].mxu0 %vm789_vm1, %v4275_v53  ;;  %8068 = vmatmul.mubr.msk.f32.gmra.mrb[32].mxu1 %vm789_vm1, %v4830_v6 }
 0x35d   :  { %8035 = vmatprep.mubr.msk.f32.mxu0 %vm8860_vm2, %v12327_v24  ;;  %8070 = vmatprep.mubr.msk.f32.mxu1 %vm8860_vm2, %v12327_v24 }
 0x360   :  { %8036 = vmatmul.mubr.msk.f32.vlgmr.msra.gmra.mrb[32].mxu0 %vm789_vm1, %v12403_v0  ;;  %8071 = vmatmul.mubr.msk.f32.gmra.mrb[34].mxu1 %vm789_vm1, %v4831_v38  ;;  %v6855_v38 = vld [vmem:[%s12171_s8 + $0x810] sm:$0xff]  ;;  %v6862_v0 = vld [vmem:[%s12171_s8 + $0x848] sm:$0xff] }
 0x361   :  { %8038 = vmatprep.mubr.msk.f32.mxu0 %vm8860_vm2, %v12327_v24  ;;  %8081 = vmatprep.mubr.msk.f32.mxu1 %vm8860_vm2, %v12327_v24  ;;  %v8682_v58 = vpack.c.bf16 %v6856_v15, %v6855_v38  ;;  %v8691_v27 = vpack.c.bf16 %v6862_v0, %v6861_v50 }
 0x362   :  { %8680 = vmatpush3.bf16.msra.mxu0 %v8679_v23 }
 0x363   :  { %8681 = vmatprep.subr.bf16.mxu0 %v12328_v28 }
 0x364   :  { %8039 = vmatmul.mubr.msk.f32.gmra.mrb[34].mxu0 %vm789_vm1, %v12405_v30  ;;  %8082 = vmatmul.mubr.msk.f32.vlgmr.msra.gmra.mrb[36].mxu1 %vm789_vm1, %v12408_v43  ;;  %v6863_v30 = vld [vmem:[%s12171_s8 + $0x850] sm:$0xff] }
 0x365   :  { %8041 = vmatprep.mubr.msk.f32.mxu0 %vm8860_vm2, %v12327_v24  ;;  %8084 = vmatprep.mubr.msk.f32.mxu1 %vm8860_vm2, %v12327_v24  ;;  %v8694_v12 = vpack.c.bf16 %v6864_v4, %v6863_v30  ;;  %v11662_v30 = vld [vmem:[%s12171_s8 + $0x908] sm:$0xff] }
 0x366   :  { %8683 = vmatpush3.bf16.msra.mxu0 %v8682_v58 }
 0x367   :  { %8684 = vmatprep.subr.bf16.mxu0 %v12328_v28 }
 0x368   :  { %8042 = vmatmul.mubr.msk.f32.gmra.mrb[36].mxu0 %vm789_vm1, %v4396_v8  ;;  %8085 = vmatmul.mubr.msk.f32.gmra.mrb[38].mxu1 %vm789_vm1, %v5250_v63  ;;  %v6879_v63 = vld [vmem:[%s12171_s8 + $0x8d0] sm:$0xff] }
 0x369   :  { %8044 = vmatprep.mubr.msk.f32.mxu0 %vm8860_vm2, %v12327_v24  ;;  %8087 = vmatprep.mubr.msk.f32.mxu1 %vm8860_vm2, %v12327_v24  ;;  %v8718_v36 = vpack.c.bf16 %v6880_v22, %v6879_v63 }
 0x36a   :  { %8686 = vmatpush3.bf16.msra.mxu0 %v8685_v48 }
 0x36b   :  { %8687 = vmatprep.subr.bf16.mxu0 %v12328_v28 }
 0x36c   :  { %8045 = vmatmul.mubr.msk.f32.gmra.mrb[38].mxu0 %vm789_vm1, %v4413_v62  ;;  %8088 = vmatmul.mubr.msk.f32.gmra.mrb[40].mxu1 %vm789_vm1, %v5267_v41  ;;  %v6865_v62 = vld [vmem:[%s12171_s8 + $0x860] sm:$0xff] }
 0x36d   :  { %8047 = vmatprep.mubr.msk.f32.mxu0 %vm8860_vm2, %v12327_v24  ;;  %8090 = vmatprep.mubr.msk.f32.mxu1 %vm8860_vm2, %v12327_v24  ;;  %v6881_v41 = vld [vmem:[%s12171_s8 + $0x8e0] sm:$0xff]  ;;  %v8697_v29 = vpack.c.bf16 %v6866_v49, %v6865_v62 }
 0x36e   :  { %8689 = vmatpush3.bf16.msra.mxu0 %v8688_v42  ;;  %v8721_v17 = vpack.c.bf16 %v6882_v11, %v6881_v41 }
 0x36f   :  { %8690 = vmatprep.subr.bf16.mxu0 %v12328_v28 }
 0x370   :  { %8048 = vmatmul.mubr.msk.f32.gmra.mrb[40].mxu0 %vm789_vm1, %v4429_v34  ;;  %8091 = vmatmul.mubr.msk.f32.gmra.mrb[42].mxu1 %vm789_vm1, %v5268_v45  ;;  %v6868_v34 = vld [vmem:[%s12171_s8 + $0x878] sm:$0xff] }
 0x371   :  { %8093 = vmatprep.mubr.msk.f32.mxu1 %vm8860_vm2, %v12327_v24  ;;  %8128 = vmatprep.mubr.msk.f32.mxu0 %vm8860_vm2, %v12327_v24  ;;  %v6884_v45 = vld [vmem:[%s12171_s8 + $0x8f8] sm:$0xff]  ;;  %v8700_v7 = vpack.c.bf16 %v6868_v34, %v6867_v60 }
 0x372   :  { %8692 = vmatpush3.bf16.msra.mxu0 %v8691_v27  ;;  %v8724_v51 = vpack.c.bf16 %v6884_v45, %v6883_v9 }
 0x373   :  { %8693 = vmatprep.subr.bf16.mxu0 %v12328_v28 }
 0x374   :  { %8094 = vmatmul.mubr.msk.f32.gmra.mrb[44].mxu1 %vm789_vm1, %v5269_v59 }
 0x375   :  { %8163 = vmatprep.mubr.msk.f32.mxu1 %vm8860_vm2, %v12327_v24 }
 0x376   :  { %8695 = vmatpush3.bf16.msra.mxu0 %v8694_v12 }
 0x377   :  { %8696 = vmatprep.subr.bf16.mxu0 %v12328_v28 }
 0x37a   :  { %8698 = vmatpush3.bf16.msra.mxu0 %v8697_v29 }
 0x37b   :  { %8699 = vmatprep.subr.bf16.mxu0 %v12328_v28 }
 0x37e   :  { %8701 = vmatpush3.bf16.msra.mxu0 %v8700_v7 }
 0x37f   :  { %8726 = vmatprep.subr.bf16.mxu0 %v12328_v28 }
 0x3d7   :  { %v3649_v61 = vpop.f32.mrb[26].mxu0 }
 0x3d8   :  { %v3653_v18 = vadd.f32 %v3649_v61, %v10953_v47  ;;  %v7828_v53 = vpop.f32.mrb[27].mxu0  ;;  %v6869_v47 = vld [vmem:[%s12171_s8 + $0x880] sm:$0xff] }
 0x3d9   :  { %v8703_v33 = vpack.c.bf16 %v6870_v10, %v6869_v47  ;;  %v6852_v53 = vld [vmem:[%s12170_s7] ss:$0 sm:$0xff] }
 0x3da   :  { %v5656_v56 = vcombine.high %v6852_v53, %v6852_v53  ;;  %v5663_v1 = vrot.slane %v6852_v53, %v9021_v26 }
 0x3db   :  { %v3764_v13 = vpop.f32.mrb[20].mxu1  ;;  %8704 = vmatpush3.bf16.msra.mxu1 %v8703_v33 }
 0x3dc   :  { %v3768_v52 = vadd.f32 %v3764_v13, %v3653_v18  ;;  %v7863_v6 = vpop.f32.mrb[21].mxu1  ;;  %8705 = vmatprep.subr.bf16.mxu1 %v12328_v28  ;;  %v5670_v23 = vrot.slane %v5656_v56, %v9021_v26  ;;  %v5671_v38 = vcombine.high %v5663_v1, %v5663_v1  ;;  %v11618_v14 = vrot.slane %v5663_v1, %v9021_v26 }
 0x3de   :  { %v5672_v15 = vcombine.high %v5670_v23, %v5670_v23  ;;  %v11624_v48 = vrot.slane %v5671_v38, %v9021_v26  ;;  %v11632_v42 = vcombine.high %v11618_v14, %v11618_v14 }
 0x3df   :  { %8707 = vmatpush3.bf16.msra.mxu1 %v8706_v46  ;;  %v11621_v46 = vrot.slane %v5670_v23, %v9021_v26 }
 0x3e0   :  { %8708 = vmatprep.subr.bf16.mxu1 %v12328_v28  ;;  %v11627_v31 = vrot.slane %v5672_v15, %v9021_v26 }
 0x3e1   :  { %v11636_v2 = vcombine.high %v11621_v46, %v11621_v46 }
 0x3e3   :  { %8710 = vmatpush3.bf16.msra.mxu1 %v8709_v54 }
 0x3e4   :  { %8711 = vmatprep.subr.bf16.mxu1 %v12328_v28 }
 0x3e7   :  { %8713 = vmatpush3.bf16.msra.mxu1 %v8712_v20 }
 0x3e8   :  { %8714 = vmatprep.subr.bf16.mxu1 %v12328_v28 }
 0x3eb   :  { %8716 = vmatpush3.bf16.msra.mxu1 %v8715_v21  ;;  %v11657_v21 = vld [vmem:[%s12171_s8 + $0x900] sm:$0xff] }
 0x3ec   :  { %8717 = vmatprep.subr.bf16.mxu1 %v12328_v28  ;;  %12418 = vst [vmem:[#allocation73_spill] sm:$0xff] %v11657_v21 }
 0x3ef   :  { %8719 = vmatpush3.bf16.msra.mxu1 %v8718_v36 }
 0x3f0   :  { %8720 = vmatprep.subr.bf16.mxu1 %v12328_v28 }
 0x3f3   :  { %8722 = vmatpush3.bf16.msra.mxu1 %v8721_v17 }
 0x3f4   :  { %8723 = vmatprep.subr.bf16.mxu1 %v12328_v28 }
 0x3f7   :  { %v3877_v37 = vpop.f32.mrb[28].mxu0  ;;  %8725 = vmatpush3.bf16.msra.mxu1 %v8724_v51 }
 0x3f8   :  { %v3881_v8 = vadd.f32 %v3877_v37, %v3768_v52  ;;  %v7898_v39 = vpop.f32.mrb[29].mxu0  ;;  %8750 = vmatprep.subr.bf16.mxu1 %v12328_v28 }
 0x3f9   :  { %v11652_v39 = vcombine.high %v11627_v31, %v11627_v31 }
 0x3fb   :  { %v3984_v43 = vpop.f32.mrb[22].mxu1 }
 0x3fc   :  { %v3988_v25 = vadd.f32 %v3984_v43, %v3881_v8  ;;  %v7933_v16 = vpop.f32.mrb[23].mxu1  ;;  %v11648_v8 = vcombine.high %v11624_v48, %v11624_v48 }
 0x417   :  { %v4090_v59 = vpop.f32.mrb[30].mxu0 }
 0x418   :  { %v4094_v61 = vadd.f32 %v4090_v59, %v3988_v25  ;;  %v7968_v18 = vpop.f32.mrb[31].mxu0 }
 0x41b   :  { %v4204_v13 = vpop.f32.mrb[24].mxu1 }
 0x41c   :  { %v11611_v52 = vadd.f32 %v4204_v13, %v4094_v61  ;;  %v8003_v6 = vpop.f32.mrb[25].mxu1 }
 0x41e   :  { %12417 = vst [vmem:[#allocation74_spill] sm:$0xff] %v11611_v52 }
 0x423   :  { %v4908_v47 = vpop.f32.mrb[26].mxu1 }
 0x424   :  { %v4937_v10 = vcombine.high %v4908_v47, %v4908_v47  ;;  %v8060_v33 = vpop.f32.mrb[27].mxu1  ;;  %v4944_v58 = vrot.slane %v4908_v47, %v9021_v26 }
 0x426   :  { %v4951_v19 = vrot.slane %v4937_v10, %v9021_v26  ;;  %v4952_v57 = vcombine.high %v4944_v58, %v4944_v58  ;;  %v11639_v3 = vrot.slane %v4944_v58, %v9021_v26 }
 0x427   :  { %v4913_v44 = vpop.f32.mrb[28].mxu1 }
 0x428   :  { %v8063_v35 = vpop.f32.mrb[29].mxu1  ;;  %v4953_v54 = vcombine.high %v4951_v19, %v4951_v19  ;;  %v4986_v40 = vcombine.high %v4913_v44, %v4913_v44  ;;  %v4993_v55 = vrot.slane %v4913_v44, %v9021_v26  ;;  %v11642_v20 = vrot.slane %v4951_v19, %v9021_v26 }
 0x429   :  { %v11665_v4 = vrot.slane %v4952_v57, %v9021_v26  ;;  %v4982_v62 = vcombine.high %v11639_v3, %v11639_v3 }
 0x42a   :  { %v5000_v50 = vrot.slane %v4986_v40, %v9021_v26  ;;  %v5001_v0 = vcombine.high %v4993_v55, %v4993_v55  ;;  %v11668_v12 = vrot.slane %v4953_v54, %v9021_v26  ;;  %v11671_v63 = vrot.slane %v4993_v55, %v9021_v26 }
 0x42b   :  { %v4918_v27 = vpop.f32.mrb[30].mxu1  ;;  %v4983_v49 = vcombine.high %v11642_v20, %v11642_v20  ;;  %v4984_v7 = vcombine.high %v11665_v4, %v11665_v4 }
 0x42c   :  { %v5035_v37 = vcombine.high %v4918_v27, %v4918_v27  ;;  %v5042_v5 = vrot.slane %v4918_v27, %v9021_v26  ;;  %v8066_v32 = vpop.f32.mrb[31].mxu1  ;;  %v5002_v43 = vcombine.high %v5000_v50, %v5000_v50  ;;  %v11674_v22 = vrot.slane %v5000_v50, %v9021_v26 }
 0x42d   :  { %v11677_v25 = vrot.slane %v5001_v0, %v9021_v26  ;;  %v4985_v51 = vcombine.high %v11668_v12, %v11668_v12  ;;  %v5031_v59 = vcombine.high %v11671_v63, %v11671_v63 }
 0x42e   :  { %v5049_v16 = vrot.slane %v5035_v37, %v9021_v26  ;;  %v5050_v36 = vcombine.high %v5042_v5, %v5042_v5  ;;  %v11685_v41 = vrot.slane %v5002_v43, %v9021_v26  ;;  %v5032_v18 = vcombine.high %v11674_v22, %v11674_v22 }
 0x42f   :  { %v4923_v29 = vpop.f32.mrb[32].mxu1  ;;  %v5033_v53 = vcombine.high %v11677_v25, %v11677_v25 }
 0x430   :  { %v5051_v60 = vcombine.high %v5049_v16, %v5049_v16  ;;  %v11690_v34 = vrot.slane %v5049_v16, %v9021_v26  ;;  %v11693_v17 = vrot.slane %v5050_v36, %v9021_v26  ;;  %v5076_v9 = vcombine.high %v4923_v29, %v4923_v29  ;;  %v8069_v45 = vpop.f32.mrb[33].mxu1 }
 0x431   :  { %v5083_v61 = vrot.slane %v4923_v29, %v9021_v26  ;;  %v5034_v56 = vcombine.high %v11685_v41, %v11685_v41 }
 0x432   :  { %v11707_v13 = vrot.slane %v5051_v60, %v9021_v26  ;;  %v5090_v6 = vrot.slane %v5076_v9, %v9021_v26 }
 0x433   :  { %v5091_v23 = vcombine.high %v5083_v61, %v5083_v61  ;;  %v11715_v47 = vrot.slane %v5083_v61, %v9021_v26  ;;  %v4502_v10 = vpop.f32.mrb[32].mxu0  ;;  %v4928_v33 = vpop.f32.mrb[34].mxu1 }
 0x434   :  { %v5092_v15 = vcombine.high %v5090_v6, %v5090_v6  ;;  %v11720_v58 = vrot.slane %v5090_v6, %v9021_v26  ;;  %v4531_v19 = vcombine.high %v4502_v10, %v4502_v10  ;;  %v8037_v44 = vpop.f32.mrb[33].mxu0  ;;  %v8072_v35 = vpop.f32.mrb[35].mxu1  ;;  %v4538_v40 = vrot.slane %v4502_v10, %v9021_v26 }
 0x435   :  { %v11725_v54 = vrot.slane %v5091_v23, %v9021_v26  ;;  %v5131_v55 = vrot.slane %v4928_v33, %v9021_v26 }
 0x436   :  { %v11730_v50 = vrot.slane %v5092_v15, %v9021_v26  ;;  %v4545_v37 = vrot.slane %v4531_v19, %v9021_v26  ;;  %v4546_v32 = vcombine.high %v4538_v40, %v4538_v40  ;;  %v4554_v43 = vrot.slane %v4538_v40, %v9021_v26 }
 0x437   :  { %v5132_v16 = vcombine.high %v5131_v55, %v5131_v55  ;;  %v4507_v36 = vpop.f32.mrb[34].mxu0  ;;  %v5346_v29 = vpop.f32.mrb[36].mxu1  ;;  %v11744_v61 = vrot.slane %v5131_v55, %v9021_v26 }
 0x438   :  { %v4547_v9 = vcombine.high %v4545_v37, %v4545_v37  ;;  %v4561_v45 = vrot.slane %v4545_v37, %v9021_v26  ;;  %v8040_v6 = vpop.f32.mrb[35].mxu0  ;;  %v8083_v23 = vpop.f32.mrb[37].mxu1  ;;  %v4568_v10 = vrot.slane %v4546_v32, %v9021_v26  ;;  %v4576_v33 = vcombine.high %v4554_v43, %v4554_v43 }
 0x439   :  { %v5180_v15 = vadd.f32 %v11639_v3, %v4554_v43  ;;  %v11749_v19 = vrot.slane %v5132_v16, %v9021_v26  ;;  %v4580_v11 = vcombine.high %v4507_v36, %v4507_v36 }
 0x43a   :  { %v4575_v44 = vrot.slane %v4547_v9, %v9021_v26  ;;  %v4577_v35 = vcombine.high %v4561_v45, %v4561_v45  ;;  %v5184_v40 = vadd.f32 %v11642_v20, %v4561_v45  ;;  %v4578_v55 = vcombine.high %v4568_v10, %v4568_v10 }
 0x43b   :  { %v5181_v6 = vadd.f32 %v11665_v4, %v4568_v10  ;;  %v5182_v23 = vadd.f32 %v4982_v62, %v4576_v33  ;;  %v11756_v32 = vpop.f32.mrb[36].mxu0  ;;  %v11758_v60 = vpop.f32.mrb[38].mxu1  ;;  %v4587_v9 = vrot.slane %v4507_v36, %v9021_v26  ;;  %v4594_v4 = vrot.slane %v4580_v11, %v9021_v26 }
 0x43c   :  { %v4579_v3 = vcombine.high %v4575_v44, %v4575_v44  ;;  %v5185_v43 = vadd.f32 %v11668_v12, %v4575_v44  ;;  %v5186_v16 = vadd.f32 %v4983_v49, %v4577_v35  ;;  %v8043_v45 = vpop.f32.mrb[37].mxu0  ;;  %v8086_v37 = vpop.f32.mrb[39].mxu1  ;;  %v5183_v5 = vadd.f32 %v4984_v7, %v4578_v55 }
 0x43d   :  { %v5375_v62 = vcombine.high %v5346_v29, %v5346_v29  ;;  %v5382_v10 = vrot.slane %v5346_v29, %v9021_v26  ;;  %v4595_v27 = vcombine.high %v4587_v9, %v4587_v9  ;;  %v4603_v44 = vrot.slane %v4587_v9, %v9021_v26 }
 0x43e   :  { %v5187_v33 = vadd.f32 %v4985_v51, %v4579_v3  ;;  %v4629_v20 = vcombine.high %v11756_v32, %v11756_v32  ;;  %v4596_v49 = vcombine.high %v4594_v4, %v4594_v4  ;;  %v4610_v36 = vrot.slane %v4594_v4, %v9021_v26 }
 0x43f   :  { %v5389_v7 = vrot.slane %v5375_v62, %v9021_v26  ;;  %v5390_v35 = vcombine.high %v5382_v10, %v5382_v10  ;;  %v11775_v11 = vpop.f32.mrb[38].mxu0  ;;  %v11777_v37 = vpop.f32.mrb[40].mxu1  ;;  %v4617_v29 = vrot.slane %v4595_v27, %v9021_v26  ;;  %v4625_v12 = vcombine.high %v4603_v44, %v4603_v44 }
 0x440   :  { %v11781_v51 = vadd.f32 %v11671_v63, %v4603_v44  ;;  %v5398_v55 = vrot.slane %v5382_v10, %v9021_v26  ;;  %v8046_v3 = vpop.f32.mrb[39].mxu0  ;;  %v8089_v9 = vpop.f32.mrb[41].mxu1  ;;  %v4624_v45 = vrot.slane %v4596_v49, %v9021_v26  ;;  %v4626_v4 = vcombine.high %v4610_v36, %v4610_v36 }
 0x441   :  { %v11786_v62 = vadd.f32 %v11674_v22, %v4610_v36  ;;  %v5391_v0 = vcombine.high %v5389_v7, %v5389_v7  ;;  %v4627_v57 = vcombine.high %v4617_v29, %v4617_v29  ;;  %v11789_v38 = vadd.f32 %v11677_v25, %v4617_v29 }
 0x442   :  { %v11794_v27 = vadd.f32 %v5031_v59, %v4625_v12  ;;  %v5405_v10 = vrot.slane %v5389_v7, %v9021_v26  ;;  %v4628_v44 = vcombine.high %v4624_v45, %v4624_v45  ;;  %v11798_v3 = vadd.f32 %v11685_v41, %v4624_v45 }
 0x443   :  { %v11803_v49 = vadd.f32 %v5032_v18, %v4626_v4  ;;  %v5412_v36 = vrot.slane %v5390_v35, %v9021_v26  ;;  %v11806_v29 = vpop.f32.mrb[40].mxu0  ;;  %v11808_v9 = vpop.f32.mrb[42].mxu1  ;;  %v11813_v63 = vadd.f32 %v5033_v53, %v4627_v57  ;;  %v5419_v59 = vrot.slane %v5391_v0, %v9021_v26 }
 0x444   :  { %v5420_v7 = vcombine.high %v5398_v55, %v5398_v55  ;;  %v5421_v12 = vcombine.high %v5405_v10, %v5405_v10  ;;  %v8049_v45 = vpop.f32.mrb[41].mxu0  ;;  %v8092_v1 = vpop.f32.mrb[43].mxu1  ;;  %v11819_v22 = vadd.f32 %v5034_v56, %v4628_v44  ;;  %v5618_v35 = vadd.f32 %v5398_v55, %v5180_v15 }
 0x445   :  { %v5422_v18 = vcombine.high %v5412_v36, %v5412_v36  ;;  %v5619_v4 = vadd.f32 %v5412_v36, %v5181_v6  ;;  %v5423_v52 = vcombine.high %v5419_v59, %v5419_v59  ;;  %v5622_v24 = vadd.f32 %v5405_v10, %v5184_v40 }
 0x446   :  { %v5620_v28 = vadd.f32 %v5420_v7, %v5182_v23  ;;  %v5623_v25 = vadd.f32 %v5419_v59, %v5185_v43  ;;  %v5624_v57 = vadd.f32 %v5421_v12, %v5186_v16  ;;  %v5713_v0 = vadd.f32 %v11618_v14, %v5618_v35 }
 0x447   :  { %v5621_v53 = vadd.f32 %v5422_v18, %v5183_v5  ;;  %v5714_v21 = vadd.f32 %v11624_v48, %v5619_v4  ;;  %v11823_v45 = vpop.f32.mrb[44].mxu1  ;;  %v5625_v1 = vadd.f32 %v5423_v52, %v5187_v33  ;;  %v5717_v56 = vadd.f32 %v11621_v46, %v5622_v24 }
 0x448   :  { %v5715_v41 = vadd.f32 %v11632_v42, %v5620_v28  ;;  %v5718_v15 = vadd.f32 %v11627_v31, %v5623_v25  ;;  %v8095_v6 = vpop.f32.mrb[45].mxu1  ;;  %v5719_v40 = vadd.f32 %v11636_v2, %v5624_v57  ;;  %v4636_v43 = vrot.slane %v11756_v32, %v9021_v26 }
 0x449   :  { %v5716_v23 = vadd.f32 %v11648_v8, %v5621_v53  ;;  %v5753_v5 = vcombine.low %v5713_v0, %v5714_v21  ;;  %v5720_v16 = vadd.f32 %v11652_v39, %v5625_v1  ;;  %v4643_v52 = vrot.slane %v4629_v20, %v9021_v26 }
 0x44a   :  { %v5918_v55 = vcombine.low %v5717_v56, %v5718_v15  ;;  %v5424_v28 = vcombine.high %v11758_v60, %v11758_v60  ;;  %v4644_v10 = vcombine.high %v4636_v43, %v4636_v43  ;;  %v5431_v44 = vrot.slane %v11758_v60, %v9021_v26 }
 0x44b   :  { %v5754_v24 = vcombine.low %v5715_v41, %v5716_v23  ;;  %v5761_v33 = vrot.slane %v5753_v5, %v9021_v26  ;;  %v5919_v36 = vcombine.low %v5719_v40, %v5720_v16  ;;  %v4645_v32 = vcombine.high %v4643_v52, %v4643_v52 }
 0x44c   :  { %v11840_v21 = vrot.slane %v5918_v55, %v9021_v26  ;;  %v4652_v59 = vrot.slane %v4643_v52, %v9021_v26  ;;  %v4659_v20 = vrot.slane %v4644_v10, %v9021_v26  ;;  %v5438_v12 = vrot.slane %v5424_v28, %v9021_v26 }
 0x44d   :  { %v5768_v7 = vrot.slane %v5754_v24, %v9021_v26  ;;  %v5439_v18 = vcombine.high %v5431_v44, %v5431_v44  ;;  %v11847_v35 = vrot.slane %v5919_v36, %v9021_v26  ;;  %v4666_v4 = vrot.slane %v4645_v32, %v9021_v26 }
 0x44e   :  { %v4667_v60 = vcombine.high %v4652_v59, %v4652_v59  ;;  %v11851_v25 = vadd.f32 %v11690_v34, %v4652_v59  ;;  %v4668_v57 = vcombine.high %v4659_v20, %v4659_v20  ;;  %v5440_v0 = vcombine.high %v5438_v12, %v5438_v12 }
 0x44f   :  { %v5769_v53 = vcombine.low %v5761_v33, %v5768_v7  ;;  %v5447_v1 = vrot.slane %v5431_v44, %v9021_v26  ;;  %v5934_v41 = vcombine.low %v11840_v21, %v11847_v35  ;;  %v4669_v56 = vcombine.high %v4666_v4, %v4666_v4 }
 0x450   :  { %v11857_v15 = vadd.f32 %v11707_v13, %v4666_v4  ;;  %v12419_v6 = vcombine.high %v11690_v34, %v11690_v34  ;;  %v12420_v5 = vcombine.high %v11693_v17, %v11693_v17  ;;  %v5454_v16 = vrot.slane %v5438_v12, %v9021_v26 }
 0x451   :  { %v11865_v40 = vrot.slane %v5769_v53, %v9021_v26  ;;  %v5461_v55 = vrot.slane %v5439_v18, %v9021_v26  ;;  %v12421_v52 = vcombine.high %v11707_v13, %v11707_v13  ;;  %v5468_v34 = vrot.slane %v5440_v0, %v9021_v26 }
 0x452   :  { %v11862_v23 = vadd.f32 %v12419_v6, %v4667_v60  ;;  %v11870_v43 = vadd.f32 %v12420_v5, %v4668_v57  ;;  %v5469_v24 = vcombine.high %v5447_v1, %v5447_v1  ;;  %v5626_v33 = vadd.f32 %v5447_v1, %v11781_v51 }
 0x453   :  { %v11877_v28 = vadd.f32 %v12421_v52, %v4669_v56  ;;  %v5470_v10 = vcombine.high %v5454_v16, %v5454_v16  ;;  %v5471_v44 = vcombine.high %v5461_v55, %v5461_v55  ;;  %v5627_v17 = vadd.f32 %v5461_v55, %v11789_v38 }
 0x454   :  { %v5630_v36 = vadd.f32 %v5454_v16, %v11786_v62  ;;  %v5472_v32 = vcombine.high %v5468_v34, %v5468_v34  ;;  %v5628_v59 = vadd.f32 %v5469_v24, %v11794_v27  ;;  %v5631_v7 = vadd.f32 %v5468_v34, %v11798_v3 }
 0x455   :  { %v5721_v13 = vadd.f32 %v11618_v14, %v5626_v33  ;;  %v5629_v20 = vadd.f32 %v5471_v44, %v11813_v63  ;;  %v5632_v12 = vadd.f32 %v5470_v10, %v11803_v49  ;;  %v5722_v18 = vadd.f32 %v11624_v48, %v5627_v17 }
 0x456   :  { %v5725_v51 = vadd.f32 %v11621_v46, %v5630_v36  ;;  %v5633_v4 = vadd.f32 %v5472_v32, %v11819_v22  ;;  %v5723_v38 = vadd.f32 %v11632_v42, %v5628_v59  ;;  %v5726_v62 = vadd.f32 %v11627_v31, %v5631_v7 }
 0x457   :  { %v4670_v27 = vcombine.high %v11775_v11, %v11775_v11  ;;  %v5724_v3 = vadd.f32 %v11648_v8, %v5629_v20  ;;  %v5727_v60 = vadd.f32 %v11636_v2, %v5632_v12  ;;  %v6082_v63 = vcombine.low %v5721_v13, %v5722_v18 }
 0x458   :  { %v4677_v49 = vrot.slane %v11775_v11, %v9021_v26  ;;  %v5728_v53 = vadd.f32 %v11652_v39, %v5633_v4  ;;  %v6246_v57 = vcombine.low %v5725_v51, %v5726_v62  ;;  %v5473_v0 = vcombine.high %v11777_v37, %v11777_v37 }
 0x459   :  { %v4684_v22 = vrot.slane %v4670_v27, %v9021_v26  ;;  %v6083_v1 = vcombine.low %v5723_v38, %v5724_v3  ;;  %v11904_v56 = vrot.slane %v6082_v63, %v9021_v26  ;;  %v12422_v20 = vcombine.high %v11715_v47, %v11715_v47 }
 0x45a   :  { %v4685_v6 = vcombine.high %v4677_v49, %v4677_v49  ;;  %v4693_v5 = vrot.slane %v4677_v49, %v9021_v26  ;;  %v6247_v16 = vcombine.low %v5727_v60, %v5728_v53  ;;  %v11908_v55 = vrot.slane %v6246_v57, %v9021_v26 }
 0x45b   :  { %v4686_v11 = vcombine.high %v4684_v22, %v4684_v22  ;;  %v4700_v52 = vrot.slane %v4684_v22, %v9021_v26  ;;  %v11912_v34 = vrot.slane %v6083_v1, %v9021_v26  ;;  %v12423_v38 = vcombine.high %v11720_v58, %v11720_v58 }
 0x45c   :  { %v4707_v24 = vrot.slane %v4685_v6, %v9021_v26  ;;  %v4715_v33 = vcombine.high %v4693_v5, %v4693_v5  ;;  %v5201_v10 = vadd.f32 %v11715_v47, %v4693_v5  ;;  %v11917_v44 = vrot.slane %v6247_v16, %v9021_v26 }
 0x45d   :  { %v4714_v17 = vrot.slane %v4686_v11, %v9021_v26  ;;  %v4716_v36 = vcombine.high %v4700_v52, %v4700_v52  ;;  %v5205_v32 = vadd.f32 %v11720_v58, %v4700_v52  ;;  %v6098_v59 = vcombine.low %v11904_v56, %v11912_v34 }
 0x45e   :  { %v4717_v7 = vcombine.high %v4707_v24, %v4707_v24  ;;  %v5202_v13 = vadd.f32 %v11725_v54, %v4707_v24  ;;  %v5203_v12 = vadd.f32 %v12422_v20, %v4715_v33  ;;  %v6262_v18 = vcombine.low %v11908_v55, %v11917_v44 }
 0x45f   :  { %v4718_v51 = vcombine.high %v4714_v17, %v4714_v17  ;;  %v5206_v4 = vadd.f32 %v11730_v50, %v4714_v17  ;;  %v5207_v62 = vadd.f32 %v12423_v38, %v4716_v36  ;;  %v12424_v27 = vcombine.high %v11725_v54, %v11725_v54 }
 0x460   :  { %v5480_v60 = vrot.slane %v11777_v37, %v9021_v26  ;;  %v5487_v47 = vrot.slane %v5473_v0, %v9021_v26  ;;  %v4725_v63 = vrot.slane %v11806_v29, %v9021_v26  ;;  %v12425_v49 = vcombine.high %v11730_v50, %v11730_v50 }
 0x461   :  { %v5204_v3 = vadd.f32 %v12424_v27, %v4717_v7  ;;  %v5514_v58 = vcombine.high %v11808_v9, %v11808_v9  ;;  %v5521_v57 = vrot.slane %v11808_v9, %v9021_v26  ;;  %v11950_v54 = vrot.slane %v11823_v45, %v9021_v26 }
 0x462   :  { %v5208_v53 = vadd.f32 %v12425_v49, %v4718_v51  ;;  %v5488_v37 = vcombine.high %v5480_v60, %v5480_v60  ;;  %v5489_v22 = vcombine.high %v5487_v47, %v5487_v47  ;;  %v5496_v0 = vrot.slane %v5487_v47, %v9021_v26 }
 0x463   :  { %v4726_v1 = vcombine.high %v4725_v63, %v4725_v63  ;;  %v4733_v29 = vrot.slane %v4725_v63, %v9021_v26  ;;  %v5528_v50 = vrot.slane %v5514_v58, %v9021_v26  ;;  %v5529_v6 = vcombine.high %v5521_v57, %v5521_v57 }
 0x464   :  { %v5537_v5 = vrot.slane %v5521_v57, %v9021_v26  ;;  %v5503_v16 = vrot.slane %v5488_v37, %v9021_v26  ;;  %v5510_v9 = vrot.slane %v5489_v22, %v9021_v26  ;;  %v5511_v11 = vcombine.high %v5496_v0, %v5496_v0 }
 0x465   :  { %v5635_v45 = vadd.f32 %v5496_v0, %v11851_v25  ;;  %v4740_v52 = vrot.slane %v4726_v1, %v9021_v26  ;;  %v4741_v24 = vcombine.high %v4733_v29, %v4733_v29  ;;  %v5209_v33 = vadd.f32 %v11744_v61, %v4733_v29 }
 0x466   :  { %v5530_v17 = vcombine.high %v5528_v50, %v5528_v50  ;;  %v5512_v36 = vcombine.high %v5503_v16, %v5503_v16  ;;  %v5513_v7 = vcombine.high %v5510_v9, %v5510_v9  ;;  %v5636_v20 = vadd.f32 %v5510_v9, %v11857_v15 }
 0x467   :  { %v5637_v51 = vadd.f32 %v5511_v11, %v11862_v23  ;;  %v5730_v38 = vadd.f32 %v11624_v48, %v5635_v45  ;;  %v5210_v27 = vadd.f32 %v11749_v19, %v4740_v52  ;;  %v12426_v60 = vcombine.high %v11744_v61, %v11744_v61 }
 0x468   :  { %v5544_v47 = vrot.slane %v5528_v50, %v9021_v26  ;;  %v5634_v63 = vadd.f32 %v5512_v36, %v11870_v43  ;;  %v5638_v49 = vadd.f32 %v5513_v7, %v11877_v28  ;;  %v5731_v58 = vadd.f32 %v11632_v42, %v5636_v20 }
 0x469   :  { %v5211_v25 = vadd.f32 %v12426_v60, %v4741_v24  ;;  %v5732_v15 = vadd.f32 %v11648_v8, %v5637_v51  ;;  %v5551_v23 = vrot.slane %v5529_v6, %v9021_v26  ;;  %v5558_v57 = vrot.slane %v5530_v17, %v9021_v26 }
 0x46a   :  { %v5559_v19 = vcombine.high %v5537_v5, %v5537_v5  ;;  %v5560_v37 = vcombine.high %v5544_v47, %v5544_v47  ;;  %v5729_v61 = vadd.f32 %v11618_v14, %v5634_v63  ;;  %v5639_v0 = vadd.f32 %v5537_v5, %v5201_v10 }
 0x46b   :  { %v5778_v22 = vcombine.low %v5731_v58, %v5732_v15  ;;  %v5643_v1 = vadd.f32 %v5544_v47, %v5205_v32  ;;  %v5561_v29 = vcombine.high %v5551_v23, %v5551_v23  ;;  %v5562_v43 = vcombine.high %v5558_v57, %v5558_v57 }
 0x46c   :  { %v5640_v50 = vadd.f32 %v5551_v23, %v5202_v13  ;;  %v5641_v28 = vadd.f32 %v5559_v19, %v5203_v12  ;;  %v5777_v16 = vcombine.low %v5729_v61, %v5730_v38  ;;  %v5644_v11 = vadd.f32 %v5558_v57, %v5206_v4 }
 0x46d   :  { %v5792_v9 = vrot.slane %v5778_v22, %v9021_v26  ;;  %v5645_v45 = vadd.f32 %v5560_v37, %v5207_v62  ;;  %v5642_v52 = vadd.f32 %v5561_v29, %v5204_v3  ;;  %v5646_v6 = vadd.f32 %v5562_v43, %v5208_v53 }
 0x46e   :  { %v5733_v24 = vadd.f32 %v11621_v46, %v5638_v49  ;;  %v5734_v17 = vadd.f32 %v11627_v31, %v5639_v0  ;;  %v5785_v36 = vrot.slane %v5777_v16, %v9021_v26  ;;  %v5735_v10 = vadd.f32 %v11636_v2, %v5640_v50 }
 0x46f   :  { %v5736_v32 = vadd.f32 %v11652_v39, %v5641_v28  ;;  %v5738_v13 = vadd.f32 %v11624_v48, %v5643_v1  ;;  %v5737_v12 = vadd.f32 %v11618_v14, %v5642_v52  ;;  %v5739_v5 = vadd.f32 %v11632_v42, %v5644_v11 }
 0x470   :  { %v5740_v4 = vadd.f32 %v11648_v8, %v5645_v45  ;;  %v5942_v62 = vcombine.low %v5733_v24, %v5734_v17  ;;  %v5793_v3 = vcombine.low %v5785_v36, %v5792_v9  ;;  %v5570_v7 = vcombine.high %v11950_v54, %v11950_v54 }
 0x471   :  { %v5943_v53 = vcombine.low %v5735_v10, %v5736_v32  ;;  %v5577_v20 = vrot.slane %v11950_v54, %v9021_v26  ;;  %v6106_v38 = vcombine.low %v5737_v12, %v5738_v13  ;;  %v5741_v48 = vadd.f32 %v11621_v46, %v5646_v6 }
 0x472   :  { %v5950_v51 = vrot.slane %v5942_v62, %v9021_v26  ;;  %v6107_v60 = vcombine.low %v5739_v5, %v5740_v4  ;;  %v5800_v14 = vrot.slane %v5793_v3, %v9021_v26  ;;  %v5584_v8 = vrot.slane %v5570_v7, %v9021_v26 }
 0x473   :  { %v5957_v42 = vrot.slane %v5943_v53, %v9021_v26  ;;  %v5585_v47 = vcombine.high %v5577_v20, %v5577_v20  ;;  %v6114_v63 = vrot.slane %v6106_v38, %v9021_v26  ;;  %v5647_v58 = vadd.f32 %v5577_v20, %v5209_v33  ;;  %v6901_v20 = vld [vmem:[%s12171_s8 + $0x980] sm:$0xff] }
 0x474   :  { %v6121_v49 = vrot.slane %v6107_v60, %v9021_v26  ;;  %v5804_v54 = vsel %vm5803_vm13, %v11865_v40, -inf  ;;  %v5648_v23 = vadd.f32 %v5584_v8, %v5210_v27  ;;  %v5811_v61 = vsel %vm5803_vm13, %v5800_v14, -inf }
 0x475   :  { %v5958_v15 = vcombine.low %v5950_v51, %v5957_v42  ;;  %v5649_v57 = vadd.f32 %v5585_v47, %v5211_v25  ;;  %v5805_v19 = vrot.slane %v5804_v54, 4  ;;  %v5742_v37 = vadd.f32 %v11627_v31, %v5647_v58  ;;  %v6902_v51 = vld [vmem:[%s12171_s8 + $0x988] sm:$0xff]  ;;  %v6888_v58 = vld [vmem:[%s12171_s8 + $0x918] sm:$0xff] }
 0x476   :  { %v6122_v46 = vcombine.low %v6114_v63, %v6121_v49  ;;  %v5941_v22 = vrot.slane %v5934_v41, %v9021_v26  ;;  %v5743_v33 = vadd.f32 %v11636_v2, %v5648_v23  ;;  %v5812_v25 = vrot.slane %v5811_v61, 4  ;;  %v6887_v49 = vld [vmem:[%s12171_s8 + $0x910] sm:$0xff] }
 0x477   :  { %v5965_v0 = vrot.slane %v5958_v15, %v9021_v26  ;;  %v5744_v40 = vadd.f32 %v11652_v39, %v5649_v57  ;;  %v5806_v1 = vmax.f32 %v5804_v54, %v5805_v19  ;;  %v6270_v27 = vcombine.low %v5741_v48, %v5742_v37  ;;  %v6903_v37 = vld [vmem:[%s12171_s8 + $0x990] sm:$0xff] }
 0x478   :  { %v5968_v29 = vsel %vm5803_vm13, %v5941_v22, -inf  ;;  %v6105_v31 = vrot.slane %v6098_v59, %v9021_v26  ;;  %v5813_v2 = vmax.f32 %v5811_v61, %v5812_v25  ;;  %v6129_v39 = vrot.slane %v6122_v46, %v9021_v26  ;;  %v6904_v61 = vld [vmem:[%s12171_s8 + $0x998] sm:$0xff] }
 0x479   :  { %v6271_v43 = vcombine.low %v5743_v33, %v5744_v40  ;;  %v5807_v50 = vrot.slane %v5806_v1, 2  ;;  %v5969_v21 = vrot.slane %v5968_v29, 4  ;;  %v5975_v35 = vsel %vm5803_vm13, %v5965_v0, -inf  ;;  %v12427_v33 = vld [vmem:[#allocation73_spill] sm:$0xff] }
 0x47a   :  { %v6278_v41 = vrot.slane %v6270_v27, %v9021_v26  ;;  %v5976_v28 = vrot.slane %v5975_v35, 4  ;;  %v6132_v45 = vsel %vm5803_vm13, %v6105_v31, -inf  ;;  %v5814_v52 = vrot.slane %v5813_v2, 2 }
 0x47b   :  { %v6285_v16 = vrot.slane %v6271_v43, %v9021_v26  ;;  %v5808_v9 = vmax.f32 %v5806_v1, %v5807_v50  ;;  %v5970_v11 = vmax.f32 %v5968_v29, %v5969_v21  ;;  %v6133_v34 = vrot.slane %v6132_v45, 4  ;;  %v6889_v43 = vld [vmem:[%s12171_s8 + $0x920] sm:$0xff]  ;;  %v6890_v50 = vld [vmem:[%s12171_s8 + $0x928] sm:$0xff] }
 0x47c   :  { %v5977_v56 = vmax.f32 %v5975_v35, %v5976_v28  ;;  %v6139_v59 = vsel %vm5803_vm13, %v6129_v39, -inf  ;;  %v5815_v10 = vmax.f32 %v5813_v2, %v5814_v52  ;;  %v6269_v12 = vrot.slane %v6262_v18, %v9021_v26  ;;  %v6905_v28 = vld [vmem:[%s12171_s8 + $0x9a0] sm:$0xff]  ;;  %v6906_v39 = vld [vmem:[%s12171_s8 + $0x9a8] sm:$0xff]  ;;  %v6891_v52 = vld [vmem:[%s12171_s8 + $0x930] sm:$0xff] }
 0x47d   :  { %v6286_v6 = vcombine.low %v6278_v41, %v6285_v16  ;;  %v5809_v24 = vrot.slane %v5808_v9, 1  ;;  %v5971_v17 = vrot.slane %v5970_v11, 2  ;;  %v6140_v36 = vrot.slane %v6139_v59, 4 }
 0x47e   :  { %v5978_v32 = vrot.slane %v5977_v56, 2  ;;  %v6134_v13 = vmax.f32 %v6132_v45, %v6133_v34  ;;  %v5816_v53 = vrot.slane %v5815_v10, 1  ;;  %v6296_v60 = vsel %vm5803_vm13, %v6269_v12, -inf }
 0x47f   :  { %v6293_v5 = vrot.slane %v6286_v6, %v9021_v26  ;;  %v5810_v4 = vmax.f32 %v5808_v9, %v5809_v24  ;;  %v5972_v62 = vmax.f32 %v5970_v11, %v5971_v17  ;;  %v6141_v3 = vmax.f32 %v6139_v59, %v6140_v36  ;;  %v6907_v24 = vld [vmem:[%s12171_s8 + $0x9b0] sm:$0xff]  ;;  %v6908_v17 = vld [vmem:[%s12171_s8 + $0x9b8] sm:$0xff] }
 0x480   :  { %v5979_v7 = vmax.f32 %v5977_v56, %v5978_v32  ;;  %v6135_v38 = vrot.slane %v6134_v13, 2  ;;  %v6297_v18 = vrot.slane %v6296_v60, 4  ;;  %v5817_v48 = vmax.f32 %v5815_v10, %v5816_v53  ;;  %v6892_v56 = vld [vmem:[%s12171_s8 + $0x938] sm:$0xff]  ;;  %v6893_v32 = vld [vmem:[%s12171_s8 + $0x940] sm:$0xff] }
 0x481   :  { %v5973_v55 = vrot.slane %v5972_v62, 1  ;;  %v6142_v44 = vrot.slane %v6141_v3, 2  ;;  %v6303_v26 = vsel %vm5803_vm13, %v6293_v5, -inf  ;;  %v8751_v63 = vpack.c.bf16 %v6902_v51, %v6901_v20  ;;  %v6909_v5 = vld [vmem:[%s12171_s8 + $0x9c0] sm:$0xff]  ;;  %v6896_v53 = vld [vmem:[%s12171_s8 + $0x958] sm:$0xff]  ;;  %v6911_v20 = vld [vmem:[%s12171_s8 + $0x9d0] sm:$0xff] }
 0x482   :  { %v5980_v14 = vrot.slane %v5979_v7, 1  ;;  %v6136_v42 = vmax.f32 %v6134_v13, %v6135_v38  ;;  %v6304_v8 = vrot.slane %v6303_v26, 4  ;;  %v6298_v15 = vmax.f32 %v6296_v60, %v6297_v18  ;;  %v6894_v13 = vld [vmem:[%s12171_s8 + $0x948] sm:$0xff]  ;;  %v6912_v51 = vld [vmem:[%s12171_s8 + $0x9d8] sm:$0xff]  ;;  %v6897_v60 = vld [vmem:[%s12171_s8 + $0x960] sm:$0xff] }
 0x483   :  { %v5974_v47 = vmax.f32 %v5972_v62, %v5973_v55  ;;  %v6143_v54 = vmax.f32 %v6141_v3, %v6142_v44  ;;  %v5837_v23 = vsel %vm1808_vm4, %v5817_v48, %v5810_v4  ;;  %v12428_v40 = vpack.c.bf16 %v11662_v30, %v12427_v33  ;;  %v6910_v4 = vld [vmem:[%s12171_s8 + $0x9c8] sm:$0xff]  ;;  %v6895_v3 = vld [vmem:[%s12171_s8 + $0x950] sm:$0xff]  ;;  %v6913_v18 = vld [vmem:[%s12171_s8 + $0x9e0] sm:$0xff] }
 0x484   :  { %v5981_v57 = vmax.f32 %v5979_v7, %v5980_v14  ;;  %v6137_v19 = vrot.slane %v6136_v42, 1  ;;  %v6305_v46 = vmax.f32 %v6303_v26, %v6304_v8  ;;  %8129 = vmatmul.mubr.f32.vlgmr.msra.gmra.mrb[42].mxu0 %v5837_v23  ;;  %v6299_v0 = vrot.slane %v6298_v15, 2  ;;  %v6898_v55 = vld [vmem:[%s12171_s8 + $0x968] sm:$0xff]  ;;  %v6899_v14 = vld [vmem:[%s12171_s8 + $0x970] sm:$0xff] }
 0x485   :  { %v6144_v22 = vrot.slane %v6143_v54, 1  ;;  %8728 = vmatpush3.bf16.msra.mxu0 %v12428_v40  ;;  %v8730_v27 = vpack.c.bf16 %v6888_v58, %v6887_v49  ;;  %v12429_v25 = vmov 0.0   ;;  %v12430_v31 = vmov 0.0|0.0   ;;  %v6914_v26 = vld [vmem:[%s12171_s8 + $0x9e8] sm:$0xff]  ;;  %v6917_v40 = vld [vmem:[%s12172_s9] ss:$0 sm:$0xff] }
 0x486   :  { %v6001_v1 = vsel %vm1808_vm4, %v5981_v57, %v5974_v47  ;;  %8198 = vmatprep.mubr.msk.f32.mxu0 %vm8860_vm2, %v12429_v25  ;;  %v6306_v29 = vrot.slane %v6305_v46, 2  ;;  %8729 = vmatprep.subr.bf16.mxu0 %v12430_v31  ;;  %v6138_v30 = vmax.f32 %v6136_v42, %v6137_v19  ;;  %v6300_v35 = vmax.f32 %v6298_v15, %v6299_v0  ;;  %v6900_v42 = vld [vmem:[%s12171_s8 + $0x978] sm:$0xff]  ;;  %v6915_v47 = vld [vmem:[%s12171_s8 + $0x9f0] sm:$0xff]  ;;  %s6430_s9 = sshll.u32 %s8862_s1, 4  ;;  %s6431_s9 = int_to_ptr.vmem [resolvable:$true] %s6430_s9 }
 0x487   :  { %8164 = vmatmul.mubr.f32.vlgmr.msra.gmra.mrb[46].mxu1 %v6001_v1  ;;  %v6145_v21 = vmax.f32 %v6143_v54, %v6144_v22  ;;  %v8754_v41 = vpack.c.bf16 %v6904_v61, %v6903_v37  ;;  %v8733_v11 = vpack.c.bf16 %v6890_v50, %v6889_v43  ;;  %v8757_v34 = vpack.c.bf16 %v6906_v39, %v6905_v28  ;;  %v12431_v15 = vld [vmem:[#allocation74_spill] sm:$0xff]  ;;  %s8831_s22 = scalar_lea.vmem %s6431_s9, 32  ;;  %p8836_p6 = scmp.lt.s32.totalorder %s6431_s9, %s6431_s9 }
 0x488   :  { %8752 = vmatpush3.bf16.msra.mxu1 %v8751_v63  ;;  %8233 = vmatprep.mubr.msk.f32.mxu1 %vm8860_vm2, %v12429_v25  ;;  %v6307_v2 = vmax.f32 %v6305_v46, %v6306_v29  ;;  %v6301_v9 = vrot.slane %v6300_v35, 1  ;;  %v8736_v36 = vpack.c.bf16 %v6892_v56, %v6891_v52  ;;  %v8760_v12 = vpack.c.bf16 %v6908_v17, %v6907_v24  ;;  %v6916_v63 = vld [vmem:[%s12171_s8 + $0x9f8] sm:$0xff]  ;;  %p8832_p5 = scmp.ne.s32.totalorder %s6431_s9, %s8831_s22  ;;  %p8837_p7 = scmp.lt.s32.totalorder %s8831_s22, %s8831_s22 }
 0x489   :  { %8753 = vmatprep.subr.bf16.mxu1 %v12430_v31  ;;  %v12068_v16 = vsel %vm1808_vm4, %v6145_v21, %v6138_v30  ;;  %8731 = vmatpush3.bf16.msra.mxu0 %v8730_v27  ;;  %v8739_v62 = vpack.c.bf16 %v6894_v13, %v6893_v32  ;;  %v8763_v7 = vpack.c.bf16 %v6910_v4, %v6909_v5 }
 0x48a   :  { %v6308_v45 = vrot.slane %v6307_v2, 1  ;;  %8732 = vmatprep.subr.bf16.mxu0 %v12430_v31  ;;  %v6302_v59 = vmax.f32 %v6300_v35, %v6301_v9  ;;  %v8742_v38 = vpack.c.bf16 %v6896_v53, %v6895_v3  ;;  %v8766_v44 = vpack.c.bf16 %v6912_v51, %v6911_v20  ;;  %p8838_p8 = por %p8837_p7, %p8836_p6 }
 0x48b   :  { %v8745_v48 = vpack.c.bf16 %v6898_v55, %v6897_v60  ;;  %v8769_v8 = vpack.c.bf16 %v6914_v26, %v6913_v18  ;;  %v8748_v49 = vpack.c.bf16 %v6900_v42, %v6899_v14  ;;  %v8772_v58 = vpack.c.bf16 %v6916_v63, %v6915_v47 }
 0x48c   :  { %8755 = vmatpush3.bf16.msra.mxu1 %v8754_v41  ;;  %v6309_v6 = vmax.f32 %v6307_v2, %v6308_v45  ;;  %p8839_p9 = pnand %p8838_p8, %p8832_p5 }
 0x48d   :  { %8756 = vmatprep.subr.bf16.mxu1 %v12430_v31  ;;  %8734 = vmatpush3.bf16.msra.mxu0 %v8733_v11 }
 0x48e   :  { %v6329_v10 = vsel %vm1808_vm4, %v6309_v6, %v6302_v59  ;;  %8735 = vmatprep.subr.bf16.mxu0 %v12430_v31 }
 0x490   :  { %8758 = vmatpush3.bf16.msra.mxu1 %v8757_v34 }
 0x491   :  { %8759 = vmatprep.subr.bf16.mxu1 %v12430_v31  ;;  %8737 = vmatpush3.bf16.msra.mxu0 %v8736_v36 }
 0x492   :  { %8738 = vmatprep.subr.bf16.mxu0 %v12430_v31 }
 0x494   :  { %8761 = vmatpush3.bf16.msra.mxu1 %v8760_v12 }
 0x495   :  { %8762 = vmatprep.subr.bf16.mxu1 %v12430_v31  ;;  %8740 = vmatpush3.bf16.msra.mxu0 %v8739_v62 }
 0x496   :  { %8741 = vmatprep.subr.bf16.mxu0 %v12430_v31 }
 0x498   :  { %8764 = vmatpush3.bf16.msra.mxu1 %v8763_v7 }
 0x499   :  { %8765 = vmatprep.subr.bf16.mxu1 %v12430_v31  ;;  %8743 = vmatpush3.bf16.msra.mxu0 %v8742_v38 }
 0x49a   :  { %8744 = vmatprep.subr.bf16.mxu0 %v12430_v31 }
 0x49c   :  { %8767 = vmatpush3.bf16.msra.mxu1 %v8766_v44 }
 0x49d   :  { %8768 = vmatprep.subr.bf16.mxu1 %v12430_v31  ;;  %8746 = vmatpush3.bf16.msra.mxu0 %v8745_v48 }
 0x49e   :  { %8747 = vmatprep.subr.bf16.mxu0 %v12430_v31 }
 0x4a0   :  { %8770 = vmatpush3.bf16.msra.mxu1 %v8769_v8 }
 0x4a1   :  { %8771 = vmatprep.subr.bf16.mxu1 %v12430_v31  ;;  %8749 = vmatpush3.bf16.msra.mxu0 %v8748_v49 }
 0x4a4   :  { %8773 = vmatpush3.bf16.msra.mxu1 %v8772_v58  ;;  %8199 = vmatmul.mubr.f32.vlgmr.msra.gmra.mrb[44].mxu0 %v12068_v16 }
 0x4a7   :  { %8234 = vmatmul.mubr.f32.vlgmr.msra.gmra.mrb[48].mxu1 %v6329_v10 }
 0x557   :  { %v5905_v54 = vpop.f32.mrb[42].mxu0 }
 0x558   :  { %v5909_v23 = vadd.f32 %v5905_v54, %v12431_v15  ;;  %v8130_v57 = vpop.f32.mrb[43].mxu0 }
 0x55a   :  { %v6069_v19 = vpop.f32.mrb[46].mxu1 }
 0x55b   :  { %v6073_v46 = vadd.f32 %v6069_v19, %v5909_v23  ;;  %v8165_v37 = vpop.f32.mrb[47].mxu1 }
 0x577   :  { %v6233_v61 = vpop.f32.mrb[44].mxu0 }
 0x578   :  { %v6237_v22 = vadd.f32 %v6233_v61, %v6073_v46  ;;  %v8200_v0 = vpop.f32.mrb[45].mxu0 }
 0x57a   :  { %v6397_v33 = vpop.f32.mrb[48].mxu1 }
 0x57b   :  { %v6401_v1 = vadd.f32 %v6397_v33, %v6237_v22  ;;  %v8235_v27 = vpop.f32.mrb[49].mxu1 }
 0x57d   :  { %v6409_v25 = vadd.f32 %v6917_v40, %v6401_v1 }
 0x57f   :  { %v6411_v29 = vsel %vm6410_vm14, %v6409_v25, -inf }
 0x580   :  { %6412 = vmax.xlane.f32.xlu0 %v6411_v29 }
 0x60d   :  { %v6413_v31 = vpop.xlane.xlu0 %6412 }
 0x60e   :  { %v6414_v43 = vsub.f32 %v6409_v25, %v6413_v31 }
 0x610   :  { %v6415_v50 = vmul.f32 1.442695, %v6414_v43 }
 0x612   :  { %8809 = vpow2.f32 %v6415_v50 }
 0x61c   :  { %v8810_v30 = vpop.eup %8809 }
 0x61d   :  { %v6417_v21 = vsel %vm6410_vm14, %v8810_v30, 0.0 }
 0x61e   :  { %6418 = vadd.xlane.f32.xlu0 %v6417_v21 }
 0x6ab   :  { %v6419_v35 = vpop.xlane.xlu0 %6418 }
 0x6ac   :  { %8811 = vlog2.f32 %v6419_v35 }
 0x6b6   :  { %v8812_v41 = vpop.eup %8811 }
 0x6b7   :  { %v6421_v2 = vmul.f32 0.6931472, %v8812_v41 }
 0x6b9   :  { %v6422_v28 = vsub.f32 %v6414_v43, %v6421_v2 }
 0x6bb   :  { %6423 = vst.msk [vmem:[#allocation5] sm:$0x3] %vm6410_vm14, %v6422_v28 }
 0x6bc   :  { %8842 = shalt.err (!%p8839_p9)
}
 0x6bd   :  { %s8843_s0 = scalar_lea.hbm %s12173_s10, 32 }
 0x6be   :  { %p8844_p10 = scmp.ne.s32.totalorder %s12173_s10, %s8843_s0  ;;  %p8847_p11 = scmp.lt.u32.totalorder %s8843_s0, %s12173_s10 }
 0x6c0   :  { %p8849_p12 = pnand %p8847_p11, %p8844_p10 }
 0x6c2   :  { %8852 = shalt.err (!%p8849_p12)
}
 0x6c3   :  { %6433 = dma.vmem_to_hbm [thread:$0]  %s6431_s9, 32, %s12173_s10, [#allocation6]  }
 0x6c4   :  { %8855 = dma.done.wait [#allocation6], 32  }
 0x6c5   :  { %8856 = vsyncadd [#allocation6], 4294967264 }
 0x6c6   :  { %6437 = vsyncpa [#allocation6], 1 }

</bundles_post_ra>
